<compile_context>
chip_gen: v7x
topology: tpu7x:2x2x1
jax: 0.10.0
libtpu: 0.0.40
codegen_flags: <defaults>
</compile_context>

<pallas_src>
import functools
import math

import jax
import jax.numpy as jnp
from jax.experimental import pallas as pl
from jax.experimental.pallas import tpu as pltpu

D_MODEL = 64
NHEAD = 8
HEAD_DIM = D_MODEL // NHEAD
FFN_DIM = 2048
LN_EPS = 1e-5
N_LAYERS = 3
_SCALE = 1.0 / math.sqrt(HEAD_DIM)


# ----------------------------------------------------------------------------
# Fused Pallas kernel: embedding + 3 encoder layers + sequence-sum + final FC
# ----------------------------------------------------------------------------
def _fused_classifier_kernel(ids_ref, emb_ref,
                             wqkv_ref, bqkv_ref, wo_ref, bo_ref,
                             g1_ref, be1_ref, w1_ref, b1_ref,
                             w2_ref, b2_ref, g2_ref, be2_ref,
                             wfc_ref, bfc_ref,
                             o_ref, *, seq_len):
    """Full classifier forward for one batch block.

    ids_ref block : (1, M, 1) int32 token ids, M = b_blk * S.
    emb_ref       : (vocab_padded, D) f32 embedding table (VMEM resident).
    Weight refs hold all N_LAYERS stacked on the leading axis; matmul weights
    (wqkv, wo, w1, w2) are bf16, biases / LN params f32 with shape (N_LAYERS, X).
    o_ref block   : (1, b_blk, out_pad) f32 (out_pad = 128-lane padded logits).
    """
    _, M, _ = ids_ref.shape
    vocab_p, D = emb_ref.shape
    S = seq_len
    b_blk = M // S
    HS = NHEAD * S

    # ---- embedding lookup, fused in-kernel ---------------------------------------
    # vocab is tiny and the table is VMEM resident, so the gather is a lane-dense
    # one-hot matmul on the MXU (removes the separate XLA gather + HBM round trip of
    # the (B, S, 64) activations).  Dropout is inference-mode identity.
    # TODO(synk): for a large vocab switch to PrefetchScalarGridSpec + pl.Element
    # row-gather of the table instead of the one-hot matmul.
    ids = ids_ref[0]                                                    # (M, 1) int32
    vcb = jax.lax.broadcasted_iota(jnp.int32, (M, vocab_p), 1)
    onehot = (vcb == ids).astype(jnp.float32)                           # (M, V)
    x = jnp.dot(onehot, emb_ref[...], preferred_element_type=jnp.float32)   # (M, D)

    # ---- constant block-diagonal "head mask" --------------------------------------
    # headmask[r, e] = 1 iff (r // S) == (e // HEAD_DIM).  Row-tiling K (resp. V)
    # NHEAD times and masking with this matrix gives a (HS, D) operand whose row
    # block h only carries head h's lanes, so a single batched matmul produces all
    # per-head score matrices side by side, and a second one produces all per-head
    # contexts already packed back into (head, dim) lane order for the Wo matmul.
    # (Group ids use a float floor; integer division is avoided on the VPU.)
    r_grp = jnp.floor((jax.lax.broadcasted_iota(jnp.int32, (HS, D), 0)
                       .astype(jnp.float32) + 0.5) * (1.0 / S))
    c_grp = jnp.floor((jax.lax.broadcasted_iota(jnp.int32, (HS, D), 1)
                       .astype(jnp.float32) + 0.5) * (1.0 / HEAD_DIM))
    headmask = (r_grp == c_grp).astype(jnp.float32)                     # (HS, D)

    for l in range(N_LAYERS):                       # static unroll over 3 layers
        # ---- multi-head self-attention (all heads / all batch rows at once) -------
        # Fused QKV projection; Q weights & bias already carry the 1/sqrt(hd) scale.
        qkv = jnp.dot(x.astype(jnp.bfloat16), wqkv_ref[l],
                      preferred_element_type=jnp.float32) + bqkv_ref[l]     # (M, 3D)
        q3 = qkv[:, 0:D].reshape(b_blk, S, D)
        k3 = qkv[:, D:2 * D].reshape(b_blk, S, D)
        v3 = qkv[:, 2 * D:3 * D].reshape(b_blk, S, D)

        kwide = jnp.concatenate([k3] * NHEAD, axis=1) * headmask        # (b, HS, D)
        vwide = jnp.concatenate([v3] * NHEAD, axis=1) * headmask        # (b, HS, D)

        # scores for every head: s[b, q, h*S + k] = <Q_h[b,q], K_h[b,k]>
        s = jnp.einsum('bqe,bre->bqr', q3, kwide,
                       preferred_element_type=jnp.float32)               # (b, S, HS)
        sf = s.reshape(M, HS)
        # per-head softmax: a per-row global max is a valid (constant within each
        # head group) stabilizer; the per-head denominator is recovered with the
        # same head mask and applied to the context.
        p = jnp.exp(sf - jnp.max(sf, axis=-1, keepdims=True))            # unnormalized
        denom = jnp.dot(p, headmask, preferred_element_type=jnp.float32)  # (M, D)

        ctx = jnp.einsum('bqr,bre->bqe',
                         p.reshape(b_blk, S, HS).astype(jnp.bfloat16),
                         vwide.astype(jnp.bfloat16),
                         preferred_element_type=jnp.float32)              # (b, S, D)
        # NOTE: approx reciprocal (EUP) deviates ~1e-3 rel. from exact softmax.
        ctx = ctx.reshape(M, D) * pl.reciprocal(denom, approx=True)
        attn = jnp.dot(ctx.astype(jnp.bfloat16), wo_ref[l],
                       preferred_element_type=jnp.float32) + bo_ref[l]

        # residual + LayerNorm 1 (post-LN)
        x = x + attn
        mu = jnp.mean(x, axis=-1, keepdims=True)
        xc = x - mu
        var = jnp.mean(xc * xc, axis=-1, keepdims=True)
        x = xc * jax.lax.rsqrt(var + LN_EPS) * g1_ref[l] + be1_ref[l]

        # ---- feed-forward (hidden dim chunked once M grows) -----------------------
        xb = x.astype(jnp.bfloat16)
        ffn_chunk = FFN_DIM if M <= 512 else 512
        y = None
        for c0 in range(0, FFN_DIM, ffn_chunk):
            h1 = jnp.dot(xb, w1_ref[l, :, c0:c0 + ffn_chunk],
                         preferred_element_type=jnp.float32) + b1_ref[l, c0:c0 + ffn_chunk]
            h1 = jnp.maximum(h1, 0.0).astype(jnp.bfloat16)               # ReLU
            yc = jnp.dot(h1, w2_ref[l, c0:c0 + ffn_chunk, :],
                         preferred_element_type=jnp.float32)
            y = yc if y is None else y + yc
        y = y + b2_ref[l]

        # residual + LayerNorm 2
        x = x + y
        mu = jnp.mean(x, axis=-1, keepdims=True)
        xc = x - mu
        var = jnp.mean(xc * xc, axis=-1, keepdims=True)
        x = xc * jax.lax.rsqrt(var + LN_EPS) * g2_ref[l] + be2_ref[l]

    # ---- epilogue: per-example sum over the sequence + final dense -----------------
    # The segment sum is a tiny lane-dense matmul (keeps the epilogue 2-D, no
    # cross-sublane reduce).  Sigmoid is NOT applied (matches the reference forward).
    seg_r = jax.lax.broadcasted_iota(jnp.int32, (b_blk, M), 0).astype(jnp.float32)
    seg_c = jnp.floor((jax.lax.broadcasted_iota(jnp.int32, (b_blk, M), 1)
                       .astype(jnp.float32) + 0.5) * (1.0 / S))
    seg = (seg_r == seg_c).astype(jnp.float32)                           # (b_blk, M)
    pooled = jnp.dot(seg, x, preferred_element_type=jnp.float32)         # (b_blk, D)
    logits = jnp.dot(pooled, wfc_ref[...],
                     preferred_element_type=jnp.float32) + bfc_ref[0]    # (b_blk, out_pad)
    o_ref[0] = logits


# ----------------------------------------------------------------------------
# Wrapper around pallas_call
# ----------------------------------------------------------------------------
def classifier_forward(text, text_lengths, params):
    """text: (B, S) int32 token ids. text_lengths unused (matches the PyTorch forward)."""
    del text_lengths  # TODO(synk): no key-padding mask, same as the reference forward.
    emb, stacked, w_fc, b_fc = params
    B, S = text.shape
    out_dim = w_fc.shape[1]
    out_pad = ((out_dim + 127) // 128) * 128   # lane-dense output (no vst.msk stores)

    # Pad the vocab axis of the embedding table to a sublane multiple and the final
    # FC to 128 output lanes; padded lanes are sliced back off after the kernel.
    vocab = emb.shape[0]
    vocab_p = ((vocab + 7) // 8) * 8
    emb_p = jnp.pad(emb, ((0, vocab_p - vocab), (0, 0)))
    w_fc_p = jnp.pad(w_fc, ((0, 0), (0, out_pad - out_dim)))
    b_fc_p = jnp.pad(b_fc.reshape(1, -1), ((0, 0), (0, out_pad - out_dim)))

    # Batch split across grid steps only when there is enough work per block:
    # v5e/v6e have a single TensorCore (the grid is a sequential loop there) and even
    # on v7x a tiny batch is better served by one block with a larger matmul M.
    nblk = 2 if (B % 2 == 0 and B * S >= 512) else 1
    b_blk = B // nblk
    M = b_blk * S

    ids = text.astype(jnp.int32).reshape(nblk, M, 1)
    weights = list(stacked) + [w_fc_p, b_fc_p]

    def full_spec(a):
        nd = a.ndim
        return pl.BlockSpec(a.shape, lambda i, _nd=nd: (0,) * _nd)

    in_specs = ([pl.BlockSpec((1, M, 1), lambda i: (i, 0, 0)), full_spec(emb_p)]
                + [full_spec(a) for a in weights])
    out_specs = pl.BlockSpec((1, b_blk, out_pad), lambda i: (i, 0, 0))

    kernel = functools.partial(_fused_classifier_kernel, seq_len=S)
    out = pl.pallas_call(
        kernel,
        grid=(nblk,),
        in_specs=in_specs,
        out_specs=out_specs,
        out_shape=jax.ShapeDtypeStruct((nblk, b_blk, out_pad), jnp.float32),
        compiler_params=pltpu.CompilerParams(
            dimension_semantics=("parallel",),
            vmem_limit_bytes=32 * 1024 * 1024),
    )(ids, emb_p, *weights)
    return out[:, :, :out_dim].reshape(B, out_dim)


# ----------------------------------------------------------------------------
# Deterministic parameter initialization (shapes from the module's __init__)
# ----------------------------------------------------------------------------
def _xavier_uniform(key, shape):
    fan_in, fan_out = shape
    bound = math.sqrt(6.0 / (fan_in + fan_out))
    return jax.random.uniform(key, shape, jnp.float32, -bound, bound)


def init_params(key, vocab_size, output_dim):
    keys = jax.random.split(key, 2 + N_LAYERS)
    emb = jax.random.uniform(keys[0], (vocab_size, D_MODEL), jnp.float32, -0.1, 0.1)

    per_tensor = [[] for _ in range(12)]
    for i in range(N_LAYERS):
        lk = jax.random.split(keys[1 + i], 8)
        wqkv = _xavier_uniform(lk[0], (D_MODEL, 3 * D_MODEL))
        bqkv = 0.02 * jax.random.normal(lk[1], (3 * D_MODEL,), jnp.float32)
        # Fold the 1/sqrt(head_dim) attention scale into the Q projection (one-time
        # reparameterization; neither kernel nor reference applies an explicit scale).
        wqkv = wqkv.at[:, :D_MODEL].multiply(_SCALE)
        bqkv = bqkv.at[:D_MODEL].multiply(_SCALE)
        wo = _xavier_uniform(lk[2], (D_MODEL, D_MODEL))
        bo = 0.02 * jax.random.normal(lk[3], (D_MODEL,), jnp.float32)
        g1 = jnp.ones((D_MODEL,), jnp.float32)
        be1 = jnp.zeros((D_MODEL,), jnp.float32)
        w1 = _xavier_uniform(lk[4], (D_MODEL, FFN_DIM))
        b1 = 0.02 * jax.random.normal(lk[5], (FFN_DIM,), jnp.float32)
        w2 = _xavier_uniform(lk[6], (FFN_DIM, D_MODEL))
        b2 = 0.02 * jax.random.normal(lk[7], (D_MODEL,), jnp.float32)
        g2 = jnp.ones((D_MODEL,), jnp.float32)
        be2 = jnp.zeros((D_MODEL,), jnp.float32)
        for j, a in enumerate((wqkv, bqkv, wo, bo, g1, be1, w1, b1, w2, b2, g2, be2)):
            per_tensor[j].append(a)

    stacked = [jnp.stack(ts) for ts in per_tensor]      # each: (N_LAYERS, ...)
    for j in (0, 2, 6, 8):                              # wqkv, wo, w1, w2 -> bf16
        stacked[j] = stacked[j].astype(jnp.bfloat16)
    stacked = tuple(stacked)

    fk = jax.random.split(keys[1 + N_LAYERS], 2)
    w_fc = _xavier_uniform(fk[0], (D_MODEL, output_dim))
    b_fc = 0.02 * jax.random.normal(fk[1], (output_dim,), jnp.float32)
    return emb, stacked, w_fc, b_fc


# ----------------------------------------------------------------------------
# Pure-JAX reference (same parameters / same bf16 weight casts) for correctness
# ----------------------------------------------------------------------------
def _layer_ref(x, lp):
    wqkv, bqkv, wo, bo, g1, be1, w1, b1, w2, b2, g2, be2 = lp
    B, S, D = x.shape
    qkv = jnp.einsum('bsd,de->bse', x.astype(jnp.bfloat16), wqkv,
                     preferred_element_type=jnp.float32) + bqkv
    q, k, v = jnp.split(qkv, 3, axis=-1)
    q = q.reshape(B, S, NHEAD, HEAD_DIM)
    k = k.reshape(B, S, NHEAD, HEAD_DIM)
    v = v.reshape(B, S, NHEAD, HEAD_DIM)
    s = jnp.einsum('bqhd,bkhd->bhqk', q, k, preferred_element_type=jnp.float32)
    p = jax.nn.softmax(s, axis=-1)          # scale already folded into Wq / bq
    attn = jnp.einsum('bhqk,bkhd->bqhd', p, v,
                      preferred_element_type=jnp.float32).reshape(B, S, D)
    attn = jnp.einsum('bsd,de->bse', attn.astype(jnp.bfloat16), wo,
                      preferred_element_type=jnp.float32) + bo
    x = x + attn
    mu = jnp.mean(x, axis=-1, keepdims=True)
    var = jnp.mean((x - mu) ** 2, axis=-1, keepdims=True)
    x = (x - mu) * jax.lax.rsqrt(var + LN_EPS) * g1 + be1
    h = jnp.einsum('bsd,df->bsf', x.astype(jnp.bfloat16), w1,
                   preferred_element_type=jnp.float32) + b1
    h = jnp.maximum(h, 0.0)
    y = jnp.einsum('bsf,fd->bsd', h.astype(jnp.bfloat16), w2,
                   preferred_element_type=jnp.float32) + b2
    x = x + y
    mu = jnp.mean(x, axis=-1, keepdims=True)
    var = jnp.mean((x - mu) ** 2, axis=-1, keepdims=True)
    return (x - mu) * jax.lax.rsqrt(var + LN_EPS) * g2 + be2


def classifier_forward_ref(text, params):
    emb, stacked, w_fc, b_fc = params
    x = jnp.take(emb, text, axis=0).astype(jnp.float32)
    for l in range(N_LAYERS):
        lp = tuple(a[l] for a in stacked)
        x = _layer_ref(x, lp)
    return jnp.sum(x, axis=1) @ w_fc + b_fc


# ----------------------------------------------------------------------------
if __name__ == "__main__":
    VOCAB = 100
    OUTPUT_DIM = 4
    B, S = 2, 8

    key = jax.random.PRNGKey(0)
    pkey, tkey = jax.random.split(key)
    params = init_params(pkey, VOCAB, OUTPUT_DIM)

    text = jax.random.randint(tkey, (B, S), 0, VOCAB, dtype=jnp.int32)
    text_lengths = jnp.full((B,), S, dtype=jnp.int32)

    out = classifier_forward(text, text_lengths, params)
    out = jax.block_until_ready(out)
    assert out.shape == (B, OUTPUT_DIM), out.shape

    ref = jax.block_until_ready(classifier_forward_ref(text, params))
    assert jnp.allclose(out, ref, atol=5e-2, rtol=5e-2), (
        f"max abs diff {jnp.max(jnp.abs(out - ref))}")

    print("KERNEL_OK")
</pallas_src>

<mosaic_0001>
module attributes {stable_mosaic.version = 11 : i64} {
  func.func @_fused_classifier_kernel(%arg0: i32, %arg1: memref<1x16x1xi32, #tpu.memory_space<vmem>>, %arg2: memref<104x64xf32, #tpu.memory_space<vmem>>, %arg3: memref<3x64x192xbf16, #tpu.memory_space<vmem>>, %arg4: memref<3x192xf32, #tpu.memory_space<vmem>>, %arg5: memref<3x64x64xbf16, #tpu.memory_space<vmem>>, %arg6: memref<3x64xf32, #tpu.memory_space<vmem>>, %arg7: memref<3x64xf32, #tpu.memory_space<vmem>>, %arg8: memref<3x64xf32, #tpu.memory_space<vmem>>, %arg9: memref<3x64x2048xbf16, #tpu.memory_space<vmem>>, %arg10: memref<3x2048xf32, #tpu.memory_space<vmem>>, %arg11: memref<3x2048x64xbf16, #tpu.memory_space<vmem>>, %arg12: memref<3x64xf32, #tpu.memory_space<vmem>>, %arg13: memref<3x64xf32, #tpu.memory_space<vmem>>, %arg14: memref<3x64xf32, #tpu.memory_space<vmem>>, %arg15: memref<64x128xf32, #tpu.memory_space<vmem>>, %arg16: memref<1x128xf32, #tpu.memory_space<vmem>>, %arg17: memref<1x2x128xf32, #tpu.memory_space<vmem>>) attributes {dimension_semantics = [#tpu.dimension_semantics<parallel>], iteration_bounds = array<i64: 1>, scalar_prefetch = 0 : i64, scratch_operands = 0 : i64, tpu.core_type = #tpu.core_type<tc>, window_params = [{transform_indices = @transform_0, window_bounds = array<i64: 1, 16, 1>}, {pipeline_mode = #tpu.pipeline_mode<synchronous>, transform_indices = @transform_1, window_bounds = array<i64: 104, 64>}, {pipeline_mode = #tpu.pipeline_mode<synchronous>, transform_indices = @transform_2, window_bounds = array<i64: 3, 64, 192>}, {pipeline_mode = #tpu.pipeline_mode<synchronous>, transform_indices = @transform_3, window_bounds = array<i64: 3, 192>}, {pipeline_mode = #tpu.pipeline_mode<synchronous>, transform_indices = @transform_4, window_bounds = array<i64: 3, 64, 64>}, {pipeline_mode = #tpu.pipeline_mode<synchronous>, transform_indices = @transform_5, window_bounds = array<i64: 3, 64>}, {pipeline_mode = #tpu.pipeline_mode<synchronous>, transform_indices = @transform_6, window_bounds = array<i64: 3, 64>}, {pipeline_mode = #tpu.pipeline_mode<synchronous>, transform_indices = @transform_7, window_bounds = array<i64: 3, 64>}, {pipeline_mode = #tpu.pipeline_mode<synchronous>, transform_indices = @transform_8, window_bounds = array<i64: 3, 64, 2048>}, {pipeline_mode = #tpu.pipeline_mode<synchronous>, transform_indices = @transform_9, window_bounds = array<i64: 3, 2048>}, {pipeline_mode = #tpu.pipeline_mode<synchronous>, transform_indices = @transform_10, window_bounds = array<i64: 3, 2048, 64>}, {pipeline_mode = #tpu.pipeline_mode<synchronous>, transform_indices = @transform_11, window_bounds = array<i64: 3, 64>}, {pipeline_mode = #tpu.pipeline_mode<synchronous>, transform_indices = @transform_12, window_bounds = array<i64: 3, 64>}, {pipeline_mode = #tpu.pipeline_mode<synchronous>, transform_indices = @transform_13, window_bounds = array<i64: 3, 64>}, {pipeline_mode = #tpu.pipeline_mode<synchronous>, transform_indices = @transform_14, window_bounds = array<i64: 64, 128>}, {pipeline_mode = #tpu.pipeline_mode<synchronous>, transform_indices = @transform_15, window_bounds = array<i64: 1, 128>}, {transform_indices = @transform_16, window_bounds = array<i64: 1, 2, 128>}]} {
    %c0 = arith.constant 0 : index
    %c0_0 = arith.constant 0 : index
    %c0_1 = arith.constant 0 : index
    %0 = vector.load %arg1[%c0, %c0_0, %c0_1] : memref<1x16x1xi32, #tpu.memory_space<vmem>>, vector<1x16x1xi32>
    %1 = vector.shape_cast %0 : vector<1x16x1xi32> to vector<16x1xi32>
    %2 = tpu.iota {dimensions = array<i32: 1>} : vector<16x104xi32>
    %3 = vector.broadcast %1 : vector<16x1xi32> to vector<16x104xi32>
    %4 = arith.cmpi eq, %2, %3 : vector<16x104xi32>
    %5 = arith.extui %4 : vector<16x104xi1> to vector<16x104xi32>
    %6 = arith.sitofp %5 : vector<16x104xi32> to vector<16x104xf32>
    %c0_2 = arith.constant 0 : index
    %c0_3 = arith.constant 0 : index
    %7 = vector.load %arg2[%c0_2, %c0_3] : memref<104x64xf32, #tpu.memory_space<vmem>>, vector<104x64xf32>
    %cst = arith.constant dense<0.000000e+00> : vector<16x64xf32>
    %8 = tpu.matmul %6, %7, %cst {dimension_numbers = #tpu.dot_dimension_numbers<[1], [0], [0], [1], [0, 0, 1, 1], [], []>} : vector<16x104xf32>, vector<104x64xf32>, vector<16x64xf32> -> vector<16x64xf32>
    %9 = tpu.iota {dimensions = array<i32: 0>} : vector<64x64xi32>
    %10 = arith.sitofp %9 : vector<64x64xi32> to vector<64x64xf32>
    %cst_4 = arith.constant 5.000000e-01 : f32
    %11 = vector.broadcast %cst_4 : f32 to vector<64x64xf32>
    %12 = arith.addf %10, %11 : vector<64x64xf32>
    %cst_5 = arith.constant 1.250000e-01 : f32
    %13 = vector.broadcast %cst_5 : f32 to vector<64x64xf32>
    %14 = arith.mulf %12, %13 : vector<64x64xf32>
    %15 = math.floor %14 : vector<64x64xf32>
    %16 = tpu.iota {dimensions = array<i32: 1>} : vector<64x64xi32>
    %17 = arith.sitofp %16 : vector<64x64xi32> to vector<64x64xf32>
    %cst_6 = arith.constant 5.000000e-01 : f32
    %18 = vector.broadcast %cst_6 : f32 to vector<64x64xf32>
    %19 = arith.addf %17, %18 : vector<64x64xf32>
    %cst_7 = arith.constant 1.250000e-01 : f32
    %20 = vector.broadcast %cst_7 : f32 to vector<64x64xf32>
    %21 = arith.mulf %19, %20 : vector<64x64xf32>
    %22 = math.floor %21 : vector<64x64xf32>
    %23 = arith.cmpf oeq, %15, %22 : vector<64x64xf32>
    %24 = arith.extui %23 : vector<64x64xi1> to vector<64x64xi32>
    %25 = arith.sitofp %24 : vector<64x64xi32> to vector<64x64xf32>
    %26 = arith.truncf %8 : vector<16x64xf32> to vector<16x64xbf16>
    %c0_8 = arith.constant 0 : index
    %c0_9 = arith.constant 0 : index
    %c0_10 = arith.constant 0 : index
    %27 = vector.load %arg3[%c0_8, %c0_9, %c0_10] : memref<3x64x192xbf16, #tpu.memory_space<vmem>>, vector<1x64x192xbf16>
    %28 = vector.shape_cast %27 : vector<1x64x192xbf16> to vector<64x192xbf16>
    %cst_11 = arith.constant dense<0.000000e+00> : vector<16x192xf32>
    %29 = tpu.matmul %26, %28, %cst_11 {dimension_numbers = #tpu.dot_dimension_numbers<[1], [0], [0], [1], [0, 0, 1, 1], [], []>} : vector<16x64xbf16>, vector<64x192xbf16>, vector<16x192xf32> -> vector<16x192xf32>
    %c0_12 = arith.constant 0 : index
    %c0_13 = arith.constant 0 : index
    %30 = vector.load %arg4[%c0_12, %c0_13] : memref<3x192xf32, #tpu.memory_space<vmem>>, vector<1x192xf32>
    %31 = vector.shape_cast %30 : vector<1x192xf32> to vector<192xf32>
    %32 = vector.shape_cast %31 : vector<192xf32> to vector<1x192xf32>
    %33 = vector.broadcast %32 : vector<1x192xf32> to vector<16x192xf32>
    %34 = arith.addf %29, %33 : vector<16x192xf32>
    %35 = vector.extract_strided_slice %34 {offsets = [0, 0], sizes = [16, 64], strides = [1, 1]} : vector<16x192xf32> to vector<16x64xf32>
    %36 = vector.shape_cast %35 : vector<16x64xf32> to vector<2x8x64xf32>
    %37 = vector.extract_strided_slice %34 {offsets = [0, 64], sizes = [16, 64], strides = [1, 1]} : vector<16x192xf32> to vector<16x64xf32>
    %38 = vector.shape_cast %37 : vector<16x64xf32> to vector<2x8x64xf32>
    %39 = vector.extract_strided_slice %34 {offsets = [0, 128], sizes = [16, 64], strides = [1, 1]} : vector<16x192xf32> to vector<16x64xf32>
    %40 = vector.shape_cast %39 : vector<16x64xf32> to vector<2x8x64xf32>
    %41 = tpu.concatenate %38, %38, %38, %38, %38, %38, %38, %38 in 1 : vector<2x8x64xf32>, vector<2x8x64xf32>, vector<2x8x64xf32>, vector<2x8x64xf32>, vector<2x8x64xf32>, vector<2x8x64xf32>, vector<2x8x64xf32>, vector<2x8x64xf32> -> vector<2x64x64xf32>
    %42 = vector.shape_cast %25 : vector<64x64xf32> to vector<1x64x64xf32>
    %43 = vector.broadcast %42 : vector<1x64x64xf32> to vector<2x64x64xf32>
    %44 = arith.mulf %41, %43 : vector<2x64x64xf32>
    %45 = tpu.concatenate %40, %40, %40, %40, %40, %40, %40, %40 in 1 : vector<2x8x64xf32>, vector<2x8x64xf32>, vector<2x8x64xf32>, vector<2x8x64xf32>, vector<2x8x64xf32>, vector<2x8x64xf32>, vector<2x8x64xf32>, vector<2x8x64xf32> -> vector<2x64x64xf32>
    %46 = vector.shape_cast %25 : vector<64x64xf32> to vector<1x64x64xf32>
    %47 = vector.broadcast %46 : vector<1x64x64xf32> to vector<2x64x64xf32>
    %48 = arith.mulf %45, %47 : vector<2x64x64xf32>
    "tpu.trace_start"() <{level = 10 : i32, message = "bqe,bre->bqr"}> : () -> ()
    %cst_14 = arith.constant dense<0.000000e+00> : vector<2x8x64xf32>
    %49 = tpu.matmul %36, %44, %cst_14 {dimension_numbers = #tpu.dot_dimension_numbers<[2], [2], [1], [1], [0, 0, 0, 1, 1, 1], [0], [0]>} : vector<2x8x64xf32>, vector<2x64x64xf32>, vector<2x8x64xf32> -> vector<2x8x64xf32>
    "tpu.trace_stop"() : () -> ()
    %50 = vector.shape_cast %49 : vector<2x8x64xf32> to vector<16x64xf32>
    %cst_15 = arith.constant dense<0xFF800000> : vector<16xf32>
    %51 = vector.multi_reduction <maximumf>, %50, %cst_15 [1] : vector<16x64xf32> to vector<16xf32>
    %52 = vector.shape_cast %51 : vector<16xf32> to vector<16x1xf32>
    %53 = vector.broadcast %52 : vector<16x1xf32> to vector<16x64xf32>
    %54 = arith.subf %50, %53 : vector<16x64xf32>
    %55 = math.exp %54 : vector<16x64xf32>
    %cst_16 = arith.constant dense<0.000000e+00> : vector<16x64xf32>
    %56 = tpu.matmul %55, %25, %cst_16 {dimension_numbers = #tpu.dot_dimension_numbers<[1], [0], [0], [1], [0, 0, 1, 1], [], []>} : vector<16x64xf32>, vector<64x64xf32>, vector<16x64xf32> -> vector<16x64xf32>
    %57 = vector.shape_cast %55 : vector<16x64xf32> to vector<2x8x64xf32>
    %58 = arith.truncf %57 : vector<2x8x64xf32> to vector<2x8x64xbf16>
    %59 = arith.truncf %48 : vector<2x64x64xf32> to vector<2x64x64xbf16>
    "tpu.trace_start"() <{level = 10 : i32, message = "bqr,bre->bqe"}> : () -> ()
    %cst_17 = arith.constant dense<0.000000e+00> : vector<2x8x64xf32>
    %60 = tpu.matmul %58, %59, %cst_17 {dimension_numbers = #tpu.dot_dimension_numbers<[2], [1], [1], [2], [0, 0, 0, 1, 1, 2], [0], [0]>} : vector<2x8x64xbf16>, vector<2x64x64xbf16>, vector<2x8x64xf32> -> vector<2x8x64xf32>
    "tpu.trace_stop"() : () -> ()
    %61 = vector.shape_cast %60 : vector<2x8x64xf32> to vector<16x64xf32>
    %62 = tpu.reciprocal %56 {approx = true} : vector<16x64xf32> -> vector<16x64xf32>
    %63 = arith.mulf %61, %62 : vector<16x64xf32>
    %64 = arith.truncf %63 : vector<16x64xf32> to vector<16x64xbf16>
    %c0_18 = arith.constant 0 : index
    %c0_19 = arith.constant 0 : index
    %c0_20 = arith.constant 0 : index
    %65 = vector.load %arg5[%c0_18, %c0_19, %c0_20] : memref<3x64x64xbf16, #tpu.memory_space<vmem>>, vector<1x64x64xbf16>
    %66 = vector.shape_cast %65 : vector<1x64x64xbf16> to vector<64x64xbf16>
    %cst_21 = arith.constant dense<0.000000e+00> : vector<16x64xf32>
    %67 = tpu.matmul %64, %66, %cst_21 {dimension_numbers = #tpu.dot_dimension_numbers<[1], [0], [0], [1], [0, 0, 1, 1], [], []>} : vector<16x64xbf16>, vector<64x64xbf16>, vector<16x64xf32> -> vector<16x64xf32>
    %c0_22 = arith.constant 0 : index
    %c0_23 = arith.constant 0 : index
    %68 = vector.load %arg6[%c0_22, %c0_23] : memref<3x64xf32, #tpu.memory_space<vmem>>, vector<1x64xf32>
    %69 = vector.shape_cast %68 : vector<1x64xf32> to vector<64xf32>
    %70 = vector.shape_cast %69 : vector<64xf32> to vector<1x64xf32>
    %71 = vector.broadcast %70 : vector<1x64xf32> to vector<16x64xf32>
    %72 = arith.addf %67, %71 : vector<16x64xf32>
    %73 = arith.addf %8, %72 : vector<16x64xf32>
    %cst_24 = arith.constant dense<0.000000e+00> : vector<16xf32>
    %74 = vector.multi_reduction <add>, %73, %cst_24 [1] : vector<16x64xf32> to vector<16xf32>
    %75 = vector.shape_cast %74 : vector<16xf32> to vector<16x1xf32>
    %cst_25 = arith.constant 6.400000e+01 : f32
    %76 = vector.broadcast %cst_25 : f32 to vector<16x1xf32>
    %77 = arith.divf %75, %76 : vector<16x1xf32>
    %78 = vector.broadcast %77 : vector<16x1xf32> to vector<16x64xf32>
    %79 = arith.subf %73, %78 : vector<16x64xf32>
    %80 = arith.mulf %79, %79 : vector<16x64xf32>
    %cst_26 = arith.constant dense<0.000000e+00> : vector<16xf32>
    %81 = vector.multi_reduction <add>, %80, %cst_26 [1] : vector<16x64xf32> to vector<16xf32>
    %82 = vector.shape_cast %81 : vector<16xf32> to vector<16x1xf32>
    %cst_27 = arith.constant 6.400000e+01 : f32
    %83 = vector.broadcast %cst_27 : f32 to vector<16x1xf32>
    %84 = arith.divf %82, %83 : vector<16x1xf32>
    %cst_28 = arith.constant 9.99999974E-6 : f32
    %85 = vector.broadcast %cst_28 : f32 to vector<16x1xf32>
    %86 = arith.addf %84, %85 : vector<16x1xf32>
    %87 = math.rsqrt %86 : vector<16x1xf32>
    %88 = vector.broadcast %87 : vector<16x1xf32> to vector<16x64xf32>
    %89 = arith.mulf %79, %88 : vector<16x64xf32>
    %c0_29 = arith.constant 0 : index
    %c0_30 = arith.constant 0 : index
    %90 = vector.load %arg7[%c0_29, %c0_30] : memref<3x64xf32, #tpu.memory_space<vmem>>, vector<1x64xf32>
    %91 = vector.shape_cast %90 : vector<1x64xf32> to vector<64xf32>
    %92 = vector.shape_cast %91 : vector<64xf32> to vector<1x64xf32>
    %93 = vector.broadcast %92 : vector<1x64xf32> to vector<16x64xf32>
    %94 = arith.mulf %89, %93 : vector<16x64xf32>
    %c0_31 = arith.constant 0 : index
    %c0_32 = arith.constant 0 : index
    %95 = vector.load %arg8[%c0_31, %c0_32] : memref<3x64xf32, #tpu.memory_space<vmem>>, vector<1x64xf32>
    %96 = vector.shape_cast %95 : vector<1x64xf32> to vector<64xf32>
    %97 = vector.shape_cast %96 : vector<64xf32> to vector<1x64xf32>
    %98 = vector.broadcast %97 : vector<1x64xf32> to vector<16x64xf32>
    %99 = arith.addf %94, %98 : vector<16x64xf32>
    %100 = arith.truncf %99 : vector<16x64xf32> to vector<16x64xbf16>
    %c0_33 = arith.constant 0 : index
    %c0_34 = arith.constant 0 : index
    %c0_35 = arith.constant 0 : index
    %101 = vector.load %arg9[%c0_33, %c0_34, %c0_35] : memref<3x64x2048xbf16, #tpu.memory_space<vmem>>, vector<1x64x2048xbf16>
    %102 = vector.shape_cast %101 : vector<1x64x2048xbf16> to vector<64x2048xbf16>
    %cst_36 = arith.constant dense<0.000000e+00> : vector<16x2048xf32>
    %103 = tpu.matmul %100, %102, %cst_36 {dimension_numbers = #tpu.dot_dimension_numbers<[1], [0], [0], [1], [0, 0, 1, 1], [], []>} : vector<16x64xbf16>, vector<64x2048xbf16>, vector<16x2048xf32> -> vector<16x2048xf32>
    %c0_37 = arith.constant 0 : index
    %c0_38 = arith.constant 0 : index
    %104 = vector.load %arg10[%c0_37, %c0_38] : memref<3x2048xf32, #tpu.memory_space<vmem>>, vector<1x2048xf32>
    %105 = vector.shape_cast %104 : vector<1x2048xf32> to vector<2048xf32>
    %106 = vector.shape_cast %105 : vector<2048xf32> to vector<1x2048xf32>
    %107 = vector.broadcast %106 : vector<1x2048xf32> to vector<16x2048xf32>
    %108 = arith.addf %103, %107 : vector<16x2048xf32>
    %cst_39 = arith.constant 0.000000e+00 : f32
    %109 = vector.broadcast %cst_39 : f32 to vector<16x2048xf32>
    %110 = arith.maximumf %108, %109 : vector<16x2048xf32>
    %111 = arith.truncf %110 : vector<16x2048xf32> to vector<16x2048xbf16>
    %c0_40 = arith.constant 0 : index
    %c0_41 = arith.constant 0 : index
    %c0_42 = arith.constant 0 : index
    %112 = vector.load %arg11[%c0_40, %c0_41, %c0_42] : memref<3x2048x64xbf16, #tpu.memory_space<vmem>>, vector<1x2048x64xbf16>
    %113 = vector.shape_cast %112 : vector<1x2048x64xbf16> to vector<2048x64xbf16>
    %cst_43 = arith.constant dense<0.000000e+00> : vector<16x64xf32>
    %114 = tpu.matmul %111, %113, %cst_43 {dimension_numbers = #tpu.dot_dimension_numbers<[1], [0], [0], [1], [0, 0, 1, 1], [], []>} : vector<16x2048xbf16>, vector<2048x64xbf16>, vector<16x64xf32> -> vector<16x64xf32>
    %c0_44 = arith.constant 0 : index
    %c0_45 = arith.constant 0 : index
    %115 = vector.load %arg12[%c0_44, %c0_45] : memref<3x64xf32, #tpu.memory_space<vmem>>, vector<1x64xf32>
    %116 = vector.shape_cast %115 : vector<1x64xf32> to vector<64xf32>
    %117 = vector.shape_cast %116 : vector<64xf32> to vector<1x64xf32>
    %118 = vector.broadcast %117 : vector<1x64xf32> to vector<16x64xf32>
    %119 = arith.addf %114, %118 : vector<16x64xf32>
    %120 = arith.addf %99, %119 : vector<16x64xf32>
    %cst_46 = arith.constant dense<0.000000e+00> : vector<16xf32>
    %121 = vector.multi_reduction <add>, %120, %cst_46 [1] : vector<16x64xf32> to vector<16xf32>
    %122 = vector.shape_cast %121 : vector<16xf32> to vector<16x1xf32>
    %cst_47 = arith.constant 6.400000e+01 : f32
    %123 = vector.broadcast %cst_47 : f32 to vector<16x1xf32>
    %124 = arith.divf %122, %123 : vector<16x1xf32>
    %125 = vector.broadcast %124 : vector<16x1xf32> to vector<16x64xf32>
    %126 = arith.subf %120, %125 : vector<16x64xf32>
    %127 = arith.mulf %126, %126 : vector<16x64xf32>
    %cst_48 = arith.constant dense<0.000000e+00> : vector<16xf32>
    %128 = vector.multi_reduction <add>, %127, %cst_48 [1] : vector<16x64xf32> to vector<16xf32>
    %129 = vector.shape_cast %128 : vector<16xf32> to vector<16x1xf32>
    %cst_49 = arith.constant 6.400000e+01 : f32
    %130 = vector.broadcast %cst_49 : f32 to vector<16x1xf32>
    %131 = arith.divf %129, %130 : vector<16x1xf32>
    %cst_50 = arith.constant 9.99999974E-6 : f32
    %132 = vector.broadcast %cst_50 : f32 to vector<16x1xf32>
    %133 = arith.addf %131, %132 : vector<16x1xf32>
    %134 = math.rsqrt %133 : vector<16x1xf32>
    %135 = vector.broadcast %134 : vector<16x1xf32> to vector<16x64xf32>
    %136 = arith.mulf %126, %135 : vector<16x64xf32>
    %c0_51 = arith.constant 0 : index
    %c0_52 = arith.constant 0 : index
    %137 = vector.load %arg13[%c0_51, %c0_52] : memref<3x64xf32, #tpu.memory_space<vmem>>, vector<1x64xf32>
    %138 = vector.shape_cast %137 : vector<1x64xf32> to vector<64xf32>
    %139 = vector.shape_cast %138 : vector<64xf32> to vector<1x64xf32>
    %140 = vector.broadcast %139 : vector<1x64xf32> to vector<16x64xf32>
    %141 = arith.mulf %136, %140 : vector<16x64xf32>
    %c0_53 = arith.constant 0 : index
    %c0_54 = arith.constant 0 : index
    %142 = vector.load %arg14[%c0_53, %c0_54] : memref<3x64xf32, #tpu.memory_space<vmem>>, vector<1x64xf32>
    %143 = vector.shape_cast %142 : vector<1x64xf32> to vector<64xf32>
    %144 = vector.shape_cast %143 : vector<64xf32> to vector<1x64xf32>
    %145 = vector.broadcast %144 : vector<1x64xf32> to vector<16x64xf32>
    %146 = arith.addf %141, %145 : vector<16x64xf32>
    %147 = arith.truncf %146 : vector<16x64xf32> to vector<16x64xbf16>
    %c1 = arith.constant 1 : index
    %c0_55 = arith.constant 0 : index
    %c0_56 = arith.constant 0 : index
    %148 = vector.load %arg3[%c1, %c0_55, %c0_56] : memref<3x64x192xbf16, #tpu.memory_space<vmem>>, vector<1x64x192xbf16>
    %149 = vector.shape_cast %148 : vector<1x64x192xbf16> to vector<64x192xbf16>
    %cst_57 = arith.constant dense<0.000000e+00> : vector<16x192xf32>
    %150 = tpu.matmul %147, %149, %cst_57 {dimension_numbers = #tpu.dot_dimension_numbers<[1], [0], [0], [1], [0, 0, 1, 1], [], []>} : vector<16x64xbf16>, vector<64x192xbf16>, vector<16x192xf32> -> vector<16x192xf32>
    %c1_58 = arith.constant 1 : index
    %c0_59 = arith.constant 0 : index
    %151 = vector.load %arg4[%c1_58, %c0_59] : memref<3x192xf32, #tpu.memory_space<vmem>>, vector<1x192xf32>
    %152 = vector.shape_cast %151 : vector<1x192xf32> to vector<192xf32>
    %153 = vector.shape_cast %152 : vector<192xf32> to vector<1x192xf32>
    %154 = vector.broadcast %153 : vector<1x192xf32> to vector<16x192xf32>
    %155 = arith.addf %150, %154 : vector<16x192xf32>
    %156 = vector.extract_strided_slice %155 {offsets = [0, 0], sizes = [16, 64], strides = [1, 1]} : vector<16x192xf32> to vector<16x64xf32>
    %157 = vector.shape_cast %156 : vector<16x64xf32> to vector<2x8x64xf32>
    %158 = vector.extract_strided_slice %155 {offsets = [0, 64], sizes = [16, 64], strides = [1, 1]} : vector<16x192xf32> to vector<16x64xf32>
    %159 = vector.shape_cast %158 : vector<16x64xf32> to vector<2x8x64xf32>
    %160 = vector.extract_strided_slice %155 {offsets = [0, 128], sizes = [16, 64], strides = [1, 1]} : vector<16x192xf32> to vector<16x64xf32>
    %161 = vector.shape_cast %160 : vector<16x64xf32> to vector<2x8x64xf32>
    %162 = tpu.concatenate %159, %159, %159, %159, %159, %159, %159, %159 in 1 : vector<2x8x64xf32>, vector<2x8x64xf32>, vector<2x8x64xf32>, vector<2x8x64xf32>, vector<2x8x64xf32>, vector<2x8x64xf32>, vector<2x8x64xf32>, vector<2x8x64xf32> -> vector<2x64x64xf32>
    %163 = vector.shape_cast %25 : vector<64x64xf32> to vector<1x64x64xf32>
    %164 = vector.broadcast %163 : vector<1x64x64xf32> to vector<2x64x64xf32>
    %165 = arith.mulf %162, %164 : vector<2x64x64xf32>
    %166 = tpu.concatenate %161, %161, %161, %161, %161, %161, %161, %161 in 1 : vector<2x8x64xf32>, vector<2x8x64xf32>, vector<2x8x64xf32>, vector<2x8x64xf32>, vector<2x8x64xf32>, vector<2x8x64xf32>, vector<2x8x64xf32>, vector<2x8x64xf32> -> vector<2x64x64xf32>
    %167 = vector.shape_cast %25 : vector<64x64xf32> to vector<1x64x64xf32>
    %168 = vector.broadcast %167 : vector<1x64x64xf32> to vector<2x64x64xf32>
    %169 = arith.mulf %166, %168 : vector<2x64x64xf32>
    "tpu.trace_start"() <{level = 10 : i32, message = "bqe,bre->bqr"}> : () -> ()
    %cst_60 = arith.constant dense<0.000000e+00> : vector<2x8x64xf32>
    %170 = tpu.matmul %157, %165, %cst_60 {dimension_numbers = #tpu.dot_dimension_numbers<[2], [2], [1], [1], [0, 0, 0, 1, 1, 1], [0], [0]>} : vector<2x8x64xf32>, vector<2x64x64xf32>, vector<2x8x64xf32> -> vector<2x8x64xf32>
    "tpu.trace_stop"() : () -> ()
    %171 = vector.shape_cast %170 : vector<2x8x64xf32> to vector<16x64xf32>
    %cst_61 = arith.constant dense<0xFF800000> : vector<16xf32>
    %172 = vector.multi_reduction <maximumf>, %171, %cst_61 [1] : vector<16x64xf32> to vector<16xf32>
    %173 = vector.shape_cast %172 : vector<16xf32> to vector<16x1xf32>
    %174 = vector.broadcast %173 : vector<16x1xf32> to vector<16x64xf32>
    %175 = arith.subf %171, %174 : vector<16x64xf32>
    %176 = math.exp %175 : vector<16x64xf32>
    %cst_62 = arith.constant dense<0.000000e+00> : vector<16x64xf32>
    %177 = tpu.matmul %176, %25, %cst_62 {dimension_numbers = #tpu.dot_dimension_numbers<[1], [0], [0], [1], [0, 0, 1, 1], [], []>} : vector<16x64xf32>, vector<64x64xf32>, vector<16x64xf32> -> vector<16x64xf32>
    %178 = vector.shape_cast %176 : vector<16x64xf32> to vector<2x8x64xf32>
    %179 = arith.truncf %178 : vector<2x8x64xf32> to vector<2x8x64xbf16>
    %180 = arith.truncf %169 : vector<2x64x64xf32> to vector<2x64x64xbf16>
    "tpu.trace_start"() <{level = 10 : i32, message = "bqr,bre->bqe"}> : () -> ()
    %cst_63 = arith.constant dense<0.000000e+00> : vector<2x8x64xf32>
    %181 = tpu.matmul %179, %180, %cst_63 {dimension_numbers = #tpu.dot_dimension_numbers<[2], [1], [1], [2], [0, 0, 0, 1, 1, 2], [0], [0]>} : vector<2x8x64xbf16>, vector<2x64x64xbf16>, vector<2x8x64xf32> -> vector<2x8x64xf32>
    "tpu.trace_stop"() : () -> ()
    %182 = vector.shape_cast %181 : vector<2x8x64xf32> to vector<16x64xf32>
    %183 = tpu.reciprocal %177 {approx = true} : vector<16x64xf32> -> vector<16x64xf32>
    %184 = arith.mulf %182, %183 : vector<16x64xf32>
    %185 = arith.truncf %184 : vector<16x64xf32> to vector<16x64xbf16>
    %c1_64 = arith.constant 1 : index
    %c0_65 = arith.constant 0 : index
    %c0_66 = arith.constant 0 : index
    %186 = vector.load %arg5[%c1_64, %c0_65, %c0_66] : memref<3x64x64xbf16, #tpu.memory_space<vmem>>, vector<1x64x64xbf16>
    %187 = vector.shape_cast %186 : vector<1x64x64xbf16> to vector<64x64xbf16>
    %cst_67 = arith.constant dense<0.000000e+00> : vector<16x64xf32>
    %188 = tpu.matmul %185, %187, %cst_67 {dimension_numbers = #tpu.dot_dimension_numbers<[1], [0], [0], [1], [0, 0, 1, 1], [], []>} : vector<16x64xbf16>, vector<64x64xbf16>, vector<16x64xf32> -> vector<16x64xf32>
    %c1_68 = arith.constant 1 : index
    %c0_69 = arith.constant 0 : index
    %189 = vector.load %arg6[%c1_68, %c0_69] : memref<3x64xf32, #tpu.memory_space<vmem>>, vector<1x64xf32>
    %190 = vector.shape_cast %189 : vector<1x64xf32> to vector<64xf32>
    %191 = vector.shape_cast %190 : vector<64xf32> to vector<1x64xf32>
    %192 = vector.broadcast %191 : vector<1x64xf32> to vector<16x64xf32>
    %193 = arith.addf %188, %192 : vector<16x64xf32>
    %194 = arith.addf %146, %193 : vector<16x64xf32>
    %cst_70 = arith.constant dense<0.000000e+00> : vector<16xf32>
    %195 = vector.multi_reduction <add>, %194, %cst_70 [1] : vector<16x64xf32> to vector<16xf32>
    %196 = vector.shape_cast %195 : vector<16xf32> to vector<16x1xf32>
    %cst_71 = arith.constant 6.400000e+01 : f32
    %197 = vector.broadcast %cst_71 : f32 to vector<16x1xf32>
    %198 = arith.divf %196, %197 : vector<16x1xf32>
    %199 = vector.broadcast %198 : vector<16x1xf32> to vector<16x64xf32>
    %200 = arith.subf %194, %199 : vector<16x64xf32>
    %201 = arith.mulf %200, %200 : vector<16x64xf32>
    %cst_72 = arith.constant dense<0.000000e+00> : vector<16xf32>
    %202 = vector.multi_reduction <add>, %201, %cst_72 [1] : vector<16x64xf32> to vector<16xf32>
    %203 = vector.shape_cast %202 : vector<16xf32> to vector<16x1xf32>
    %cst_73 = arith.constant 6.400000e+01 : f32
    %204 = vector.broadcast %cst_73 : f32 to vector<16x1xf32>
    %205 = arith.divf %203, %204 : vector<16x1xf32>
    %cst_74 = arith.constant 9.99999974E-6 : f32
    %206 = vector.broadcast %cst_74 : f32 to vector<16x1xf32>
    %207 = arith.addf %205, %206 : vector<16x1xf32>
    %208 = math.rsqrt %207 : vector<16x1xf32>
    %209 = vector.broadcast %208 : vector<16x1xf32> to vector<16x64xf32>
    %210 = arith.mulf %200, %209 : vector<16x64xf32>
    %c1_75 = arith.constant 1 : index
    %c0_76 = arith.constant 0 : index
    %211 = vector.load %arg7[%c1_75, %c0_76] : memref<3x64xf32, #tpu.memory_space<vmem>>, vector<1x64xf32>
    %212 = vector.shape_cast %211 : vector<1x64xf32> to vector<64xf32>
    %213 = vector.shape_cast %212 : vector<64xf32> to vector<1x64xf32>
    %214 = vector.broadcast %213 : vector<1x64xf32> to vector<16x64xf32>
    %215 = arith.mulf %210, %214 : vector<16x64xf32>
    %c1_77 = arith.constant 1 : index
    %c0_78 = arith.constant 0 : index
    %216 = vector.load %arg8[%c1_77, %c0_78] : memref<3x64xf32, #tpu.memory_space<vmem>>, vector<1x64xf32>
    %217 = vector.shape_cast %216 : vector<1x64xf32> to vector<64xf32>
    %218 = vector.shape_cast %217 : vector<64xf32> to vector<1x64xf32>
    %219 = vector.broadcast %218 : vector<1x64xf32> to vector<16x64xf32>
    %220 = arith.addf %215, %219 : vector<16x64xf32>
    %221 = arith.truncf %220 : vector<16x64xf32> to vector<16x64xbf16>
    %c1_79 = arith.constant 1 : index
    %c0_80 = arith.constant 0 : index
    %c0_81 = arith.constant 0 : index
    %222 = vector.load %arg9[%c1_79, %c0_80, %c0_81] : memref<3x64x2048xbf16, #tpu.memory_space<vmem>>, vector<1x64x2048xbf16>
    %223 = vector.shape_cast %222 : vector<1x64x2048xbf16> to vector<64x2048xbf16>
    %cst_82 = arith.constant dense<0.000000e+00> : vector<16x2048xf32>
    %224 = tpu.matmul %221, %223, %cst_82 {dimension_numbers = #tpu.dot_dimension_numbers<[1], [0], [0], [1], [0, 0, 1, 1], [], []>} : vector<16x64xbf16>, vector<64x2048xbf16>, vector<16x2048xf32> -> vector<16x2048xf32>
    %c1_83 = arith.constant 1 : index
    %c0_84 = arith.constant 0 : index
    %225 = vector.load %arg10[%c1_83, %c0_84] : memref<3x2048xf32, #tpu.memory_space<vmem>>, vector<1x2048xf32>
    %226 = vector.shape_cast %225 : vector<1x2048xf32> to vector<2048xf32>
    %227 = vector.shape_cast %226 : vector<2048xf32> to vector<1x2048xf32>
    %228 = vector.broadcast %227 : vector<1x2048xf32> to vector<16x2048xf32>
    %229 = arith.addf %224, %228 : vector<16x2048xf32>
    %cst_85 = arith.constant 0.000000e+00 : f32
    %230 = vector.broadcast %cst_85 : f32 to vector<16x2048xf32>
    %231 = arith.maximumf %229, %230 : vector<16x2048xf32>
    %232 = arith.truncf %231 : vector<16x2048xf32> to vector<16x2048xbf16>
    %c1_86 = arith.constant 1 : index
    %c0_87 = arith.constant 0 : index
    %c0_88 = arith.constant 0 : index
    %233 = vector.load %arg11[%c1_86, %c0_87, %c0_88] : memref<3x2048x64xbf16, #tpu.memory_space<vmem>>, vector<1x2048x64xbf16>
    %234 = vector.shape_cast %233 : vector<1x2048x64xbf16> to vector<2048x64xbf16>
    %cst_89 = arith.constant dense<0.000000e+00> : vector<16x64xf32>
    %235 = tpu.matmul %232, %234, %cst_89 {dimension_numbers = #tpu.dot_dimension_numbers<[1], [0], [0], [1], [0, 0, 1, 1], [], []>} : vector<16x2048xbf16>, vector<2048x64xbf16>, vector<16x64xf32> -> vector<16x64xf32>
    %c1_90 = arith.constant 1 : index
    %c0_91 = arith.constant 0 : index
    %236 = vector.load %arg12[%c1_90, %c0_91] : memref<3x64xf32, #tpu.memory_space<vmem>>, vector<1x64xf32>
    %237 = vector.shape_cast %236 : vector<1x64xf32> to vector<64xf32>
    %238 = vector.shape_cast %237 : vector<64xf32> to vector<1x64xf32>
    %239 = vector.broadcast %238 : vector<1x64xf32> to vector<16x64xf32>
    %240 = arith.addf %235, %239 : vector<16x64xf32>
    %241 = arith.addf %220, %240 : vector<16x64xf32>
    %cst_92 = arith.constant dense<0.000000e+00> : vector<16xf32>
    %242 = vector.multi_reduction <add>, %241, %cst_92 [1] : vector<16x64xf32> to vector<16xf32>
    %243 = vector.shape_cast %242 : vector<16xf32> to vector<16x1xf32>
    %cst_93 = arith.constant 6.400000e+01 : f32
    %244 = vector.broadcast %cst_93 : f32 to vector<16x1xf32>
    %245 = arith.divf %243, %244 : vector<16x1xf32>
    %246 = vector.broadcast %245 : vector<16x1xf32> to vector<16x64xf32>
    %247 = arith.subf %241, %246 : vector<16x64xf32>
    %248 = arith.mulf %247, %247 : vector<16x64xf32>
    %cst_94 = arith.constant dense<0.000000e+00> : vector<16xf32>
    %249 = vector.multi_reduction <add>, %248, %cst_94 [1] : vector<16x64xf32> to vector<16xf32>
    %250 = vector.shape_cast %249 : vector<16xf32> to vector<16x1xf32>
    %cst_95 = arith.constant 6.400000e+01 : f32
    %251 = vector.broadcast %cst_95 : f32 to vector<16x1xf32>
    %252 = arith.divf %250, %251 : vector<16x1xf32>
    %cst_96 = arith.constant 9.99999974E-6 : f32
    %253 = vector.broadcast %cst_96 : f32 to vector<16x1xf32>
    %254 = arith.addf %252, %253 : vector<16x1xf32>
    %255 = math.rsqrt %254 : vector<16x1xf32>
    %256 = vector.broadcast %255 : vector<16x1xf32> to vector<16x64xf32>
    %257 = arith.mulf %247, %256 : vector<16x64xf32>
    %c1_97 = arith.constant 1 : index
    %c0_98 = arith.constant 0 : index
    %258 = vector.load %arg13[%c1_97, %c0_98] : memref<3x64xf32, #tpu.memory_space<vmem>>, vector<1x64xf32>
    %259 = vector.shape_cast %258 : vector<1x64xf32> to vector<64xf32>
    %260 = vector.shape_cast %259 : vector<64xf32> to vector<1x64xf32>
    %261 = vector.broadcast %260 : vector<1x64xf32> to vector<16x64xf32>
    %262 = arith.mulf %257, %261 : vector<16x64xf32>
    %c1_99 = arith.constant 1 : index
    %c0_100 = arith.constant 0 : index
    %263 = vector.load %arg14[%c1_99, %c0_100] : memref<3x64xf32, #tpu.memory_space<vmem>>, vector<1x64xf32>
    %264 = vector.shape_cast %263 : vector<1x64xf32> to vector<64xf32>
    %265 = vector.shape_cast %264 : vector<64xf32> to vector<1x64xf32>
    %266 = vector.broadcast %265 : vector<1x64xf32> to vector<16x64xf32>
    %267 = arith.addf %262, %266 : vector<16x64xf32>
    %268 = arith.truncf %267 : vector<16x64xf32> to vector<16x64xbf16>
    %c2 = arith.constant 2 : index
    %c0_101 = arith.constant 0 : index
    %c0_102 = arith.constant 0 : index
    %269 = vector.load %arg3[%c2, %c0_101, %c0_102] : memref<3x64x192xbf16, #tpu.memory_space<vmem>>, vector<1x64x192xbf16>
    %270 = vector.shape_cast %269 : vector<1x64x192xbf16> to vector<64x192xbf16>
    %cst_103 = arith.constant dense<0.000000e+00> : vector<16x192xf32>
    %271 = tpu.matmul %268, %270, %cst_103 {dimension_numbers = #tpu.dot_dimension_numbers<[1], [0], [0], [1], [0, 0, 1, 1], [], []>} : vector<16x64xbf16>, vector<64x192xbf16>, vector<16x192xf32> -> vector<16x192xf32>
    %c2_104 = arith.constant 2 : index
    %c0_105 = arith.constant 0 : index
    %272 = vector.load %arg4[%c2_104, %c0_105] : memref<3x192xf32, #tpu.memory_space<vmem>>, vector<1x192xf32>
    %273 = vector.shape_cast %272 : vector<1x192xf32> to vector<192xf32>
    %274 = vector.shape_cast %273 : vector<192xf32> to vector<1x192xf32>
    %275 = vector.broadcast %274 : vector<1x192xf32> to vector<16x192xf32>
    %276 = arith.addf %271, %275 : vector<16x192xf32>
    %277 = vector.extract_strided_slice %276 {offsets = [0, 0], sizes = [16, 64], strides = [1, 1]} : vector<16x192xf32> to vector<16x64xf32>
    %278 = vector.shape_cast %277 : vector<16x64xf32> to vector<2x8x64xf32>
    %279 = vector.extract_strided_slice %276 {offsets = [0, 64], sizes = [16, 64], strides = [1, 1]} : vector<16x192xf32> to vector<16x64xf32>
    %280 = vector.shape_cast %279 : vector<16x64xf32> to vector<2x8x64xf32>
    %281 = vector.extract_strided_slice %276 {offsets = [0, 128], sizes = [16, 64], strides = [1, 1]} : vector<16x192xf32> to vector<16x64xf32>
    %282 = vector.shape_cast %281 : vector<16x64xf32> to vector<2x8x64xf32>
    %283 = tpu.concatenate %280, %280, %280, %280, %280, %280, %280, %280 in 1 : vector<2x8x64xf32>, vector<2x8x64xf32>, vector<2x8x64xf32>, vector<2x8x64xf32>, vector<2x8x64xf32>, vector<2x8x64xf32>, vector<2x8x64xf32>, vector<2x8x64xf32> -> vector<2x64x64xf32>
    %284 = vector.shape_cast %25 : vector<64x64xf32> to vector<1x64x64xf32>
    %285 = vector.broadcast %284 : vector<1x64x64xf32> to vector<2x64x64xf32>
    %286 = arith.mulf %283, %285 : vector<2x64x64xf32>
    %287 = tpu.concatenate %282, %282, %282, %282, %282, %282, %282, %282 in 1 : vector<2x8x64xf32>, vector<2x8x64xf32>, vector<2x8x64xf32>, vector<2x8x64xf32>, vector<2x8x64xf32>, vector<2x8x64xf32>, vector<2x8x64xf32>, vector<2x8x64xf32> -> vector<2x64x64xf32>
    %288 = vector.shape_cast %25 : vector<64x64xf32> to vector<1x64x64xf32>
    %289 = vector.broadcast %288 : vector<1x64x64xf32> to vector<2x64x64xf32>
    %290 = arith.mulf %287, %289 : vector<2x64x64xf32>
    "tpu.trace_start"() <{level = 10 : i32, message = "bqe,bre->bqr"}> : () -> ()
    %cst_106 = arith.constant dense<0.000000e+00> : vector<2x8x64xf32>
    %291 = tpu.matmul %278, %286, %cst_106 {dimension_numbers = #tpu.dot_dimension_numbers<[2], [2], [1], [1], [0, 0, 0, 1, 1, 1], [0], [0]>} : vector<2x8x64xf32>, vector<2x64x64xf32>, vector<2x8x64xf32> -> vector<2x8x64xf32>
    "tpu.trace_stop"() : () -> ()
    %292 = vector.shape_cast %291 : vector<2x8x64xf32> to vector<16x64xf32>
    %cst_107 = arith.constant dense<0xFF800000> : vector<16xf32>
    %293 = vector.multi_reduction <maximumf>, %292, %cst_107 [1] : vector<16x64xf32> to vector<16xf32>
    %294 = vector.shape_cast %293 : vector<16xf32> to vector<16x1xf32>
    %295 = vector.broadcast %294 : vector<16x1xf32> to vector<16x64xf32>
    %296 = arith.subf %292, %295 : vector<16x64xf32>
    %297 = math.exp %296 : vector<16x64xf32>
    %cst_108 = arith.constant dense<0.000000e+00> : vector<16x64xf32>
    %298 = tpu.matmul %297, %25, %cst_108 {dimension_numbers = #tpu.dot_dimension_numbers<[1], [0], [0], [1], [0, 0, 1, 1], [], []>} : vector<16x64xf32>, vector<64x64xf32>, vector<16x64xf32> -> vector<16x64xf32>
    %299 = vector.shape_cast %297 : vector<16x64xf32> to vector<2x8x64xf32>
    %300 = arith.truncf %299 : vector<2x8x64xf32> to vector<2x8x64xbf16>
    %301 = arith.truncf %290 : vector<2x64x64xf32> to vector<2x64x64xbf16>
    "tpu.trace_start"() <{level = 10 : i32, message = "bqr,bre->bqe"}> : () -> ()
    %cst_109 = arith.constant dense<0.000000e+00> : vector<2x8x64xf32>
    %302 = tpu.matmul %300, %301, %cst_109 {dimension_numbers = #tpu.dot_dimension_numbers<[2], [1], [1], [2], [0, 0, 0, 1, 1, 2], [0], [0]>} : vector<2x8x64xbf16>, vector<2x64x64xbf16>, vector<2x8x64xf32> -> vector<2x8x64xf32>
    "tpu.trace_stop"() : () -> ()
    %303 = vector.shape_cast %302 : vector<2x8x64xf32> to vector<16x64xf32>
    %304 = tpu.reciprocal %298 {approx = true} : vector<16x64xf32> -> vector<16x64xf32>
    %305 = arith.mulf %303, %304 : vector<16x64xf32>
    %306 = arith.truncf %305 : vector<16x64xf32> to vector<16x64xbf16>
    %c2_110 = arith.constant 2 : index
    %c0_111 = arith.constant 0 : index
    %c0_112 = arith.constant 0 : index
    %307 = vector.load %arg5[%c2_110, %c0_111, %c0_112] : memref<3x64x64xbf16, #tpu.memory_space<vmem>>, vector<1x64x64xbf16>
    %308 = vector.shape_cast %307 : vector<1x64x64xbf16> to vector<64x64xbf16>
    %cst_113 = arith.constant dense<0.000000e+00> : vector<16x64xf32>
    %309 = tpu.matmul %306, %308, %cst_113 {dimension_numbers = #tpu.dot_dimension_numbers<[1], [0], [0], [1], [0, 0, 1, 1], [], []>} : vector<16x64xbf16>, vector<64x64xbf16>, vector<16x64xf32> -> vector<16x64xf32>
    %c2_114 = arith.constant 2 : index
    %c0_115 = arith.constant 0 : index
    %310 = vector.load %arg6[%c2_114, %c0_115] : memref<3x64xf32, #tpu.memory_space<vmem>>, vector<1x64xf32>
    %311 = vector.shape_cast %310 : vector<1x64xf32> to vector<64xf32>
    %312 = vector.shape_cast %311 : vector<64xf32> to vector<1x64xf32>
    %313 = vector.broadcast %312 : vector<1x64xf32> to vector<16x64xf32>
    %314 = arith.addf %309, %313 : vector<16x64xf32>
    %315 = arith.addf %267, %314 : vector<16x64xf32>
    %cst_116 = arith.constant dense<0.000000e+00> : vector<16xf32>
    %316 = vector.multi_reduction <add>, %315, %cst_116 [1] : vector<16x64xf32> to vector<16xf32>
    %317 = vector.shape_cast %316 : vector<16xf32> to vector<16x1xf32>
    %cst_117 = arith.constant 6.400000e+01 : f32
    %318 = vector.broadcast %cst_117 : f32 to vector<16x1xf32>
    %319 = arith.divf %317, %318 : vector<16x1xf32>
    %320 = vector.broadcast %319 : vector<16x1xf32> to vector<16x64xf32>
    %321 = arith.subf %315, %320 : vector<16x64xf32>
    %322 = arith.mulf %321, %321 : vector<16x64xf32>
    %cst_118 = arith.constant dense<0.000000e+00> : vector<16xf32>
    %323 = vector.multi_reduction <add>, %322, %cst_118 [1] : vector<16x64xf32> to vector<16xf32>
    %324 = vector.shape_cast %323 : vector<16xf32> to vector<16x1xf32>
    %cst_119 = arith.constant 6.400000e+01 : f32
    %325 = vector.broadcast %cst_119 : f32 to vector<16x1xf32>
    %326 = arith.divf %324, %325 : vector<16x1xf32>
    %cst_120 = arith.constant 9.99999974E-6 : f32
    %327 = vector.broadcast %cst_120 : f32 to vector<16x1xf32>
    %328 = arith.addf %326, %327 : vector<16x1xf32>
    %329 = math.rsqrt %328 : vector<16x1xf32>
    %330 = vector.broadcast %329 : vector<16x1xf32> to vector<16x64xf32>
    %331 = arith.mulf %321, %330 : vector<16x64xf32>
    %c2_121 = arith.constant 2 : index
    %c0_122 = arith.constant 0 : index
    %332 = vector.load %arg7[%c2_121, %c0_122] : memref<3x64xf32, #tpu.memory_space<vmem>>, vector<1x64xf32>
    %333 = vector.shape_cast %332 : vector<1x64xf32> to vector<64xf32>
    %334 = vector.shape_cast %333 : vector<64xf32> to vector<1x64xf32>
    %335 = vector.broadcast %334 : vector<1x64xf32> to vector<16x64xf32>
    %336 = arith.mulf %331, %335 : vector<16x64xf32>
    %c2_123 = arith.constant 2 : index
    %c0_124 = arith.constant 0 : index
    %337 = vector.load %arg8[%c2_123, %c0_124] : memref<3x64xf32, #tpu.memory_space<vmem>>, vector<1x64xf32>
    %338 = vector.shape_cast %337 : vector<1x64xf32> to vector<64xf32>
    %339 = vector.shape_cast %338 : vector<64xf32> to vector<1x64xf32>
    %340 = vector.broadcast %339 : vector<1x64xf32> to vector<16x64xf32>
    %341 = arith.addf %336, %340 : vector<16x64xf32>
    %342 = arith.truncf %341 : vector<16x64xf32> to vector<16x64xbf16>
    %c2_125 = arith.constant 2 : index
    %c0_126 = arith.constant 0 : index
    %c0_127 = arith.constant 0 : index
    %343 = vector.load %arg9[%c2_125, %c0_126, %c0_127] : memref<3x64x2048xbf16, #tpu.memory_space<vmem>>, vector<1x64x2048xbf16>
    %344 = vector.shape_cast %343 : vector<1x64x2048xbf16> to vector<64x2048xbf16>
    %cst_128 = arith.constant dense<0.000000e+00> : vector<16x2048xf32>
    %345 = tpu.matmul %342, %344, %cst_128 {dimension_numbers = #tpu.dot_dimension_numbers<[1], [0], [0], [1], [0, 0, 1, 1], [], []>} : vector<16x64xbf16>, vector<64x2048xbf16>, vector<16x2048xf32> -> vector<16x2048xf32>
    %c2_129 = arith.constant 2 : index
    %c0_130 = arith.constant 0 : index
    %346 = vector.load %arg10[%c2_129, %c0_130] : memref<3x2048xf32, #tpu.memory_space<vmem>>, vector<1x2048xf32>
    %347 = vector.shape_cast %346 : vector<1x2048xf32> to vector<2048xf32>
    %348 = vector.shape_cast %347 : vector<2048xf32> to vector<1x2048xf32>
    %349 = vector.broadcast %348 : vector<1x2048xf32> to vector<16x2048xf32>
    %350 = arith.addf %345, %349 : vector<16x2048xf32>
    %cst_131 = arith.constant 0.000000e+00 : f32
    %351 = vector.broadcast %cst_131 : f32 to vector<16x2048xf32>
    %352 = arith.maximumf %350, %351 : vector<16x2048xf32>
    %353 = arith.truncf %352 : vector<16x2048xf32> to vector<16x2048xbf16>
    %c2_132 = arith.constant 2 : index
    %c0_133 = arith.constant 0 : index
    %c0_134 = arith.constant 0 : index
    %354 = vector.load %arg11[%c2_132, %c0_133, %c0_134] : memref<3x2048x64xbf16, #tpu.memory_space<vmem>>, vector<1x2048x64xbf16>
    %355 = vector.shape_cast %354 : vector<1x2048x64xbf16> to vector<2048x64xbf16>
    %cst_135 = arith.constant dense<0.000000e+00> : vector<16x64xf32>
    %356 = tpu.matmul %353, %355, %cst_135 {dimension_numbers = #tpu.dot_dimension_numbers<[1], [0], [0], [1], [0, 0, 1, 1], [], []>} : vector<16x2048xbf16>, vector<2048x64xbf16>, vector<16x64xf32> -> vector<16x64xf32>
    %c2_136 = arith.constant 2 : index
    %c0_137 = arith.constant 0 : index
    %357 = vector.load %arg12[%c2_136, %c0_137] : memref<3x64xf32, #tpu.memory_space<vmem>>, vector<1x64xf32>
    %358 = vector.shape_cast %357 : vector<1x64xf32> to vector<64xf32>
    %359 = vector.shape_cast %358 : vector<64xf32> to vector<1x64xf32>
    %360 = vector.broadcast %359 : vector<1x64xf32> to vector<16x64xf32>
    %361 = arith.addf %356, %360 : vector<16x64xf32>
    %362 = arith.addf %341, %361 : vector<16x64xf32>
    %cst_138 = arith.constant dense<0.000000e+00> : vector<16xf32>
    %363 = vector.multi_reduction <add>, %362, %cst_138 [1] : vector<16x64xf32> to vector<16xf32>
    %364 = vector.shape_cast %363 : vector<16xf32> to vector<16x1xf32>
    %cst_139 = arith.constant 6.400000e+01 : f32
    %365 = vector.broadcast %cst_139 : f32 to vector<16x1xf32>
    %366 = arith.divf %364, %365 : vector<16x1xf32>
    %367 = vector.broadcast %366 : vector<16x1xf32> to vector<16x64xf32>
    %368 = arith.subf %362, %367 : vector<16x64xf32>
    %369 = arith.mulf %368, %368 : vector<16x64xf32>
    %cst_140 = arith.constant dense<0.000000e+00> : vector<16xf32>
    %370 = vector.multi_reduction <add>, %369, %cst_140 [1] : vector<16x64xf32> to vector<16xf32>
    %371 = vector.shape_cast %370 : vector<16xf32> to vector<16x1xf32>
    %cst_141 = arith.constant 6.400000e+01 : f32
    %372 = vector.broadcast %cst_141 : f32 to vector<16x1xf32>
    %373 = arith.divf %371, %372 : vector<16x1xf32>
    %cst_142 = arith.constant 9.99999974E-6 : f32
    %374 = vector.broadcast %cst_142 : f32 to vector<16x1xf32>
    %375 = arith.addf %373, %374 : vector<16x1xf32>
    %376 = math.rsqrt %375 : vector<16x1xf32>
    %377 = vector.broadcast %376 : vector<16x1xf32> to vector<16x64xf32>
    %378 = arith.mulf %368, %377 : vector<16x64xf32>
    %c2_143 = arith.constant 2 : index
    %c0_144 = arith.constant 0 : index
    %379 = vector.load %arg13[%c2_143, %c0_144] : memref<3x64xf32, #tpu.memory_space<vmem>>, vector<1x64xf32>
    %380 = vector.shape_cast %379 : vector<1x64xf32> to vector<64xf32>
    %381 = vector.shape_cast %380 : vector<64xf32> to vector<1x64xf32>
    %382 = vector.broadcast %381 : vector<1x64xf32> to vector<16x64xf32>
    %383 = arith.mulf %378, %382 : vector<16x64xf32>
    %c2_145 = arith.constant 2 : index
    %c0_146 = arith.constant 0 : index
    %384 = vector.load %arg14[%c2_145, %c0_146] : memref<3x64xf32, #tpu.memory_space<vmem>>, vector<1x64xf32>
    %385 = vector.shape_cast %384 : vector<1x64xf32> to vector<64xf32>
    %386 = vector.shape_cast %385 : vector<64xf32> to vector<1x64xf32>
    %387 = vector.broadcast %386 : vector<1x64xf32> to vector<16x64xf32>
    %388 = arith.addf %383, %387 : vector<16x64xf32>
    %389 = tpu.iota {dimensions = array<i32: 0>} : vector<2x16xi32>
    %390 = arith.sitofp %389 : vector<2x16xi32> to vector<2x16xf32>
    %391 = tpu.iota {dimensions = array<i32: 1>} : vector<2x16xi32>
    %392 = arith.sitofp %391 : vector<2x16xi32> to vector<2x16xf32>
    %cst_147 = arith.constant 5.000000e-01 : f32
    %393 = vector.broadcast %cst_147 : f32 to vector<2x16xf32>
    %394 = arith.addf %392, %393 : vector<2x16xf32>
    %cst_148 = arith.constant 1.250000e-01 : f32
    %395 = vector.broadcast %cst_148 : f32 to vector<2x16xf32>
    %396 = arith.mulf %394, %395 : vector<2x16xf32>
    %397 = math.floor %396 : vector<2x16xf32>
    %398 = arith.cmpf oeq, %390, %397 : vector<2x16xf32>
    %399 = arith.extui %398 : vector<2x16xi1> to vector<2x16xi32>
    %400 = arith.sitofp %399 : vector<2x16xi32> to vector<2x16xf32>
    %cst_149 = arith.constant dense<0.000000e+00> : vector<2x64xf32>
    %401 = tpu.matmul %400, %388, %cst_149 {dimension_numbers = #tpu.dot_dimension_numbers<[1], [0], [0], [1], [0, 0, 1, 1], [], []>} : vector<2x16xf32>, vector<16x64xf32>, vector<2x64xf32> -> vector<2x64xf32>
    %c0_150 = arith.constant 0 : index
    %c0_151 = arith.constant 0 : index
    %402 = vector.load %arg15[%c0_150, %c0_151] : memref<64x128xf32, #tpu.memory_space<vmem>>, vector<64x128xf32>
    %cst_152 = arith.constant dense<0.000000e+00> : vector<2x128xf32>
    %403 = tpu.matmul %401, %402, %cst_152 {dimension_numbers = #tpu.dot_dimension_numbers<[1], [0], [0], [1], [0, 0, 1, 1], [], []>} : vector<2x64xf32>, vector<64x128xf32>, vector<2x128xf32> -> vector<2x128xf32>
    %c0_153 = arith.constant 0 : index
    %c0_154 = arith.constant 0 : index
    %404 = vector.load %arg16[%c0_153, %c0_154] : memref<1x128xf32, #tpu.memory_space<vmem>>, vector<1x128xf32>
    %405 = vector.shape_cast %404 : vector<1x128xf32> to vector<128xf32>
    %406 = vector.shape_cast %405 : vector<128xf32> to vector<1x128xf32>
    %407 = vector.broadcast %406 : vector<1x128xf32> to vector<2x128xf32>
    %408 = arith.addf %403, %407 : vector<2x128xf32>
    %c0_155 = arith.constant 0 : index
    %c0_156 = arith.constant 0 : index
    %c0_157 = arith.constant 0 : index
    %409 = vector.load %arg17[%c0_155, %c0_156, %c0_157] : memref<1x2x128xf32, #tpu.memory_space<vmem>>, vector<1x2x128xf32>
    %410 = vector.shape_cast %409 : vector<1x2x128xf32> to vector<2x128xf32>
    %411 = vector.shape_cast %408 : vector<2x128xf32> to vector<1x2x128xf32>
    tpu.vector_store %arg17[%c0_155, %c0_156, %c0_157], %411 {strides = array<i32>} : memref<1x2x128xf32, #tpu.memory_space<vmem>>, vector<1x2x128xf32>,
    return
  }
  func.func @transform_0(%arg0: i32) -> (i32, i32, i32) {
    %c0_i32 = arith.constant 0 : i32
    %c0_i32_0 = arith.constant 0 : i32
    %c0_i32_1 = arith.constant 0 : i32
    return %arg0, %c0_i32, %c0_i32_0 : i32, i32, i32
  }
  func.func @transform_1(%arg0: i32) -> (i32, i32) {
    %c0_i32 = arith.constant 0 : i32
    %c0_i32_0 = arith.constant 0 : i32
    %c0_i32_1 = arith.constant 0 : i32
    return %c0_i32, %c0_i32_0 : i32, i32
  }
  func.func @transform_2(%arg0: i32) -> (i32, i32, i32) {
    %c0_i32 = arith.constant 0 : i32
    %c0_i32_0 = arith.constant 0 : i32
    %c0_i32_1 = arith.constant 0 : i32
    %c0_i32_2 = arith.constant 0 : i32
    return %c0_i32, %c0_i32_0, %c0_i32_1 : i32, i32, i32
  }
  func.func @transform_3(%arg0: i32) -> (i32, i32) {
    %c0_i32 = arith.constant 0 : i32
    %c0_i32_0 = arith.constant 0 : i32
    %c0_i32_1 = arith.constant 0 : i32
    return %c0_i32, %c0_i32_0 : i32, i32
  }
  func.func @transform_4(%arg0: i32) -> (i32, i32, i32) {
    %c0_i32 = arith.constant 0 : i32
    %c0_i32_0 = arith.constant 0 : i32
    %c0_i32_1 = arith.constant 0 : i32
    %c0_i32_2 = arith.constant 0 : i32
    return %c0_i32, %c0_i32_0, %c0_i32_1 : i32, i32, i32
  }
  func.func @transform_5(%arg0: i32) -> (i32, i32) {
    %c0_i32 = arith.constant 0 : i32
    %c0_i32_0 = arith.constant 0 : i32
    %c0_i32_1 = arith.constant 0 : i32
    return %c0_i32, %c0_i32_0 : i32, i32
  }
  func.func @transform_6(%arg0: i32) -> (i32, i32) {
    %c0_i32 = arith.constant 0 : i32
    %c0_i32_0 = arith.constant 0 : i32
    %c0_i32_1 = arith.constant 0 : i32
    return %c0_i32, %c0_i32_0 : i32, i32
  }
  func.func @transform_7(%arg0: i32) -> (i32, i32) {
    %c0_i32 = arith.constant 0 : i32
    %c0_i32_0 = arith.constant 0 : i32
    %c0_i32_1 = arith.constant 0 : i32
    return %c0_i32, %c0_i32_0 : i32, i32
  }
  func.func @transform_8(%arg0: i32) -> (i32, i32, i32) {
    %c0_i32 = arith.constant 0 : i32
    %c0_i32_0 = arith.constant 0 : i32
    %c0_i32_1 = arith.constant 0 : i32
    %c0_i32_2 = arith.constant 0 : i32
    return %c0_i32, %c0_i32_0, %c0_i32_1 : i32, i32, i32
  }
  func.func @transform_9(%arg0: i32) -> (i32, i32) {
    %c0_i32 = arith.constant 0 : i32
    %c0_i32_0 = arith.constant 0 : i32
    %c0_i32_1 = arith.constant 0 : i32
    return %c0_i32, %c0_i32_0 : i32, i32
  }
  func.func @transform_10(%arg0: i32) -> (i32, i32, i32) {
    %c0_i32 = arith.constant 0 : i32
    %c0_i32_0 = arith.constant 0 : i32
    %c0_i32_1 = arith.constant 0 : i32
    %c0_i32_2 = arith.constant 0 : i32
    return %c0_i32, %c0_i32_0, %c0_i32_1 : i32, i32, i32
  }
  func.func @transform_11(%arg0: i32) -> (i32, i32) {
    %c0_i32 = arith.constant 0 : i32
    %c0_i32_0 = arith.constant 0 : i32
    %c0_i32_1 = arith.constant 0 : i32
    return %c0_i32, %c0_i32_0 : i32, i32
  }
  func.func @transform_12(%arg0: i32) -> (i32, i32) {
    %c0_i32 = arith.constant 0 : i32
    %c0_i32_0 = arith.constant 0 : i32
    %c0_i32_1 = arith.constant 0 : i32
    return %c0_i32, %c0_i32_0 : i32, i32
  }
  func.func @transform_13(%arg0: i32) -> (i32, i32) {
    %c0_i32 = arith.constant 0 : i32
    %c0_i32_0 = arith.constant 0 : i32
    %c0_i32_1 = arith.constant 0 : i32
    return %c0_i32, %c0_i32_0 : i32, i32
  }
  func.func @transform_14(%arg0: i32) -> (i32, i32) {
    %c0_i32 = arith.constant 0 : i32
    %c0_i32_0 = arith.constant 0 : i32
    %c0_i32_1 = arith.constant 0 : i32
    return %c0_i32, %c0_i32_0 : i32, i32
  }
  func.func @transform_15(%arg0: i32) -> (i32, i32) {
    %c0_i32 = arith.constant 0 : i32
    %c0_i32_0 = arith.constant 0 : i32
    %c0_i32_1 = arith.constant 0 : i32
    return %c0_i32, %c0_i32_0 : i32, i32
  }
  func.func @transform_16(%arg0: i32) -> (i32, i32, i32) {
    %c0_i32 = arith.constant 0 : i32
    %c0_i32_0 = arith.constant 0 : i32
    %c0_i32_1 = arith.constant 0 : i32
    return %arg0, %c0_i32, %c0_i32_0 : i32, i32, i32
  }
}

</mosaic_0001>

<bundles_post_ra>
// kernel: tpu_custom_call.1
= control target key start
LH: loop header
LB: loop body
LE: loop exit
PB: predicated region body
PF: predicated region fallthrough
CT: control target
= control target key end

     0   :  { %s15689_s0 = inlined_call_operand.vmem [shape: s32[1,16,1], index: 0, kind: input, shape index: {}]   ;;  %s15690_s1 = inlined_call_operand.vmem [shape: f32[104,64], index: 1, kind: input, shape index: {}]   ;;  %s15691_s2 = inlined_call_operand.vmem [shape: bf16[3,64,192], index: 2, kind: input, shape index: {}]   ;;  %s15692_s3 = inlined_call_operand.vmem [shape: f32[3,192], index: 3, kind: input, shape index: {}]   ;;  %s15693_s4 = inlined_call_operand.vmem [shape: bf16[3,64,64], index: 4, kind: input, shape index: {}]   ;;  %s15694_s5 = inlined_call_operand.vmem [shape: f32[3,64], index: 5, kind: input, shape index: {}]   ;;  %s15695_s6 = inlined_call_operand.vmem [shape: f32[3,64], index: 6, kind: input, shape index: {}]   ;;  %s15696_s7 = inlined_call_operand.vmem [shape: f32[3,64], index: 7, kind: input, shape index: {}]   ;;  %s15697_s8 = inlined_call_operand.vmem [shape: bf16[3,64,2048], index: 8, kind: input, shape index: {}]   ;;  %s15698_s9 = inlined_call_operand.vmem [shape: f32[3,2048], index: 9, kind: input, shape index: {}]   ;;  %s15699_s10 = inlined_call_operand.vmem [shape: bf16[3,2048,64], index: 10, kind: input, shape index: {}]   ;;  %s15700_s11 = inlined_call_operand.vmem [shape: f32[3,64], index: 11, kind: input, shape index: {}]   ;;  %s15701_s12 = inlined_call_operand.vmem [shape: f32[3,64], index: 12, kind: input, shape index: {}]   ;;  %s15702_s13 = inlined_call_operand.vmem [shape: f32[3,64], index: 13, kind: input, shape index: {}]   ;;  %s15703_s14 = inlined_call_operand.vmem [shape: f32[64,128], index: 14, kind: input, shape index: {}]   ;;  %s15704_s15 = inlined_call_operand.vmem [shape: f32[1,128], index: 15, kind: input, shape index: {}]   ;;  %s15705_s16 = inlined_call_operand.hbm [shape: f32[1,2,128], index: 16, kind: output, shape index: {}]  }
   0x1   :  { %15717 = sst [smem:[#allocation6_spill]] %s15689_s0 }
   0x2   :  { %s15718_s23 = sld [smem:[#allocation6_spill]]  ;;  %v71_v1 = vld [vmem:[%s15690_s1] sm:$0xff]  ;;  %v15712_v2 = vmov 0   ;;  %v72_v3 = vld [vmem:[%s15690_s1 + $0x8] sm:$0xff]  ;;  %v73_v4 = vld [vmem:[%s15690_s1 + $0x10] sm:$0xff]  ;;  %v57_v13 = vlaneseq  ;;  %vm84_vm0 = vcmask 850944  }
   0x3   :  { %11952 = vset.pattern.permute.xlu0 %v15712_v2  ;;  %v74_v5 = vld [vmem:[%s15690_s1 + $0x18] sm:$0xff]  ;;  %332 = vmatprep.mubr.bf16.mxu1 %v15712_v2  ;;  %v11762_v6 = vpack.c.bf16 %v72_v3, %v71_v1  ;;  %v75_v9 = vld [vmem:[%s15690_s1 + $0x20] sm:$0xff]  ;;  %v76_v10 = vld [vmem:[%s15690_s1 + $0x28] sm:$0xff]  ;;  %v15710_v33 = vmov 0.0   ;;  %s12599_s22 = smov 64  }
   0x4   :  { %v11766_v7 = vpack.c.bf16 %v74_v5, %v73_v4  ;;  %v77_v11 = vld [vmem:[%s15690_s1 + $0x30] sm:$0xff]  ;;  %v78_v12 = vld [vmem:[%s15690_s1 + $0x38] sm:$0xff]  ;;  %v11770_v14 = vpack.c.bf16 %v76_v10, %v75_v9  ;;  %v12093_v15 = vld [vmem:[%s15691_s2 + $0x4] ss:$8 sps:$4 sm:$0xff]   ;;  %v58_v19 = vand.u32 127, %v57_v13  ;;  %v12756_v37 = vshrl.u32 %v57_v13, 7 }
   0x5   :  { %11763 = vmatprep.subr.bf16.mxu0 %v11762_v6  ;;  %v12095_v16 = vld [vmem:[%s15691_s2] ss:$8 sps:$4 sm:$0xff]   ;;  %v12096_v20 = vld [vmem:[%s15691_s2 + $0x14] ss:$8 sps:$4 sm:$0xff]   ;;  %v12098_v21 = vld [vmem:[%s15691_s2 + $0x10] ss:$8 sps:$4 sm:$0xff]   ;;  %v11774_v22 = vpack.c.bf16 %v78_v12, %v77_v11  ;;  %300 = vmatprep.subr.bf16.mxu1 %v12093_v15 }
   0x6   :  { %11765 = vmatpush3.bf16.msra.mxu0 %v11762_v6  ;;  %v79_v17 = vld [vmem:[%s15690_s1 + $0x40] sm:$0xff]  ;;  %v80_v18 = vld [vmem:[%s15690_s1 + $0x48] sm:$0xff]  ;;  %301 = vmatpush1.bf16.msra.mxu1 %v12095_v16  ;;  %v81_v24 = vld [vmem:[%s15690_s1 + $0x50] sm:$0xff]  ;;  %v207_v30 = vcvt.s32.f32 %v58_v19  ;;  %15719 = vst [vmem:[#allocation5_spill] sm:$0xff] %v12756_v37  ;;  %v168_v42 = vadd.s32 8, %v12756_v37  ;;  %v15707_v43 = vcvt.s32.f32 %v12756_v37  ;;  %v169_v44 = vadd.s32 16, %v12756_v37 }
   0x7   :  { %11767 = vmatprep.subr.bf16.mxu0 %v11766_v7  ;;  %v12099_v23 = vld [vmem:[%s15691_s2 + $0x24] ss:$8 sps:$4 sm:$0xff]   ;;  %302 = vmatprep.subr.bf16.mxu1 %v12096_v20  ;;  %v82_v25 = vld [vmem:[%s15690_s1 + $0x58] sm:$0xff]  ;;  %v12101_v26 = vld [vmem:[%s15691_s2 + $0x20] ss:$8 sps:$4 sm:$0xff]   ;;  %v11778_v27 = vpack.c.bf16 %v80_v18, %v79_v17  ;;  %v170_v45 = vadd.s32 24, %v12756_v37 }
   0x8   :  { %v55_v0 = vld [vmem:[%s15718_s23] sm:$0xff]  ;;  %v56_v8 = vld [vmem:[%s15718_s23 + $0x8] sm:$0xff]  ;;  %v11782_v28 = vpack.c.bf16 %v82_v25, %v81_v24  ;;  %v208_v31 = vadd.f32 0.5, %v207_v30  ;;  %v12102_v39 = vld [vmem:[%s15691_s2 + $0x34] ss:$8 sps:$4 sm:$0xff]   ;;  %v173_v46 = vadd.s32 48, %v12756_v37  ;;  %v176_v50 = vcvt.s32.f32 %v168_v42 }
   0x9   :  { %60 = vperm.xlu0 %11952, %v55_v0   ;;  %v83_v29 = vld [vmem:[%s15690_s1 + $0x60] sm:$0xff]  ;;  %v12104_v40 = vld [vmem:[%s15691_s2 + $0x30] ss:$8 sps:$4 sm:$0xff]   ;;  %v174_v47 = vadd.s32 56, %v12756_v37  ;;  %v171_v48 = vadd.s32 32, %v12756_v37  ;;  %v172_v49 = vadd.s32 40, %v12756_v37  ;;  %v177_v52 = vcvt.s32.f32 %v169_v44 }
   0xa   :  { %11769 = vmatpush3.bf16.msra.mxu0 %v11766_v7  ;;  %303 = vmatpush1.bf16.msra.mxu1 %v12098_v21  ;;  %v209_v38 = vmul.f32 0.125, %v208_v31  ;;  %v183_v51 = vadd.f32 0.5, %v15707_v43  ;;  %v178_v53 = vcvt.s32.f32 %v170_v45  ;;  %v181_v54 = vcvt.s32.f32 %v173_v46 }
   0xb   :  { %11771 = vmatprep.subr.bf16.mxu0 %v11770_v14  ;;  %304 = vmatprep.subr.bf16.mxu1 %v12099_v23  ;;  %v182_v55 = vcvt.s32.f32 %v174_v47  ;;  %v179_v56 = vcvt.s32.f32 %v171_v48  ;;  %v180_v57 = vcvt.s32.f32 %v172_v49  ;;  %v184_v58 = vadd.f32 0.5, %v176_v50 }
   0xc   :  { %v12764_v41 = vfloor.f32 %v209_v38  ;;  %v191_v59 = vmul.f32 0.125, %v183_v51  ;;  %v185_v60 = vadd.f32 0.5, %v177_v52  ;;  %v186_v61 = vadd.f32 0.5, %v178_v53 }
   0xd   :  { %63 = vperm.xlu0 %11952, %v56_v8   ;;  %v189_v62 = vadd.f32 0.5, %v181_v54  ;;  %v190_v63 = vadd.f32 0.5, %v182_v55  ;;  %v187_v0 = vadd.f32 0.5, %v179_v56  ;;  %v188_v1 = vadd.f32 0.5, %v180_v57 }
   0xe   :  { %11773 = vmatpush3.bf16.msra.mxu0 %v11770_v14  ;;  %305 = vmatpush1.bf16.msra.mxu1 %v12101_v26  ;;  %v192_v3 = vmul.f32 0.125, %v184_v58  ;;  %v199_v4 = vfloor.f32 %v191_v59  ;;  %v193_v5 = vmul.f32 0.125, %v185_v60  ;;  %v194_v6 = vmul.f32 0.125, %v186_v61 }
   0xf   :  { %11775 = vmatprep.subr.bf16.mxu0 %v11774_v22  ;;  %306 = vmatprep.subr.bf16.mxu1 %v12102_v39  ;;  %v197_v7 = vmul.f32 0.125, %v189_v62  ;;  %v198_v8 = vmul.f32 0.125, %v190_v63  ;;  %v195_v9 = vmul.f32 0.125, %v187_v0  ;;  %v196_v10 = vmul.f32 0.125, %v188_v1 }
  0x10   :  { %v200_v11 = vfloor.f32 %v192_v3  ;;  %vm12777_vm3 = vcmp.eq.f32.partialorder %v199_v4, %v12764_v41  ;;  %v201_v13 = vfloor.f32 %v193_v5  ;;  %v202_v14 = vfloor.f32 %v194_v6 }
  0x11   :  { %v12784_v15 = vsel %vm12777_vm3, 1.0, %v15710_v33  ;;  %v205_v16 = vfloor.f32 %v197_v7  ;;  %v206_v17 = vfloor.f32 %v198_v8  ;;  %v203_v18 = vfloor.f32 %v195_v9 }
  0x12   :  { %11777 = vmatpush3.bf16.msra.mxu0 %v11774_v22  ;;  %307 = vmatpush1.bf16.msra.mxu1 %v12104_v40  ;;  %vm12787_vm4 = vcmp.eq.f32.partialorder %v200_v11, %v12764_v41  ;;  %vm12792_vm5 = vcmp.eq.f32.partialorder %v201_v13, %v12764_v41  ;;  %vm12797_vm6 = vcmp.eq.f32.partialorder %v202_v14, %v12764_v41  ;;  %v204_v22 = vfloor.f32 %v196_v10 }
  0x13   :  { %11779 = vmatprep.subr.bf16.mxu0 %v11778_v27  ;;  %v12804_v23 = vsel %vm12787_vm4, 1.0, %v15710_v33  ;;  %v12809_v24 = vsel %vm12792_vm5, 1.0, %v15710_v33  ;;  %v12814_v25 = vsel %vm12797_vm6, 1.0, %v15710_v33  ;;  %vm12817_vm7 = vcmp.eq.f32.partialorder %v205_v16, %v12764_v41 }
  0x14   :  { %vm12824_vm8 = vcmp.eq.f32.partialorder %v206_v17, %v12764_v41  ;;  %vm12839_vm9 = vcmp.eq.f32.partialorder %v203_v18, %v12764_v41  ;;  %vm12844_vm10 = vcmp.eq.f32.partialorder %v204_v22, %v12764_v41 }
  0x15   :  { %v12836_v30 = vsel %vm12824_vm8, 1.0, %v15710_v33 }
  0x16   :  { %11781 = vmatpush3.bf16.msra.mxu0 %v11778_v27  ;;  %v11953_v27 = vpack.i.bf16 %v12804_v23, %v12784_v15 }
  0x17   :  { %11783 = vmatprep.subr.bf16.mxu0 %v11782_v28 }
  0x18   :  { %11954 = vrot.lane.b32.xlu1 %v11953_v27, %s12599_s22 }
  0x1a   :  { %11785 = vmatpush3.bf16.msra.mxu0 %v11782_v28 }
  0x1b   :  { %11452 = vmatprep.subr.mxu0 %v83_v29 }
  0x1e   :  { %11453 = vmatpush3.msra.mxu0 %v83_v29  ;;  %v12831_v29 = vsel %vm12817_vm7, 1.0, %v15710_v33 }
  0x1f   :  { %v11968_v39 = vpack.i.bf16 %v12836_v30, %v12831_v29 }
  0x88   :  { %v61_v32 = vpop.permute.xlu0 %60 }
  0x89   :  { %vm65_vm1 = vcmp.eq.s32.totalorder %v58_v19, %v61_v32 }
  0x8a   :  { %v9299_v34 = vsel %vm65_vm1, 1.0, %v15710_v33 }
  0x8b   :  { %11454 = vmatprep.mubr.msk.f32.mxu0 %vm84_vm0, %v9299_v34  ;;  %v11958_v34 = vpack.i.bf16 %v12814_v25, %v12809_v24 }
  0x8c   :  { %v64_v35 = vpop.permute.xlu0 %63 }
  0x8d   :  { %vm66_vm2 = vcmp.eq.s32.totalorder %v58_v19, %v64_v35  ;;  %v12854_v35 = vsel %vm12839_vm9, 1.0, %v15710_v33  ;;  %11959 = vrot.lane.b32.xlu1 %v11958_v34, %s12599_s22 }
  0x8e   :  { %v9300_v36 = vsel %vm66_vm2, 1.0, %v15710_v33 }
  0x8f   :  { %11455 = vmatmul.mubr.msk.f32.vlgmr.msra.gmra.mrb[0].mxu0 %vm84_vm0, %v9300_v36  ;;  %v12859_v36 = vsel %vm12844_vm10, 1.0, %v15710_v33 }
  0x90   :  { %v11963_v38 = vpack.i.bf16 %v12859_v36, %v12854_v35 }
  0x91   :  { %11969 = vrot.lane.b32.xlu1 %v11968_v39, %s12599_s22 }
  0x92   :  { %11964 = vrot.lane.b32.xlu0 %v11963_v38, %s12599_s22 }
  0x93   :  { %21 = vsyncpa [#allocation3], 0  ;;  %vm296_vm11 = vcmask 523264   ;;  %v11955_v45 = vpop.permute.xlu1 %11954  ;;  %v12876_v46 = vsub.s32 0, %v12756_v37  ;;  %v12883_v49 = vsub.s32 1, %v12756_v37  ;;  %v15714_v53 = vmov 0.0|0.0  }
  0x94   :  { %v244_v47 = vld [vmem:[%s15692_s3] ss:$4 sm:$0x3]  ;;  %v12885_v50 = vunpack.i.h.bf16 %v11955_v45  ;;  %v12887_v51 = vunpack.i.l.bf16 %v11955_v45  ;;  %11786 = vmatprep.subr.bf16.mxu1 %v15714_v53  ;;  %11802 = vmatprep.subr.bf16.mxu0 %v15714_v53  ;;  %vm12601_vm12 = vmmov 0   ;;  %vm12961_vm13 = vmpackc.low %vm296_vm11, %vm296_vm11 }
  0x95   :  { %v249_v48 = vrot.slane %v244_v47, %v12876_v46  ;;  %v12900_v60 = vrot.slane %v244_v47, %v12883_v49  ;;  %11492 = vmatprep.mubr.msk.f32.mxu0 %vm12601_vm12, %v15710_v33  ;;  %vm13014_vm14 = vmpackc.low %vm12787_vm4, %vm12777_vm3  ;;  %vm9122_vm3 = vcmask 130048  }
  0x96   :  { %vm13028_vm15 = vmpackc.low %vm12797_vm6, %vm12792_vm5 }
  0x97   :  { %vm13039_vm0 = vmpackc.low %vm12844_vm10, %vm12839_vm9 }
  0x98   :  { %vm13053_vm1 = vmpackc.low %vm12824_vm8, %vm12817_vm7 }
  0xff   :  { %v11960_v52 = vpop.permute.xlu1 %11959 }
 0x100   :  { %v12891_v54 = vunpack.i.l.bf16 %v11960_v52  ;;  %v12893_v56 = vunpack.i.h.bf16 %v11960_v52 }
 0x103   :  { %v11970_v7 = vpop.permute.xlu1 %11969 }
 0x104   :  { %v11965_v58 = vpop.permute.xlu0 %11964  ;;  %v12928_v17 = vunpack.i.h.bf16 %v11970_v7  ;;  %v12930_v18 = vunpack.i.l.bf16 %v11970_v7 }
 0x105   :  { %v12908_v3 = vunpack.i.h.bf16 %v11965_v58  ;;  %v12910_v4 = vunpack.i.l.bf16 %v11965_v58 }
 0x162   :  { %v12868_v40 = vpop.f32.mrb[0].mxu0 }
 0x163   :  { %v12870_v42 = vpop.f32.mrb[1].mxu0 }
 0x164   :  { %v235_v44 = vpack.c.bf16 %v12868_v40, %v12870_v42 }
 0x166   :  { %9319 = vmatmul.mubr.msk.bf16.vlgmr.msra.gmra.mrb[0].mxu1 %vm296_vm11, %v235_v44 }
 0x167   :  { %11473 = vmatprep.mubr.msk.f32.mxu1 %vm12601_vm12, %v15710_v33 }
 0x239   :  { %v334_v55 = vpop.f32.mrb[0].mxu1 }
 0x23a   :  { %v12895_v57 = vadd.f32 %v334_v55, %v249_v48  ;;  %v12897_v59 = vpop.f32.mrb[1].mxu1 }
 0x23b   :  { %v338_v61 = vpop.f32.mrb[2].mxu1 }
 0x23c   :  { %v12902_v62 = vadd.f32 %v338_v61, %v249_v48  ;;  %v340_v63 = vpop.f32.mrb[3].mxu1  ;;  %v375_v0 = vmul.f32 %v12887_v51, %v12895_v57  ;;  %v376_v1 = vmul.f32 %v12885_v50, %v12895_v57  ;;  %v377_v6 = vmul.f32 %v12891_v54, %v12895_v57 }
 0x23d   :  { %v12913_v5 = vadd.f32 %v340_v63, %v12900_v60  ;;  %v378_v11 = vmul.f32 %v12893_v56, %v12895_v57  ;;  %v379_v27 = vmul.f32 %v12910_v4, %v12895_v57  ;;  %v380_v34 = vmul.f32 %v12908_v3, %v12895_v57 }
 0x23e   :  { %v11973_v8 = vpack.i.bf16 %v376_v1, %v375_v0  ;;  %v383_v9 = vmul.f32 %v12887_v51, %v12902_v62  ;;  %v384_v10 = vmul.f32 %v12885_v50, %v12902_v62  ;;  %v385_v14 = vmul.f32 %v12891_v54, %v12902_v62 }
 0x23f   :  { %v386_v16 = vmul.f32 %v12893_v56, %v12902_v62  ;;  %v11983_v22 = vpack.i.bf16 %v378_v11, %v377_v6  ;;  %v387_v39 = vmul.f32 %v12910_v4, %v12902_v62  ;;  %v388_v44 = vmul.f32 %v12908_v3, %v12902_v62 }
 0x240   :  { %11974 = vrot.lane.b32.xlu0 %v11973_v8, %s12599_s22  ;;  %v11978_v13 = vpack.i.bf16 %v384_v10, %v383_v9  ;;  %v11993_v45 = vpack.i.bf16 %v380_v34, %v379_v27  ;;  %v381_v47 = vmul.f32 %v12930_v18, %v12895_v57  ;;  %v382_v48 = vmul.f32 %v12928_v17, %v12895_v57 }
 0x241   :  { %v11988_v38 = vpack.i.bf16 %v386_v16, %v385_v14  ;;  %v11998_v52 = vpack.i.bf16 %v388_v44, %v387_v39  ;;  %v389_v55 = vmul.f32 %v12930_v18, %v12902_v62  ;;  %v390_v58 = vmul.f32 %v12928_v17, %v12902_v62 }
 0x242   :  { %11979 = vrot.lane.b32.xlu1 %v11978_v13, %s12599_s22  ;;  %v12003_v61 = vpack.i.bf16 %v382_v48, %v381_v47 }
 0x243   :  { %v12008_v63 = vpack.i.bf16 %v390_v58, %v389_v55 }
 0x244   :  { %11984 = vrot.lane.b32.xlu0 %v11983_v22, %s12599_s22 }
 0x246   :  { %11989 = vrot.lane.b32.xlu1 %v11988_v38, %s12599_s22 }
 0x248   :  { %11994 = vrot.lane.b32.xlu0 %v11993_v45, %s12599_s22 }
 0x24a   :  { %11999 = vrot.lane.b32.xlu1 %v11998_v52, %s12599_s22 }
 0x24c   :  { %12004 = vrot.lane.b32.xlu0 %v12003_v61, %s12599_s22 }
 0x24e   :  { %12009 = vrot.lane.b32.xlu1 %v12008_v63, %s12599_s22 }
 0x2b2   :  { %v11975_v0 = vpop.permute.xlu0 %11974 }
 0x2b3   :  { %v11977_v1 = vunpack.i.h.bf16 %v11975_v0  ;;  %v11976_v6 = vunpack.i.l.bf16 %v11975_v0 }
 0x2b4   :  { %v11980_v7 = vpop.permute.xlu1 %11979 }
 0x2b5   :  { %v11787_v9 = vpack.c.bf16 %v11977_v1, %v11976_v6  ;;  %v11982_v10 = vunpack.i.h.bf16 %v11980_v7  ;;  %v11981_v11 = vunpack.i.l.bf16 %v11980_v7 }
 0x2b6   :  { %v11985_v13 = vpop.permute.xlu0 %11984 }
 0x2b7   :  { %v11803_v14 = vpack.c.bf16 %v11982_v10, %v11981_v11  ;;  %11789 = vmatpush3.bf16.xpose.msk.msra.mxu1 %vm12961_vm13, %v11787_v9  ;;  %v11987_v22 = vunpack.i.h.bf16 %v11985_v13  ;;  %v11986_v27 = vunpack.i.l.bf16 %v11985_v13  ;;  %v337_v13 = vadd.f32 %v12897_v59, %v12900_v60 }
 0x2b8   :  { %v11990_v16 = vpop.permute.xlu1 %11989  ;;  %11790 = vmatprep.subr.bf16.mxu1 %v15714_v53 }
 0x2b9   :  { %11805 = vmatpush3.bf16.xpose.msk.msra.mxu0 %vm12961_vm13, %v11803_v14  ;;  %v11992_v34 = vunpack.i.h.bf16 %v11990_v16  ;;  %v11991_v38 = vunpack.i.l.bf16 %v11990_v16  ;;  %v11791_v39 = vpack.c.bf16 %v11987_v22, %v11986_v27  ;;  %v391_v16 = vmul.f32 %v12784_v15, %v337_v13 }
 0x2ba   :  { %11806 = vmatprep.subr.bf16.mxu0 %v15714_v53  ;;  %v11995_v44 = vpop.permute.xlu0 %11994  ;;  %v392_v22 = vmul.f32 %v12804_v23, %v337_v13  ;;  %v394_v59 = vmul.f32 %v12814_v25, %v337_v13 }
 0x2bb   :  { %v11807_v45 = vpack.c.bf16 %v11992_v34, %v11991_v38  ;;  %v11997_v48 = vunpack.i.h.bf16 %v11995_v44  ;;  %v11996_v52 = vunpack.i.l.bf16 %v11995_v44  ;;  %v393_v34 = vmul.f32 %v12809_v24, %v337_v13 }
 0x2bc   :  { %v12000_v47 = vpop.permute.xlu1 %11999  ;;  %v728_v27 = vpack.c.bf16 %v392_v22, %v391_v16  ;;  %v395_v38 = vmul.f32 %v12854_v35, %v337_v13  ;;  %v397_v44 = vmul.f32 %v12831_v29, %v337_v13  ;;  %v402_v16 = vmul.f32 %v12814_v25, %v12913_v5 }
 0x2bd   :  { %v12002_v55 = vunpack.i.h.bf16 %v12000_v47  ;;  %v12001_v58 = vunpack.i.l.bf16 %v12000_v47  ;;  %v11795_v61 = vpack.c.bf16 %v11997_v48, %v11996_v52  ;;  %v729_v60 = vpack.c.bf16 %v394_v59, %v393_v34 }
 0x2be   :  { %v12005_v63 = vpop.permute.xlu0 %12004  ;;  %v404_v34 = vmul.f32 %v12859_v36, %v12913_v5 }
 0x2bf   :  { %11793 = vmatpush3.bf16.xpose.msk.msra.mxu1 %vm12961_vm13, %v11791_v39  ;;  %v11811_v0 = vpack.c.bf16 %v12002_v55, %v12001_v58  ;;  %v12007_v6 = vunpack.i.h.bf16 %v12005_v63  ;;  %v12006_v7 = vunpack.i.l.bf16 %v12005_v63  ;;  %v396_v39 = vmul.f32 %v12859_v36, %v337_v13 }
 0x2c0   :  { %11794 = vmatprep.subr.bf16.mxu1 %v15714_v53  ;;  %v12010_v1 = vpop.permute.xlu1 %12009 }
 0x2c1   :  { %11809 = vmatpush3.bf16.xpose.msk.msra.mxu0 %vm12961_vm13, %v11807_v45  ;;  %v12012_v9 = vunpack.i.h.bf16 %v12010_v1  ;;  %v12011_v10 = vunpack.i.l.bf16 %v12010_v1  ;;  %v11799_v11 = vpack.c.bf16 %v12007_v6, %v12006_v7  ;;  %v398_v45 = vmul.f32 %v12836_v30, %v337_v13 }
 0x2c2   :  { %11810 = vmatprep.subr.bf16.mxu0 %v15714_v53  ;;  %v399_v6 = vmul.f32 %v12784_v15, %v12913_v5  ;;  %v400_v7 = vmul.f32 %v12804_v23, %v12913_v5 }
 0x2c3   :  { %v11815_v14 = vpack.c.bf16 %v12012_v9, %v12011_v10 }
 0x2c4   :  { %v732_v13 = vpack.c.bf16 %v400_v7, %v399_v6 }
 0x2c7   :  { %11797 = vmatpush3.bf16.xpose.msk.msra.mxu1 %vm12961_vm13, %v11795_v61 }
 0x2c8   :  { %11798 = vmatprep.subr.bf16.mxu1 %v15714_v53 }
 0x2c9   :  { %11813 = vmatpush3.bf16.xpose.msk.msra.mxu0 %vm12961_vm13, %v11811_v0  ;;  %v15708_v0 = vmov 1.0|1.0  }
 0x2ca   :  { %11814 = vmatprep.subr.bf16.mxu0 %v15714_v53 }
 0x2cf   :  { %11801 = vmatpush3.bf16.xpose.msk.msra.mxu1 %vm12961_vm13, %v11799_v11 }
 0x2d0   :  { %11819 = vmatprep.subr.msk.bf16.mxu1 %vm13014_vm14, %v15708_v0 }
 0x2d1   :  { %11817 = vmatpush3.bf16.xpose.msk.msra.mxu0 %vm12961_vm13, %v11815_v14  ;;  %v401_v14 = vmul.f32 %v12809_v24, %v12913_v5 }
 0x2d2   :  { %11514 = vmatprep.subr.bf16.mxu0 %v15710_v33 }
 0x2d3   :  { %v733_v22 = vpack.c.bf16 %v402_v16, %v401_v14 }
 0x2d6   :  { %11474 = vmatmul.mubr.msk.f32.vlgmr.msra.gmra.mrb[4].mxu1 %vm296_vm11, %v12895_v57  ;;  %v730_v57 = vpack.c.bf16 %v396_v39, %v395_v38  ;;  %v406_v38 = vmul.f32 %v12836_v30, %v12913_v5 }
 0x2d7   :  { %11821 = vmatpush3.bf16.msk.msra.mxu1 %vm13014_vm14, %v15708_v0 }
 0x2d8   :  { %11493 = vmatmul.mubr.msk.f32.vlgmr.msra.gmra.mrb[2].mxu0 %vm296_vm11, %v12902_v62  ;;  %v731_v62 = vpack.c.bf16 %v398_v45, %v397_v44  ;;  %11823 = vmatprep.subr.msk.bf16.mxu1 %vm13028_vm15, %v15708_v0  ;;  %v12105_v44 = vld [vmem:[%s15693_s4] sm:$0xff]   ;;  %v12106_v45 = vld [vmem:[%s15693_s4 + $0x8] sm:$0xff]  }
 0x2d9   :  { %11515 = vmatpush3.bf16.msra.mxu0 %v728_v27  ;;  %11522 = vmatprep.mubr.msk.bf16.mxu0 %vm12601_vm12, %v15710_v33  ;;  %v403_v27 = vmul.f32 %v12854_v35, %v12913_v5 }
 0x2da   :  { %11516 = vmatprep.subr.bf16.mxu0 %v15710_v33 }
 0x2db   :  { %11825 = vmatpush3.bf16.msk.msra.mxu1 %vm13028_vm15, %v15708_v0  ;;  %v734_v59 = vpack.c.bf16 %v404_v34, %v403_v27 }
 0x2dc   :  { %11827 = vmatprep.subr.msk.bf16.mxu1 %vm13039_vm0, %v15708_v0 }
 0x2dd   :  { %11517 = vmatpush3.bf16.msra.mxu0 %v729_v60  ;;  %v405_v60 = vmul.f32 %v12831_v29, %v12913_v5  ;;  %v12107_v5 = vld [vmem:[%s15693_s4 + $0x10] sm:$0xff]  }
 0x2de   :  { %11518 = vmatprep.subr.bf16.mxu0 %v15710_v33 }
 0x2df   :  { %11829 = vmatpush3.bf16.msk.msra.mxu1 %vm13039_vm0, %v15708_v0  ;;  %v735_v39 = vpack.c.bf16 %v406_v38, %v405_v60 }
 0x2e0   :  { %11831 = vmatprep.subr.msk.bf16.mxu1 %vm13053_vm1, %v15708_v0 }
 0x2e1   :  { %11519 = vmatpush3.bf16.msra.mxu0 %v730_v57 }
 0x2e2   :  { %11520 = vmatprep.subr.bf16.mxu0 %v15710_v33 }
 0x2e3   :  { %11833 = vmatpush3.bf16.msk.msra.mxu1 %vm13053_vm1, %v15708_v0 }
 0x2e4   :  { %11526 = vmatprep.subr.bf16.mxu1 %v15710_v33 }
 0x2e5   :  { %11521 = vmatpush3.bf16.msra.mxu0 %v731_v62  ;;  %v12108_v62 = vld [vmem:[%s15693_s4 + $0x18] sm:$0xff]  }
 0x2e6   :  { %11538 = vmatprep.subr.bf16.mxu0 %v15710_v33 }
 0x3a9   :  { %v516_v47 = vpop.f32.mrb[4].mxu1 }
 0x3aa   :  { %v11475_v48 = vpop.f32.mrb[5].mxu1  ;;  %v633_v52 = vsel %vm296_vm11, %v516_v47, -inf }
 0x3ab   :  { %v629_v55 = vpop.f32.mrb[2].mxu0  ;;  %634 = vmax.xlane.f32.xlu0 %v633_v52 }
 0x3ac   :  { %v11494_v58 = vpop.f32.mrb[3].mxu0  ;;  %v636_v61 = vsel %vm296_vm11, %v629_v55, -inf }
 0x3ad   :  { %637 = vmax.xlane.f32.xlu1 %v636_v61 }
 0x438   :  { %v635_v21 = vpop.xlane.xlu0 %634 }
 0x439   :  { %v639_v26 = vsub.f32 %v516_v47, %v635_v21 }
 0x43a   :  { %v638_v28 = vpop.xlane.xlu1 %637 }
 0x43b   :  { %v641_v31 = vmul.f32 1.442695, %v639_v26  ;;  %v640_v32 = vsub.f32 %v629_v55, %v638_v28 }
 0x43d   :  { %12525 = vpow2.f32 %v641_v31  ;;  %v643_v1 = vmul.f32 1.442695, %v640_v32 }
 0x43f   :  { %12527 = vpow2.f32 %v643_v1 }
 0x447   :  { %v12526_v9 = vpop.eup %12525 }
 0x448   :  { %11511 = vmatprep.mubr.msk.f32.mxu1 %vm296_vm11, %v12526_v9  ;;  %v726_v10 = vpack.c.bf16 %v12526_v9, %v12526_v9 }
 0x449   :  { %v12528_v11 = vpop.eup %12527 }
 0x44a   :  { %11512 = vmatmul.mubr.msk.f32.vlgmr.msra.gmra.mrb[6].mxu1 %vm296_vm11, %v12528_v11  ;;  %11523 = vmatmul.mubr.msk.bf16.vlgmr.msra.gmra.mrb[4].mxu0 %vm296_vm11, %v726_v10  ;;  %v727_v57 = vpack.c.bf16 %v12528_v11, %v12528_v11  ;;  %v9350_v10 = vld [vmem:[%s15694_s5] ss:$0 sm:$0xff] }
 0x44b   :  { %11527 = vmatpush3.bf16.msra.mxu1 %v732_v13  ;;  %11534 = vmatprep.mubr.msk.bf16.mxu1 %vm12601_vm12, %v15710_v33 }
 0x44c   :  { %11528 = vmatprep.subr.bf16.mxu1 %v15710_v33  ;;  %11546 = vmatprep.mubr.msk.bf16.mxu0 %vm12601_vm12, %v15710_v33 }
 0x44d   :  { %11539 = vmatpush3.bf16.msra.mxu0 %v12105_v44 }
 0x44e   :  { %11540 = vmatprep.subr.bf16.mxu0 %v15710_v33 }
 0x44f   :  { %11529 = vmatpush3.bf16.msra.mxu1 %v733_v22 }
 0x450   :  { %11530 = vmatprep.subr.bf16.mxu1 %v15710_v33 }
 0x451   :  { %11541 = vmatpush3.bf16.msra.mxu0 %v12106_v45 }
 0x452   :  { %11542 = vmatprep.subr.bf16.mxu0 %v15710_v33 }
 0x453   :  { %11531 = vmatpush3.bf16.msra.mxu1 %v734_v59 }
 0x454   :  { %11532 = vmatprep.subr.bf16.mxu1 %v15710_v33 }
 0x455   :  { %11543 = vmatpush3.bf16.msra.mxu0 %v12107_v5 }
 0x456   :  { %11544 = vmatprep.subr.bf16.mxu0 %v15710_v33 }
 0x457   :  { %11533 = vmatpush3.bf16.msra.mxu1 %v735_v39 }
 0x459   :  { %11545 = vmatpush3.bf16.msra.mxu0 %v12108_v62 }
 0x45a   :  { %11535 = vmatmul.mubr.msk.bf16.vlgmr.msra.gmra.mrb[8].mxu1 %vm296_vm11, %v727_v57 }
 0x45b   :  { %1456 = vmatprep.mubr.bf16.mxu1 %v15712_v2 }
 0x51d   :  { %v11513_v47 = vpop.f32.mrb[6].mxu1  ;;  %v773_v48 = vpop.f32.mrb[4].mxu0 }
 0x51e   :  { %v717_v52 = vpop.f32.mrb[7].mxu1  ;;  %v11524_v55 = vpop.f32.mrb[5].mxu0 }
 0x51f   :  { %12529 = vrcp.f32 %v717_v52  ;;  %v776_v58 = vpop.f32.mrb[6].mxu0  ;;  %v952_v52 = vld [vmem:[%s15697_s8] sm:$0xff] }
 0x520   :  { %v11525_v61 = vpop.f32.mrb[7].mxu0  ;;  %12531 = vrcp.f32 %v11513_v47  ;;  %v960_v55 = vld [vmem:[%s15697_s8 + $0x40] sm:$0xff]  ;;  %v953_v58 = vld [vmem:[%s15697_s8 + $0x8] sm:$0xff] }
 0x521   :  { %v9360_v61 = vcombine.high %v952_v52, %v960_v55 }
 0x523   :  { %1424 = vmatprep.subr.bf16.mxu1 %v9360_v61 }
 0x529   :  { %v12530_v21 = vpop.eup %12529 }
 0x52a   :  { %v824_v26 = vmul.f32 %v12530_v21, %v773_v48  ;;  %v12532_v28 = vpop.eup %12531  ;;  %v961_v21 = vld [vmem:[%s15697_s8 + $0x48] sm:$0xff] }
 0x52d   :  { %v816_v31 = vpop.f32.mrb[8].mxu1 }
 0x52e   :  { %v825_v32 = vmul.f32 %v12532_v28, %v816_v31  ;;  %v11536_v1 = vpop.f32.mrb[9].mxu1  ;;  %v9361_v28 = vcombine.low %v953_v58, %v961_v21  ;;  %v9362_v31 = vcombine.high %v953_v58, %v961_v21  ;;  %v955_v21 = vld [vmem:[%s15697_s8 + $0x18] sm:$0xff] }
 0x52f   :  { %v819_v6 = vpop.f32.mrb[10].mxu1  ;;  %v976_v1 = vld [vmem:[%s15697_s8 + $0xc0] sm:$0xff] }
 0x530   :  { %v826_v7 = vpack.c.bf16 %v825_v32, %v824_v26  ;;  %v11537_v9 = vpop.f32.mrb[11].mxu1  ;;  %v9359_v26 = vcombine.low %v952_v52, %v960_v55  ;;  %1467 = vmatprep.subr.bf16.mxu0 %v9362_v31  ;;  %v968_v32 = vld [vmem:[%s15697_s8 + $0x80] sm:$0xff]  ;;  %v969_v6 = vld [vmem:[%s15697_s8 + $0x88] sm:$0xff] }
 0x531   :  { %v977_v9 = vld [vmem:[%s15697_s8 + $0xc8] sm:$0xff] }
 0x532   :  { %11547 = vmatmul.mubr.msk.bf16.vlgmr.msra.gmra.mrb[8].mxu0 %vm296_vm11, %v826_v7  ;;  %1425 = vmatpush1.bf16.msra.mxu1 %v9359_v26  ;;  %v9376_v7 = vcombine.high %v968_v32, %v976_v1  ;;  %v963_v26 = vld [vmem:[%s15697_s8 + $0x58] sm:$0xff] }
 0x533   :  { %1499 = vmatprep.mubr.bf16.mxu0 %v15712_v2  ;;  %1468 = vmatpush1.bf16.msra.mxu0 %v9361_v28  ;;  %v9365_v28 = vcombine.low %v955_v21, %v963_v26  ;;  %v9366_v31 = vcombine.high %v955_v21, %v963_v26 }
 0x534   :  { %1426 = vmatprep.subr.bf16.mxu1 %v9376_v7 }
 0x605   :  { %v901_v11 = vpop.f32.mrb[8].mxu0 }
 0x606   :  { %v902_v13 = vadd.f32 %v9350_v10, %v901_v11  ;;  %v11548_v14 = vpop.f32.mrb[9].mxu0  ;;  %v9377_v11 = vcombine.low %v969_v6, %v977_v9 }
 0x607   :  { %v904_v16 = vpop.f32.mrb[10].mxu0  ;;  %v984_v14 = vld [vmem:[%s15697_s8 + $0x100] sm:$0xff] }
 0x608   :  { %v905_v22 = vadd.f32 %v9350_v10, %v904_v16  ;;  %v11549_v27 = vpop.f32.mrb[11].mxu0  ;;  %v908_v34 = vadd.f32 %v902_v13, %v12870_v42  ;;  %v9375_v10 = vcombine.low %v968_v32, %v976_v1  ;;  %v9378_v13 = vcombine.high %v969_v6, %v977_v9  ;;  %v992_v16 = vld [vmem:[%s15697_s8 + $0x140] sm:$0xff] }
 0x609   :  { %v9392_v27 = vcombine.high %v984_v14, %v992_v16 }
 0x60a   :  { %v910_v59 = vsel %vm296_vm11, %v908_v34, 0.0  ;;  %v909_v60 = vadd.f32 %v12868_v40, %v905_v22  ;;  %1469 = vmatprep.subr.bf16.mxu0 %v9378_v13  ;;  %1427 = vmatpush1.bf16.msra.mxu1 %v9375_v10  ;;  %v985_v22 = vld [vmem:[%s15697_s8 + $0x108] sm:$0xff] }
 0x60b   :  { %911 = vadd.xlane.f32.xlu0 %v910_v59  ;;  %1470 = vmatpush1.bf16.msra.mxu0 %v9377_v11  ;;  %v9391_v59 = vcombine.low %v984_v14, %v992_v16  ;;  %v9356_v14 = vld [vmem:[%s15695_s6] ss:$0 sm:$0xff] }
 0x60c   :  { %v913_v38 = vsel %vm296_vm11, %v909_v60, 0.0  ;;  %1428 = vmatprep.subr.bf16.mxu1 %v9392_v27 }
 0x60e   :  { %1429 = vmatpush1.bf16.msra.mxu1 %v9391_v59 }
 0x60f   :  { %914 = vadd.xlane.f32.xlu0 %v913_v38 }
 0x698   :  { %v912_v39 = vpop.xlane.xlu0 %911 }
 0x699   :  { %v917_v57 = vmul.f32 0.015625, %v912_v39  ;;  %v1000_v39 = vld [vmem:[%s15697_s8 + $0x180] sm:$0xff] }
 0x69b   :  { %v13119_v44 = vsub.f32 %v908_v34, %v917_v57  ;;  %v993_v34 = vld [vmem:[%s15697_s8 + $0x148] sm:$0xff]  ;;  %v1008_v57 = vld [vmem:[%s15697_s8 + $0x1c0] sm:$0xff] }
 0x69c   :  { %v915_v45 = vpop.xlane.xlu0 %914  ;;  %v9394_v38 = vcombine.high %v985_v22, %v993_v34 }
 0x69d   :  { %v918_v5 = vmul.f32 0.015625, %v915_v45  ;;  %v921_v62 = vmul.f32 %v13119_v44, %v13119_v44  ;;  %v1001_v45 = vld [vmem:[%s15697_s8 + $0x188] sm:$0xff] }
 0x69e   :  { %1471 = vmatprep.subr.bf16.mxu0 %v9394_v38  ;;  %v971_v38 = vld [vmem:[%s15697_s8 + $0x98] sm:$0xff] }
 0x69f   :  { %v13123_v47 = vsub.f32 %v909_v60, %v918_v5  ;;  %v923_v42 = vsel %vm296_vm11, %v921_v62, 0.0  ;;  %v9393_v60 = vcombine.low %v985_v22, %v993_v34  ;;  %v9407_v5 = vcombine.low %v1000_v39, %v1008_v57  ;;  %v9357_v34 = vld [vmem:[%s15696_s7] ss:$0 sm:$0xff] }
 0x6a0   :  { %924 = vadd.xlane.f32.xlu1 %v923_v42  ;;  %v9408_v62 = vcombine.high %v1000_v39, %v1008_v57  ;;  %v1009_v42 = vld [vmem:[%s15697_s8 + $0x1c8] sm:$0xff] }
 0x6a1   :  { %v922_v40 = vmul.f32 %v13123_v47, %v13123_v47  ;;  %1472 = vmatpush1.bf16.msra.mxu0 %v9393_v60  ;;  %v9409_v52 = vcombine.low %v1001_v45, %v1009_v42  ;;  %v9410_v55 = vcombine.high %v1001_v45, %v1009_v42  ;;  %v970_v60 = vld [vmem:[%s15697_s8 + $0x90] sm:$0xff] }
 0x6a2   :  { %1430 = vmatprep.subr.bf16.mxu1 %v9408_v62  ;;  %v986_v42 = vld [vmem:[%s15697_s8 + $0x110] sm:$0xff] }
 0x6a3   :  { %v926_v48 = vsel %vm296_vm11, %v922_v40, 0.0  ;;  %v954_v40 = vld [vmem:[%s15697_s8 + $0x10] sm:$0xff]  ;;  %1473 = vmatprep.subr.bf16.mxu0 %v9410_v55  ;;  %1431 = vmatpush1.bf16.msra.mxu1 %v9407_v5 }
 0x6a4   :  { %927 = vadd.xlane.f32.xlu0 %v926_v48  ;;  %v962_v48 = vld [vmem:[%s15697_s8 + $0x50] sm:$0xff] }
 0x6a5   :  { %v9363_v58 = vcombine.low %v954_v40, %v962_v48  ;;  %v9364_v61 = vcombine.high %v954_v40, %v962_v48  ;;  %1474 = vmatpush1.bf16.msra.mxu0 %v9409_v52  ;;  %v994_v40 = vld [vmem:[%s15697_s8 + $0x150] sm:$0xff]  ;;  %v987_v48 = vld [vmem:[%s15697_s8 + $0x118] sm:$0xff] }
 0x6a6   :  { %1553 = vmatprep.subr.bf16.mxu0 %v9366_v31  ;;  %v995_v52 = vld [vmem:[%s15697_s8 + $0x158] sm:$0xff]  ;;  %v9396_v21 = vcombine.high %v986_v42, %v994_v40  ;;  %v1002_v31 = vld [vmem:[%s15697_s8 + $0x190] sm:$0xff] }
 0x6a7   :  { %1510 = vmatprep.subr.bf16.mxu1 %v9364_v61  ;;  %v9398_v26 = vcombine.high %v987_v48, %v995_v52 }
 0x72d   :  { %v925_v32 = vpop.xlane.xlu1 %924 }
 0x72e   :  { %v929_v1 = vmul.f32 0.015625, %v925_v32  ;;  %v1010_v32 = vld [vmem:[%s15697_s8 + $0x1d0] sm:$0xff] }
 0x730   :  { %v931_v6 = vadd.f32 1e-05, %v929_v1  ;;  %v1003_v1 = vld [vmem:[%s15697_s8 + $0x198] sm:$0xff] }
 0x731   :  { %v928_v7 = vpop.xlane.xlu0 %927 }
 0x732   :  { %12533 = vrsqrt.f32 %v931_v6  ;;  %v930_v9 = vmul.f32 0.015625, %v928_v7  ;;  %v9397_v6 = vcombine.low %v987_v48, %v995_v52  ;;  %v9412_v7 = vcombine.high %v1002_v31, %v1010_v32  ;;  %v996_v48 = vld [vmem:[%s15697_s8 + $0x160] sm:$0xff]  ;;  %v989_v52 = vld [vmem:[%s15697_s8 + $0x128] sm:$0xff] }
 0x734   :  { %v932_v10 = vadd.f32 1e-05, %v930_v9 }
 0x736   :  { %12535 = vrsqrt.f32 %v932_v10  ;;  %v956_v10 = vld [vmem:[%s15697_s8 + $0x20] sm:$0xff] }
 0x73c   :  { %v12534_v11 = vpop.eup %12533 }
 0x73d   :  { %v935_v13 = vmul.f32 %v12534_v11, %v13119_v44  ;;  %v978_v44 = vld [vmem:[%s15697_s8 + $0xd0] sm:$0xff]  ;;  %v964_v11 = vld [vmem:[%s15697_s8 + $0x60] sm:$0xff] }
 0x73e   :  { %v9380_v5 = vcombine.high %v970_v60, %v978_v44  ;;  %v9379_v55 = vcombine.low %v970_v60, %v978_v44  ;;  %v980_v60 = vld [vmem:[%s15697_s8 + $0xe0] sm:$0xff]  ;;  %v973_v44 = vld [vmem:[%s15697_s8 + $0xa8] sm:$0xff] }
 0x73f   :  { %v942_v22 = vmul.f32 %v9356_v14, %v935_v13  ;;  %v957_v13 = vld [vmem:[%s15697_s8 + $0x28] sm:$0xff] }
 0x740   :  { %v12536_v16 = vpop.eup %12535 }
 0x741   :  { %v936_v27 = vmul.f32 %v12536_v16, %v13123_v47  ;;  %v979_v47 = vld [vmem:[%s15697_s8 + $0xd8] sm:$0xff]  ;;  %v13209_v39 = vadd.f32 %v9357_v34, %v942_v22  ;;  %v9411_v16 = vcombine.low %v1002_v31, %v1010_v32  ;;  %v1004_v32 = vld [vmem:[%s15697_s8 + $0x1a0] sm:$0xff] }
 0x742   :  { %v9382_v62 = vcombine.high %v971_v38, %v979_v47  ;;  %v9381_v61 = vcombine.low %v971_v38, %v979_v47  ;;  %v981_v38 = vld [vmem:[%s15697_s8 + $0xe8] sm:$0xff]  ;;  %v9367_v47 = vcombine.low %v956_v10, %v964_v11 }
 0x743   :  { %v943_v59 = vmul.f32 %v9356_v14, %v936_v27  ;;  %v965_v14 = vld [vmem:[%s15697_s8 + $0x68] sm:$0xff]  ;;  %v9368_v27 = vcombine.high %v956_v10, %v964_v11  ;;  %v958_v11 = vld [vmem:[%s15697_s8 + $0x30] sm:$0xff] }
 0x745   :  { %v13211_v57 = vadd.f32 %v9357_v34, %v943_v59  ;;  %v9370_v34 = vcombine.high %v957_v13, %v965_v14  ;;  %v972_v59 = vld [vmem:[%s15697_s8 + $0xa0] sm:$0xff] }
 0x747   :  { %v13215_v45 = vpack.c.bf16 %v13211_v57, %v13209_v39 }
 0x749   :  { %9423 = vmatmul.mubr.msk.bf16.vlgmr.msra.gmra.mrb[12].mxu1 %vm296_vm11, %v13215_v45  ;;  %9424 = vmatmul.mubr.msk.bf16.vlgmr.msra.gmra.mrb[12].mxu0 %vm296_vm11, %v13215_v45 }
 0x74a   :  { %1511 = vmatpush1.bf16.msra.mxu1 %v9363_v58  ;;  %1554 = vmatpush1.bf16.msra.mxu0 %v9365_v28  ;;  %v1011_v58 = vld [vmem:[%s15697_s8 + $0x1d8] sm:$0xff]  ;;  %v9395_v28 = vcombine.low %v986_v42, %v994_v40  ;;  %v9386_v42 = vcombine.high %v973_v44, %v981_v38  ;;  %v988_v40 = vld [vmem:[%s15697_s8 + $0x120] sm:$0xff] }
 0x74b   :  { %1512 = vmatprep.subr.bf16.mxu1 %v9380_v5  ;;  %1555 = vmatprep.subr.bf16.mxu0 %v9382_v62  ;;  %v9414_v9 = vcombine.high %v1003_v1, %v1011_v58  ;;  %v9413_v22 = vcombine.low %v1003_v1, %v1011_v58  ;;  %v9369_v5 = vcombine.low %v957_v13, %v965_v14  ;;  %v1012_v1 = vld [vmem:[%s15697_s8 + $0x1e0] sm:$0xff]  ;;  %v1005_v58 = vld [vmem:[%s15697_s8 + $0x1a8] sm:$0xff]  ;;  %v966_v13 = vld [vmem:[%s15697_s8 + $0x70] sm:$0xff] }
 0x74c   :  { %1542 = vmatprep.mubr.bf16.mxu1 %v15712_v2  ;;  %1585 = vmatprep.mubr.bf16.mxu0 %v15712_v2  ;;  %v9384_v62 = vcombine.high %v972_v59, %v980_v60  ;;  %v959_v14 = vld [vmem:[%s15697_s8 + $0x38] sm:$0xff] }
 0x74e   :  { %1513 = vmatpush1.bf16.msra.mxu1 %v9379_v55  ;;  %1556 = vmatpush1.bf16.msra.mxu0 %v9381_v61  ;;  %v997_v55 = vld [vmem:[%s15697_s8 + $0x168] sm:$0xff]  ;;  %v9383_v61 = vcombine.low %v972_v59, %v980_v60  ;;  %v974_v60 = vld [vmem:[%s15697_s8 + $0xb0] sm:$0xff] }
 0x74f   :  { %1514 = vmatprep.subr.bf16.mxu1 %v9396_v21  ;;  %1557 = vmatprep.subr.bf16.mxu0 %v9398_v26  ;;  %v9385_v21 = vcombine.low %v973_v44, %v981_v38  ;;  %v9400_v26 = vcombine.high %v988_v40, %v996_v48  ;;  %v9402_v31 = vcombine.high %v989_v52, %v997_v55  ;;  %v982_v44 = vld [vmem:[%s15697_s8 + $0xf0] sm:$0xff]  ;;  %v975_v38 = vld [vmem:[%s15697_s8 + $0xb8] sm:$0xff] }
 0x752   :  { %1515 = vmatpush1.bf16.msra.mxu1 %v9395_v28  ;;  %1558 = vmatpush1.bf16.msra.mxu0 %v9397_v6  ;;  %v1013_v28 = vld [vmem:[%s15697_s8 + $0x1e8] sm:$0xff]  ;;  %v9399_v6 = vcombine.low %v988_v40, %v996_v48  ;;  %v990_v48 = vld [vmem:[%s15697_s8 + $0x130] sm:$0xff] }
 0x753   :  { %1516 = vmatprep.subr.bf16.mxu1 %v9412_v7  ;;  %1559 = vmatprep.subr.bf16.mxu0 %v9414_v9  ;;  %v9401_v7 = vcombine.low %v989_v52, %v997_v55  ;;  %v9416_v9 = vcombine.high %v1004_v32, %v1012_v1  ;;  %v9418_v10 = vcombine.high %v1005_v58, %v1013_v28  ;;  %v998_v52 = vld [vmem:[%s15697_s8 + $0x170] sm:$0xff]  ;;  %v991_v55 = vld [vmem:[%s15697_s8 + $0x138] sm:$0xff] }
 0x756   :  { %1517 = vmatpush1.bf16.msra.mxu1 %v9411_v16  ;;  %1560 = vmatpush1.bf16.msra.mxu0 %v9413_v22  ;;  %v967_v16 = vld [vmem:[%s15697_s8 + $0x78] sm:$0xff]  ;;  %v9415_v22 = vcombine.low %v1004_v32, %v1012_v1  ;;  %v1006_v1 = vld [vmem:[%s15697_s8 + $0x1b0] sm:$0xff] }
 0x757   :  { %1596 = vmatprep.subr.bf16.mxu1 %v9368_v27  ;;  %1639 = vmatprep.subr.bf16.mxu0 %v9370_v34  ;;  %v9417_v27 = vcombine.low %v1005_v58, %v1013_v28  ;;  %v9372_v34 = vcombine.high %v958_v11, %v966_v13  ;;  %v9374_v59 = vcombine.high %v959_v14, %v967_v16  ;;  %v1014_v58 = vld [vmem:[%s15697_s8 + $0x1f0] sm:$0xff]  ;;  %v1007_v28 = vld [vmem:[%s15697_s8 + $0x1b8] sm:$0xff] }
 0x759   :  { %9425 = vmatmul.mubr.msk.bf16.vlgmr.msra.gmra.mrb[16].mxu1 %vm296_vm11, %v13215_v45  ;;  %9426 = vmatmul.mubr.msk.bf16.vlgmr.msra.gmra.mrb[16].mxu0 %vm296_vm11, %v13215_v45 }
 0x75a   :  { %1597 = vmatpush1.bf16.msra.mxu1 %v9367_v47  ;;  %1640 = vmatpush1.bf16.msra.mxu0 %v9369_v5  ;;  %v983_v47 = vld [vmem:[%s15697_s8 + $0xf8] sm:$0xff]  ;;  %v9371_v5 = vcombine.low %v958_v11, %v966_v13  ;;  %v9419_v13 = vcombine.low %v1006_v1, %v1014_v58 }
 0x75b   :  { %1598 = vmatprep.subr.bf16.mxu1 %v9384_v62  ;;  %1641 = vmatprep.subr.bf16.mxu0 %v9386_v42  ;;  %v9373_v62 = vcombine.low %v959_v14, %v967_v16  ;;  %v9388_v42 = vcombine.high %v974_v60, %v982_v44  ;;  %v9390_v40 = vcombine.high %v975_v38, %v983_v47  ;;  %v12109_v16 = vld [vmem:[%s15699_s10 + $0x40] sm:$0xff]  }
 0x75c   :  { %1628 = vmatprep.mubr.bf16.mxu1 %v15712_v2  ;;  %1671 = vmatprep.mubr.bf16.mxu0 %v15712_v2 }
 0x75e   :  { %1599 = vmatpush1.bf16.msra.mxu1 %v9383_v61  ;;  %1642 = vmatpush1.bf16.msra.mxu0 %v9385_v21  ;;  %v999_v61 = vld [vmem:[%s15697_s8 + $0x178] sm:$0xff]  ;;  %v9387_v21 = vcombine.low %v974_v60, %v982_v44  ;;  %v12114_v60 = vld [vmem:[%s15699_s10 + $0xc8] sm:$0xff]  }
 0x75f   :  { %1600 = vmatprep.subr.bf16.mxu1 %v9400_v26  ;;  %1643 = vmatprep.subr.bf16.mxu0 %v9402_v31  ;;  %v9389_v26 = vcombine.low %v975_v38, %v983_v47  ;;  %v9404_v31 = vcombine.high %v990_v48, %v998_v52  ;;  %v9406_v32 = vcombine.high %v991_v55, %v999_v61  ;;  %v12115_v44 = vld [vmem:[%s15699_s10 + $0x8] sm:$0xff]   ;;  %v12117_v47 = vld [vmem:[%s15699_s10 + $0x50] sm:$0xff]  }
 0x760   :  { %v12116_v38 = vld [vmem:[%s15699_s10 + $0x88] sm:$0xff]  }
 0x762   :  { %1601 = vmatpush1.bf16.msra.mxu1 %v9399_v6  ;;  %1644 = vmatpush1.bf16.msra.mxu0 %v9401_v7  ;;  %v1015_v6 = vld [vmem:[%s15697_s8 + $0x1f8] sm:$0xff]  ;;  %v9403_v7 = vcombine.low %v990_v48, %v998_v52 }
 0x763   :  { %1602 = vmatprep.subr.bf16.mxu1 %v9416_v9  ;;  %1645 = vmatprep.subr.bf16.mxu0 %v9418_v10  ;;  %v9405_v9 = vcombine.low %v991_v55, %v999_v61  ;;  %v9420_v10 = vcombine.high %v1006_v1, %v1014_v58  ;;  %v9422_v11 = vcombine.high %v1007_v28, %v1015_v6  ;;  %v12123_v48 = vld [vmem:[%s15699_s10 + $0x18] sm:$0xff]   ;;  %v12125_v55 = vld [vmem:[%s15699_s10 + $0x60] sm:$0xff]   ;;  %v12131_v1 = vld [vmem:[%s15699_s10 + $0x28] sm:$0xff]  }
 0x764   :  { %v9421_v14 = vcombine.low %v1007_v28, %v1015_v6  ;;  %v12124_v52 = vld [vmem:[%s15699_s10 + $0x98] sm:$0xff]   ;;  %v12126_v61 = vld [vmem:[%s15699_s10 + $0xe0] sm:$0xff]   ;;  %v12132_v58 = vld [vmem:[%s15699_s10 + $0xa8] sm:$0xff]  }
 0x765   :  { %v12133_v28 = vld [vmem:[%s15699_s10 + $0x70] sm:$0xff]  }
 0x766   :  { %1603 = vmatpush1.bf16.msra.mxu1 %v9415_v22  ;;  %1646 = vmatpush1.bf16.msra.mxu0 %v9417_v27  ;;  %v12110_v22 = vld [vmem:[%s15699_s10 + $0xc0] sm:$0xff]   ;;  %v12134_v6 = vld [vmem:[%s15699_s10 + $0xf0] sm:$0xff]  }
 0x767   :  { %1682 = vmatprep.subr.bf16.mxu1 %v9372_v34  ;;  %1725 = vmatprep.subr.bf16.mxu0 %v9374_v59  ;;  %v12111_v27 = vld [vmem:[%s15699_s10] sm:$0xff]   ;;  %v12113_v59 = vld [vmem:[%s15699_s10 + $0x48] sm:$0xff]  }
 0x768   :  { %v12112_v34 = vld [vmem:[%s15699_s10 + $0x80] sm:$0xff]  }
 0x769   :  { %9427 = vmatmul.mubr.msk.bf16.vlgmr.msra.gmra.mrb[20].mxu1 %vm296_vm11, %v13215_v45  ;;  %9428 = vmatmul.mubr.msk.bf16.vlgmr.msra.gmra.mrb[20].mxu0 %vm296_vm11, %v13215_v45 }
 0x76a   :  { %1683 = vmatpush1.bf16.msra.mxu1 %v9371_v5  ;;  %1726 = vmatpush1.bf16.msra.mxu0 %v9373_v62  ;;  %v12119_v5 = vld [vmem:[%s15699_s10 + $0x10] sm:$0xff]  }
 0x76b   :  { %1684 = vmatprep.subr.bf16.mxu1 %v9388_v42  ;;  %1727 = vmatprep.subr.bf16.mxu0 %v9390_v40  ;;  %v12120_v62 = vld [vmem:[%s15699_s10 + $0x90] sm:$0xff]   ;;  %v12121_v42 = vld [vmem:[%s15699_s10 + $0x58] sm:$0xff]  }
 0x76c   :  { %1714 = vmatprep.mubr.bf16.mxu1 %v15712_v2  ;;  %1757 = vmatprep.mubr.bf16.mxu0 %v15712_v2  ;;  %v12122_v40 = vld [vmem:[%s15699_s10 + $0xd8] sm:$0xff]  }
 0x76e   :  { %1685 = vmatpush1.bf16.msra.mxu1 %v9387_v21  ;;  %1728 = vmatpush1.bf16.msra.mxu0 %v9389_v26  ;;  %v12127_v21 = vld [vmem:[%s15699_s10 + $0x20] sm:$0xff]  }
 0x76f   :  { %1686 = vmatprep.subr.bf16.mxu1 %v9404_v31  ;;  %1729 = vmatprep.subr.bf16.mxu0 %v9406_v32  ;;  %v12128_v26 = vld [vmem:[%s15699_s10 + $0xa0] sm:$0xff]   ;;  %v12129_v31 = vld [vmem:[%s15699_s10 + $0x68] sm:$0xff]  }
 0x770   :  { %v12130_v32 = vld [vmem:[%s15699_s10 + $0xe8] sm:$0xff]  }
 0x772   :  { %1687 = vmatpush1.bf16.msra.mxu1 %v9403_v7  ;;  %1730 = vmatpush1.bf16.msra.mxu0 %v9405_v9  ;;  %v12135_v7 = vld [vmem:[%s15699_s10 + $0x30] sm:$0xff]  }
 0x773   :  { %1688 = vmatprep.subr.bf16.mxu1 %v9420_v10  ;;  %1731 = vmatprep.subr.bf16.mxu0 %v9422_v11  ;;  %v12136_v9 = vld [vmem:[%s15699_s10 + $0xb0] sm:$0xff]   ;;  %v12137_v10 = vld [vmem:[%s15699_s10 + $0x78] sm:$0xff]  }
 0x774   :  { %v12138_v11 = vld [vmem:[%s15699_s10 + $0xf8] sm:$0xff]  }
 0x776   :  { %1689 = vmatpush1.bf16.msra.mxu1 %v9419_v13  ;;  %1732 = vmatpush1.bf16.msra.mxu0 %v9421_v14  ;;  %v12139_v13 = vld [vmem:[%s15699_s10 + $0x38] sm:$0xff]  }
 0x777   :  { %10802 = vmatprep.subr.bf16.mxu1 %v12109_v16  ;;  %10824 = vmatprep.subr.bf16.mxu0 %v12110_v22  ;;  %v12140_v14 = vld [vmem:[%s15699_s10 + $0xb8] sm:$0xff]   ;;  %v12141_v16 = vld [vmem:[%s15699_s10 + $0x140] sm:$0xff]  }
 0x778   :  { %v12142_v22 = vld [vmem:[%s15699_s10 + $0x1c0] sm:$0xff]  }
 0x779   :  { %9429 = vmatmul.mubr.msk.bf16.vlgmr.msra.gmra.mrb[24].mxu1 %vm296_vm11, %v13215_v45  ;;  %9430 = vmatmul.mubr.msk.bf16.vlgmr.msra.gmra.mrb[24].mxu0 %vm296_vm11, %v13215_v45  ;;  %v12118_v45 = vld [vmem:[%s15699_s10 + $0xd0] sm:$0xff]  }
 0x77a   :  { %10803 = vmatpush3.bf16.msra.mxu1 %v12111_v27  ;;  %10825 = vmatpush3.bf16.msra.mxu0 %v12112_v34  ;;  %v13462_v27 = vsub.s32 2, %v12756_v37  ;;  %v1016_v34 = vld [vmem:[%s15698_s9] ss:$4 sm:$0xff] }
 0x77b   :  { %10804 = vmatprep.subr.bf16.mxu1 %v12113_v59  ;;  %10826 = vmatprep.subr.bf16.mxu0 %v12114_v60  ;;  %v13468_v59 = vsub.s32 3, %v12756_v37  ;;  %v1024_v60 = vrot.slane %v1016_v34, %v12876_v46 }
 0x77e   :  { %10805 = vmatpush3.bf16.msra.mxu1 %v12115_v44  ;;  %10827 = vmatpush3.bf16.msra.mxu0 %v12116_v38  ;;  %v1032_v44 = vrot.slane %v1016_v34, %v13462_v27  ;;  %v1028_v38 = vrot.slane %v1016_v34, %v12883_v49 }
 0x77f   :  { %10806 = vmatprep.subr.bf16.mxu1 %v12117_v47  ;;  %10828 = vmatprep.subr.bf16.mxu0 %v12118_v45  ;;  %v1036_v47 = vrot.slane %v1016_v34, %v13468_v59 }
 0x782   :  { %10807 = vmatpush3.bf16.msra.mxu1 %v12119_v5  ;;  %10829 = vmatpush3.bf16.msra.mxu0 %v12120_v62 }
 0x783   :  { %10808 = vmatprep.subr.bf16.mxu1 %v12121_v42  ;;  %10830 = vmatprep.subr.bf16.mxu0 %v12122_v40 }
 0x786   :  { %10809 = vmatpush3.bf16.msra.mxu1 %v12123_v48  ;;  %10831 = vmatpush3.bf16.msra.mxu0 %v12124_v52 }
 0x787   :  { %10810 = vmatprep.subr.bf16.mxu1 %v12125_v55  ;;  %10832 = vmatprep.subr.bf16.mxu0 %v12126_v61 }
 0x78a   :  { %10811 = vmatpush3.bf16.msra.mxu1 %v12127_v21  ;;  %10833 = vmatpush3.bf16.msra.mxu0 %v12128_v26 }
 0x78b   :  { %10812 = vmatprep.subr.bf16.mxu1 %v12129_v31  ;;  %10834 = vmatprep.subr.bf16.mxu0 %v12130_v32 }
 0x78e   :  { %10813 = vmatpush3.bf16.msra.mxu1 %v12131_v1  ;;  %10835 = vmatpush3.bf16.msra.mxu0 %v12132_v58 }
 0x78f   :  { %10814 = vmatprep.subr.bf16.mxu1 %v12133_v28  ;;  %10836 = vmatprep.subr.bf16.mxu0 %v12134_v6 }
 0x792   :  { %10815 = vmatpush3.bf16.msra.mxu1 %v12135_v7  ;;  %10837 = vmatpush3.bf16.msra.mxu0 %v12136_v9 }
 0x793   :  { %10816 = vmatprep.subr.bf16.mxu1 %v12137_v10  ;;  %10838 = vmatprep.subr.bf16.mxu0 %v12138_v11 }
 0x796   :  { %10817 = vmatpush3.bf16.msra.mxu1 %v12139_v13  ;;  %10839 = vmatpush3.bf16.msra.mxu0 %v12140_v14 }
 0x797   :  { %10846 = vmatprep.subr.bf16.mxu1 %v12141_v16  ;;  %10868 = vmatprep.subr.bf16.mxu0 %v12142_v22 }
 0x81c   :  { %v1458_v45 = vpop.f32.mrb[12].mxu1  ;;  %v1501_v5 = vpop.f32.mrb[12].mxu0 }
 0x81d   :  { %v1459_v62 = vadd.f32 %v1458_v45, %v1024_v60  ;;  %v1502_v42 = vadd.f32 %v1501_v5, %v1032_v44  ;;  %v1460_v40 = vpop.f32.mrb[13].mxu1  ;;  %v1503_v48 = vpop.f32.mrb[13].mxu0 }
 0x81e   :  { %v1461_v52 = vadd.f32 %v1460_v40, %v1028_v38  ;;  %v1504_v55 = vadd.f32 %v1503_v48, %v1036_v47  ;;  %v1462_v61 = vpop.f32.mrb[14].mxu1  ;;  %v1505_v21 = vpop.f32.mrb[14].mxu0  ;;  %v13493_v48 = vsub.s32 5, %v12756_v37 }
 0x81f   :  { %v1463_v26 = vadd.f32 %v1462_v61, %v1024_v60  ;;  %v1506_v31 = vadd.f32 %v1505_v21, %v1032_v44  ;;  %v1464_v32 = vpop.f32.mrb[15].mxu1  ;;  %v1507_v1 = vpop.f32.mrb[15].mxu0  ;;  %v1768_v6 = vmax.f32 %v1459_v62, 0.0  ;;  %v1770_v7 = vmax.f32 %v1502_v42, 0.0  ;;  %v12143_v60 = vld [vmem:[%s15699_s10 + $0x100] sm:$0xff]   ;;  %v12148_v61 = vld [vmem:[%s15699_s10 + $0x188] sm:$0xff]  }
 0x820   :  { %v1465_v58 = vadd.f32 %v1464_v32, %v1028_v38  ;;  %v1508_v28 = vadd.f32 %v1507_v1, %v1036_v47  ;;  %v1769_v11 = vmax.f32 %v1461_v52, 0.0  ;;  %v1771_v13 = vmax.f32 %v1504_v55, 0.0  ;;  %v12144_v44 = vld [vmem:[%s15699_s10 + $0x180] sm:$0xff]   ;;  %v12145_v38 = vld [vmem:[%s15699_s10 + $0x148] sm:$0xff]   ;;  %v12150_v32 = vld [vmem:[%s15699_s10 + $0x1d0] sm:$0xff]  }
 0x821   :  { %v1784_v9 = vmax.f32 %v1463_v26, 0.0  ;;  %v1786_v10 = vmax.f32 %v1506_v31, 0.0  ;;  %v12146_v47 = vld [vmem:[%s15699_s10 + $0x1c8] sm:$0xff]   ;;  %v13487_v62 = vsub.s32 4, %v12756_v37  ;;  %v13490_v42 = vsub.s32 6, %v12756_v37  ;;  %v12149_v31 = vld [vmem:[%s15699_s10 + $0x150] sm:$0xff]  }
 0x822   :  { %v1785_v14 = vmax.f32 %v1465_v58, 0.0  ;;  %v1787_v16 = vmax.f32 %v1508_v28, 0.0  ;;  %v13496_v52 = vsub.s32 7, %v12756_v37  ;;  %v12147_v55 = vld [vmem:[%s15699_s10 + $0x108] sm:$0xff]   ;;  %v1044_v1 = vrot.slane %v1016_v34, %v13493_v48 }
 0x823   :  { %v1800_v22 = vpack.c.bf16 %v1784_v9, %v1768_v6  ;;  %v1802_v45 = vpack.c.bf16 %v1786_v10, %v1770_v7  ;;  %v1040_v21 = vrot.slane %v1016_v34, %v13487_v62  ;;  %v1048_v26 = vrot.slane %v1016_v34, %v13490_v42  ;;  %v12151_v7 = vld [vmem:[%s15699_s10 + $0x110] sm:$0xff]  }
 0x824   :  { %v1801_v5 = vpack.c.bf16 %v1785_v14, %v1769_v11  ;;  %v1803_v40 = vpack.c.bf16 %v1787_v16, %v1771_v13  ;;  %v1052_v58 = vrot.slane %v1016_v34, %v13496_v52  ;;  %v12152_v9 = vld [vmem:[%s15699_s10 + $0x190] sm:$0xff]   ;;  %v12153_v34 = vld [vmem:[%s15699_s10 + $0x158] sm:$0xff]  }
 0x825   :  { %v12154_v16 = vld [vmem:[%s15699_s10 + $0x1d8] sm:$0xff]  }
 0x826   :  { %2877 = vmatprep.mubr.bf16.mxu1 %v1801_v5  ;;  %2918 = vmatprep.mubr.bf16.mxu0 %v1803_v40 }
 0x827   :  { %2878 = vmatmul.mubr.bf16.vlgmr.msra.gmra.mrb[28].mxu1 %v1800_v22  ;;  %2919 = vmatmul.mubr.bf16.vlgmr.msra.gmra.mrb[28].mxu0 %v1802_v45 }
 0x828   :  { %10847 = vmatpush3.bf16.msra.mxu1 %v12143_v60  ;;  %10869 = vmatpush3.bf16.msra.mxu0 %v12144_v44 }
 0x829   :  { %10848 = vmatprep.subr.bf16.mxu1 %v12145_v38  ;;  %10870 = vmatprep.subr.bf16.mxu0 %v12146_v47 }
 0x82c   :  { %v1544_v28 = vpop.f32.mrb[16].mxu1  ;;  %v1587_v6 = vpop.f32.mrb[16].mxu0  ;;  %10849 = vmatpush3.bf16.msra.mxu1 %v12147_v55  ;;  %10871 = vmatpush3.bf16.msra.mxu0 %v12148_v61 }
 0x82d   :  { %v1545_v10 = vadd.f32 %v1544_v28, %v1040_v21  ;;  %v1588_v11 = vadd.f32 %v1587_v6, %v1048_v26  ;;  %v1546_v13 = vpop.f32.mrb[17].mxu1  ;;  %v1589_v14 = vpop.f32.mrb[17].mxu0  ;;  %10850 = vmatprep.subr.bf16.mxu1 %v12149_v31  ;;  %10872 = vmatprep.subr.bf16.mxu0 %v12150_v32  ;;  %v12155_v31 = vld [vmem:[%s15699_s10 + $0x118] sm:$0xff]  }
 0x82e   :  { %v1547_v22 = vadd.f32 %v1546_v13, %v1044_v1  ;;  %v1590_v45 = vadd.f32 %v1589_v14, %v1052_v58  ;;  %v1548_v5 = vpop.f32.mrb[18].mxu1  ;;  %v1591_v40 = vpop.f32.mrb[18].mxu0  ;;  %v12156_v32 = vld [vmem:[%s15699_s10 + $0x198] sm:$0xff]  }
 0x82f   :  { %v1549_v60 = vadd.f32 %v1548_v5, %v1040_v21  ;;  %v1592_v44 = vadd.f32 %v1591_v40, %v1048_v26  ;;  %v1550_v38 = vpop.f32.mrb[19].mxu1  ;;  %v1593_v47 = vpop.f32.mrb[19].mxu0  ;;  %v1772_v28 = vmax.f32 %v1545_v10, 0.0  ;;  %v1774_v6 = vmax.f32 %v1588_v11, 0.0  ;;  %v12157_v21 = vld [vmem:[%s15699_s10 + $0x160] sm:$0xff]  }
 0x830   :  { %v1551_v55 = vadd.f32 %v1550_v38, %v1044_v1  ;;  %v1594_v61 = vadd.f32 %v1593_v47, %v1052_v58  ;;  %10851 = vmatpush3.bf16.msra.mxu1 %v12151_v7  ;;  %10873 = vmatpush3.bf16.msra.mxu0 %v12152_v9  ;;  %v12158_v26 = vld [vmem:[%s15699_s10 + $0x1e0] sm:$0xff]   ;;  %v1773_v1 = vmax.f32 %v1547_v22, 0.0  ;;  %v1775_v58 = vmax.f32 %v1590_v45, 0.0  ;;  %v12161_v22 = vld [vmem:[%s15699_s10 + $0x168] sm:$0xff]  }
 0x831   :  { %v1788_v13 = vmax.f32 %v1549_v60, 0.0  ;;  %v1790_v14 = vmax.f32 %v1592_v44, 0.0  ;;  %10852 = vmatprep.subr.bf16.mxu1 %v12153_v34  ;;  %10874 = vmatprep.subr.bf16.mxu0 %v12154_v16  ;;  %v12159_v34 = vld [vmem:[%s15699_s10 + $0x120] sm:$0xff]   ;;  %v12162_v45 = vld [vmem:[%s15699_s10 + $0x1e8] sm:$0xff]  }
 0x832   :  { %v1789_v7 = vmax.f32 %v1551_v55, 0.0  ;;  %v1791_v9 = vmax.f32 %v1594_v61, 0.0  ;;  %v12160_v16 = vld [vmem:[%s15699_s10 + $0x1a0] sm:$0xff]   ;;  %v12163_v44 = vld [vmem:[%s15699_s10 + $0x128] sm:$0xff]   ;;  %v12165_v61 = vld [vmem:[%s15699_s10 + $0x170] sm:$0xff]  }
 0x833   :  { %v13538_v5 = vpack.c.bf16 %v1788_v13, %v1772_v28  ;;  %v13540_v10 = vpack.c.bf16 %v1790_v14, %v1774_v6  ;;  %v13557_v60 = vld [vmem:[%s15698_s9 + $0x20] ss:$4 sm:$0xff] }
 0x834   :  { %v1805_v11 = vpack.c.bf16 %v1789_v7, %v1773_v1  ;;  %v1807_v40 = vpack.c.bf16 %v1791_v9, %v1775_v58  ;;  %10853 = vmatpush3.bf16.msra.mxu1 %v12155_v31  ;;  %10875 = vmatpush3.bf16.msra.mxu0 %v12156_v32  ;;  %v12164_v38 = vld [vmem:[%s15699_s10 + $0x1a8] sm:$0xff]   ;;  %v1056_v47 = vrot.slane %v13557_v60, %v12876_v46  ;;  %v12166_v31 = vld [vmem:[%s15699_s10 + $0x1f0] sm:$0xff]   ;;  %v12169_v9 = vld [vmem:[%s15699_s10 + $0x178] sm:$0xff]  }
 0x835   :  { %10854 = vmatprep.subr.bf16.mxu1 %v12157_v21  ;;  %10876 = vmatprep.subr.bf16.mxu0 %v12158_v26  ;;  %v1064_v55 = vrot.slane %v13557_v60, %v13462_v27  ;;  %v1060_v32 = vrot.slane %v13557_v60, %v12883_v49  ;;  %v1068_v28 = vrot.slane %v13557_v60, %v13468_v59  ;;  %v12167_v14 = vld [vmem:[%s15699_s10 + $0x130] sm:$0xff]  }
 0x836   :  { %2959 = vmatprep.mubr.bf16.mxu1 %v1805_v11  ;;  %3000 = vmatprep.mubr.bf16.mxu0 %v1807_v40  ;;  %v12168_v21 = vld [vmem:[%s15699_s10 + $0x1b0] sm:$0xff]   ;;  %v12170_v11 = vld [vmem:[%s15699_s10 + $0x1f8] sm:$0xff]  }
 0x838   :  { %10855 = vmatpush3.bf16.msra.mxu1 %v12159_v34  ;;  %10877 = vmatpush3.bf16.msra.mxu0 %v12160_v16 }
 0x839   :  { %10856 = vmatprep.subr.bf16.mxu1 %v12161_v22  ;;  %10878 = vmatprep.subr.bf16.mxu0 %v12162_v45 }
 0x83c   :  { %v1630_v6 = vpop.f32.mrb[20].mxu1  ;;  %v1673_v13 = vpop.f32.mrb[20].mxu0  ;;  %10857 = vmatpush3.bf16.msra.mxu1 %v12163_v44  ;;  %10879 = vmatpush3.bf16.msra.mxu0 %v12164_v38 }
 0x83d   :  { %v1631_v26 = vadd.f32 %v1630_v6, %v1056_v47  ;;  %v1674_v1 = vadd.f32 %v1673_v13, %v1064_v55  ;;  %v1632_v58 = vpop.f32.mrb[21].mxu1  ;;  %v1675_v7 = vpop.f32.mrb[21].mxu0  ;;  %10858 = vmatprep.subr.bf16.mxu1 %v12165_v61  ;;  %10880 = vmatprep.subr.bf16.mxu0 %v12166_v31  ;;  %v12171_v61 = vld [vmem:[%s15699_s10 + $0x138] sm:$0xff]  }
 0x83e   :  { %v1633_v40 = vadd.f32 %v1632_v58, %v1060_v32  ;;  %v1676_v34 = vadd.f32 %v1675_v7, %v1068_v28  ;;  %v1634_v16 = vpop.f32.mrb[22].mxu1  ;;  %v1677_v22 = vpop.f32.mrb[22].mxu0  ;;  %v12172_v31 = vld [vmem:[%s15699_s10 + $0x1b8] sm:$0xff]  }
 0x83f   :  { %v1635_v45 = vadd.f32 %v1634_v16, %v1056_v47  ;;  %v1678_v44 = vadd.f32 %v1677_v22, %v1064_v55  ;;  %v1636_v38 = vpop.f32.mrb[23].mxu1  ;;  %v1679_v6 = vpop.f32.mrb[23].mxu0  ;;  %v1776_v58 = vmax.f32 %v1631_v26, 0.0  ;;  %v1778_v7 = vmax.f32 %v1674_v1, 0.0  ;;  %v12173_v47 = vld [vmem:[%s15699_s10 + $0x240] sm:$0xff]  }
 0x840   :  { %v1637_v13 = vadd.f32 %v1636_v38, %v1060_v32  ;;  %v1680_v43 = vadd.f32 %v1679_v6, %v1068_v28  ;;  %10859 = vmatpush3.bf16.msra.mxu1 %v12167_v14  ;;  %10881 = vmatpush3.bf16.msra.mxu0 %v12168_v21  ;;  %v12174_v55 = vld [vmem:[%s15699_s10 + $0x2c0] sm:$0xff]   ;;  %v1777_v32 = vmax.f32 %v1633_v40, 0.0  ;;  %v1779_v28 = vmax.f32 %v1676_v34, 0.0  ;;  %v12182_v38 = vld [vmem:[%s15699_s10 + $0x2d0] sm:$0xff]  }
 0x841   :  { %v1792_v0 = vmax.f32 %v1635_v45, 0.0  ;;  %v1794_v33 = vmax.f32 %v1678_v44, 0.0  ;;  %10860 = vmatprep.subr.bf16.mxu1 %v12169_v9  ;;  %10882 = vmatprep.subr.bf16.mxu0 %v12170_v11  ;;  %v12175_v9 = vld [vmem:[%s15699_s10 + $0x200] sm:$0xff]   ;;  %v1072_v40 = vrot.slane %v13557_v60, %v13487_v62  ;;  %v1080_v34 = vrot.slane %v13557_v60, %v13490_v42 }
 0x842   :  { %v1793_v14 = vmax.f32 %v1637_v13, 0.0  ;;  %v1795_v21 = vmax.f32 %v1680_v43, 0.0  ;;  %v12176_v11 = vld [vmem:[%s15699_s10 + $0x280] sm:$0xff]   ;;  %v12177_v43 = vld [vmem:[%s15699_s10 + $0x248] sm:$0xff]   ;;  %v1076_v45 = vrot.slane %v13557_v60, %v13493_v48  ;;  %v1084_v44 = vrot.slane %v13557_v60, %v13496_v52  ;;  %v12184_v60 = vld [vmem:[%s15699_s10 + $0x290] sm:$0xff]  }
 0x843   :  { %v13603_v16 = vpack.c.bf16 %v1792_v0, %v1776_v58  ;;  %v13605_v26 = vpack.c.bf16 %v1794_v33, %v1778_v7  ;;  %v12178_v33 = vld [vmem:[%s15699_s10 + $0x2c8] sm:$0xff]  }
 0x844   :  { %v1809_v1 = vpack.c.bf16 %v1793_v14, %v1777_v32  ;;  %v1811_v22 = vpack.c.bf16 %v1795_v21, %v1779_v28  ;;  %10861 = vmatpush3.bf16.msra.mxu1 %v12171_v61  ;;  %10883 = vmatpush3.bf16.msra.mxu0 %v12172_v31  ;;  %v12179_v0 = vld [vmem:[%s15699_s10 + $0x208] sm:$0xff]   ;;  %v12183_v61 = vld [vmem:[%s15699_s10 + $0x210] sm:$0xff]  }
 0x845   :  { %10890 = vmatprep.subr.bf16.mxu1 %v12173_v47  ;;  %10912 = vmatprep.subr.bf16.mxu0 %v12174_v55  ;;  %v12185_v55 = vld [vmem:[%s15699_s10 + $0x258] sm:$0xff]  }
 0x847   :  { %2960 = vmatmul.mubr.bf16.vlgmr.msra.gmra.mrb[32].mxu1 %v13538_v5  ;;  %3001 = vmatmul.mubr.bf16.vlgmr.msra.gmra.mrb[32].mxu0 %v13540_v10  ;;  %v12180_v5 = vld [vmem:[%s15699_s10 + $0x288] sm:$0xff]   ;;  %v12181_v10 = vld [vmem:[%s15699_s10 + $0x250] sm:$0xff]  }
 0x848   :  { %10891 = vmatpush3.bf16.msra.mxu1 %v12175_v9  ;;  %3041 = vmatprep.mubr.bf16.mxu1 %v1809_v1  ;;  %v12186_v1 = vld [vmem:[%s15699_s10 + $0x2d8] sm:$0xff]  }
 0x849   :  { %10913 = vmatpush3.bf16.msra.mxu0 %v12176_v11  ;;  %3082 = vmatprep.mubr.bf16.mxu0 %v1811_v22 }
 0x84a   :  { %10892 = vmatprep.subr.bf16.mxu1 %v12177_v43  ;;  %10914 = vmatprep.subr.bf16.mxu0 %v12178_v33 }
 0x84c   :  { %v1716_v6 = vpop.f32.mrb[24].mxu1  ;;  %v1759_v13 = vpop.f32.mrb[24].mxu0  ;;  %10893 = vmatpush3.bf16.msra.mxu1 %v12179_v0 }
 0x84d   :  { %v1717_v31 = vadd.f32 %v1716_v6, %v1072_v40  ;;  %v1760_v58 = vadd.f32 %v1759_v13, %v1080_v34  ;;  %10915 = vmatpush3.bf16.msra.mxu0 %v12180_v5  ;;  %v1718_v7 = vpop.f32.mrb[25].mxu1  ;;  %v1761_v47 = vpop.f32.mrb[25].mxu0  ;;  %10894 = vmatprep.subr.bf16.mxu1 %v12181_v10  ;;  %v12187_v5 = vld [vmem:[%s15699_s10 + $0x218] sm:$0xff]  }
 0x84e   :  { %v1719_v32 = vadd.f32 %v1718_v7, %v1076_v45  ;;  %v1762_v28 = vadd.f32 %v1761_v47, %v1084_v44  ;;  %v1720_v14 = vpop.f32.mrb[26].mxu1  ;;  %v1763_v21 = vpop.f32.mrb[26].mxu0  ;;  %10916 = vmatprep.subr.bf16.mxu0 %v12182_v38 }
 0x84f   :  { %v1721_v22 = vadd.f32 %v1720_v14, %v1072_v40  ;;  %v1764_v9 = vadd.f32 %v1763_v21, %v1080_v34  ;;  %v1722_v11 = vpop.f32.mrb[27].mxu1  ;;  %v1765_v43 = vpop.f32.mrb[27].mxu0  ;;  %v1780_v10 = vmax.f32 %v1717_v31, 0.0  ;;  %v1782_v6 = vmax.f32 %v1760_v58, 0.0  ;;  %v12188_v40 = vld [vmem:[%s15699_s10 + $0x298] sm:$0xff]   ;;  %v12189_v34 = vld [vmem:[%s15699_s10 + $0x260] sm:$0xff]  }
 0x850   :  { %v1723_v33 = vadd.f32 %v1722_v11, %v1076_v45  ;;  %v1766_v0 = vadd.f32 %v1765_v43, %v1084_v44  ;;  %10895 = vmatpush3.bf16.msra.mxu1 %v12183_v61  ;;  %v1781_v45 = vmax.f32 %v1719_v32, 0.0  ;;  %v1783_v44 = vmax.f32 %v1762_v28, 0.0  ;;  %v12190_v31 = vld [vmem:[%s15699_s10 + $0x2e0] sm:$0xff]   ;;  %v12193_v28 = vld [vmem:[%s15699_s10 + $0x268] sm:$0xff]   ;;  %v12198_v11 = vld [vmem:[%s15699_s10 + $0x2f0] sm:$0xff]  }
 0x851   :  { %v1796_v13 = vmax.f32 %v1721_v22, 0.0  ;;  %v1798_v7 = vmax.f32 %v1764_v9, 0.0  ;;  %10917 = vmatpush3.bf16.msra.mxu0 %v12184_v60  ;;  %10896 = vmatprep.subr.bf16.mxu1 %v12185_v55  ;;  %v12191_v14 = vld [vmem:[%s15699_s10 + $0x220] sm:$0xff]   ;;  %v12194_v21 = vld [vmem:[%s15699_s10 + $0x2e8] sm:$0xff]   ;;  %v12197_v9 = vld [vmem:[%s15699_s10 + $0x270] sm:$0xff]  }
 0x852   :  { %v1797_v38 = vmax.f32 %v1723_v33, 0.0  ;;  %v1799_v61 = vmax.f32 %v1766_v0, 0.0  ;;  %10918 = vmatprep.subr.bf16.mxu0 %v12186_v1  ;;  %v12192_v32 = vld [vmem:[%s15699_s10 + $0x2a0] sm:$0xff]   ;;  %v12195_v1 = vld [vmem:[%s15699_s10 + $0x228] sm:$0xff]   ;;  %v12199_v43 = vld [vmem:[%s15699_s10 + $0x230] sm:$0xff]  }
 0x853   :  { %v13665_v58 = vpack.c.bf16 %v1796_v13, %v1780_v10  ;;  %v13667_v47 = vpack.c.bf16 %v1798_v7, %v1782_v6  ;;  %v12196_v22 = vld [vmem:[%s15699_s10 + $0x2a8] sm:$0xff]   ;;  %v12200_v33 = vld [vmem:[%s15699_s10 + $0x2b0] sm:$0xff]   ;;  %v12201_v0 = vld [vmem:[%s15699_s10 + $0x278] sm:$0xff]  }
 0x854   :  { %v1813_v60 = vpack.c.bf16 %v1797_v38, %v1781_v45  ;;  %v1815_v55 = vpack.c.bf16 %v1799_v61, %v1783_v44  ;;  %10897 = vmatpush3.bf16.msra.mxu1 %v12187_v5  ;;  %v12202_v5 = vld [vmem:[%s15699_s10 + $0x2f8] sm:$0xff]   ;;  %v12205_v13 = vld [vmem:[%s15699_s10 + $0x340] sm:$0xff]   ;;  %v12209_v45 = vld [vmem:[%s15699_s10 + $0x348] sm:$0xff]  }
 0x855   :  { %10919 = vmatpush3.bf16.msra.mxu0 %v12188_v40  ;;  %10898 = vmatprep.subr.bf16.mxu1 %v12189_v34  ;;  %v12203_v10 = vld [vmem:[%s15699_s10 + $0x238] sm:$0xff]   ;;  %v12206_v7 = vld [vmem:[%s15699_s10 + $0x3c0] sm:$0xff]   ;;  %v12210_v44 = vld [vmem:[%s15699_s10 + $0x3c8] sm:$0xff]  }
 0x856   :  { %10920 = vmatprep.subr.bf16.mxu0 %v12190_v31  ;;  %v12204_v6 = vld [vmem:[%s15699_s10 + $0x2b8] sm:$0xff]   ;;  %v12207_v40 = vld [vmem:[%s15699_s10 + $0x300] sm:$0xff]   ;;  %v12211_v38 = vld [vmem:[%s15699_s10 + $0x308] sm:$0xff]  }
 0x857   :  { %v12208_v34 = vld [vmem:[%s15699_s10 + $0x380] sm:$0xff]   ;;  %v12212_v61 = vld [vmem:[%s15699_s10 + $0x388] sm:$0xff]   ;;  %v12215_v31 = vld [vmem:[%s15699_s10 + $0x310] sm:$0xff]  }
 0x858   :  { %10899 = vmatpush3.bf16.msra.mxu1 %v12191_v14  ;;  %v12218_v14 = vld [vmem:[%s15699_s10 + $0x3d8] sm:$0xff]  }
 0x859   :  { %10921 = vmatpush3.bf16.msra.mxu0 %v12192_v32  ;;  %10900 = vmatprep.subr.bf16.mxu1 %v12193_v28  ;;  %v12219_v32 = vld [vmem:[%s15699_s10 + $0x318] sm:$0xff]  }
 0x85a   :  { %10922 = vmatprep.subr.bf16.mxu0 %v12194_v21  ;;  %v12220_v28 = vld [vmem:[%s15699_s10 + $0x398] sm:$0xff]   ;;  %v12221_v21 = vld [vmem:[%s15699_s10 + $0x360] sm:$0xff]  }
 0x85c   :  { %10901 = vmatpush3.bf16.msra.mxu1 %v12195_v1  ;;  %v12222_v1 = vld [vmem:[%s15699_s10 + $0x3e0] sm:$0xff]  }
 0x85d   :  { %10923 = vmatpush3.bf16.msra.mxu0 %v12196_v22  ;;  %10902 = vmatprep.subr.bf16.mxu1 %v12197_v9  ;;  %v12223_v22 = vld [vmem:[%s15699_s10 + $0x320] sm:$0xff]  }
 0x85e   :  { %10924 = vmatprep.subr.bf16.mxu0 %v12198_v11  ;;  %v12224_v9 = vld [vmem:[%s15699_s10 + $0x3a0] sm:$0xff]   ;;  %v12225_v11 = vld [vmem:[%s15699_s10 + $0x368] sm:$0xff]  }
 0x860   :  { %10903 = vmatpush3.bf16.msra.mxu1 %v12199_v43  ;;  %v12226_v43 = vld [vmem:[%s15699_s10 + $0x3e8] sm:$0xff]  }
 0x861   :  { %10925 = vmatpush3.bf16.msra.mxu0 %v12200_v33  ;;  %10904 = vmatprep.subr.bf16.mxu1 %v12201_v0  ;;  %v12227_v33 = vld [vmem:[%s15699_s10 + $0x328] sm:$0xff]  }
 0x862   :  { %10926 = vmatprep.subr.bf16.mxu0 %v12202_v5  ;;  %v12228_v0 = vld [vmem:[%s15699_s10 + $0x3a8] sm:$0xff]   ;;  %v12229_v5 = vld [vmem:[%s15699_s10 + $0x370] sm:$0xff]  }
 0x864   :  { %10905 = vmatpush3.bf16.msra.mxu1 %v12203_v10  ;;  %v12230_v10 = vld [vmem:[%s15699_s10 + $0x3f0] sm:$0xff]  }
 0x865   :  { %10927 = vmatpush3.bf16.msra.mxu0 %v12204_v6  ;;  %10934 = vmatprep.subr.bf16.mxu1 %v12205_v13  ;;  %v12231_v6 = vld [vmem:[%s15699_s10 + $0x330] sm:$0xff]  }
 0x866   :  { %10956 = vmatprep.subr.bf16.mxu0 %v12206_v7  ;;  %v12232_v13 = vld [vmem:[%s15699_s10 + $0x3b0] sm:$0xff]   ;;  %v12233_v7 = vld [vmem:[%s15699_s10 + $0x378] sm:$0xff]  }
 0x867   :  { %3042 = vmatmul.mubr.bf16.vlgmr.msra.gmra.mrb[36].mxu1 %v13603_v16  ;;  %v12213_v16 = vld [vmem:[%s15699_s10 + $0x350] sm:$0xff]  }
 0x868   :  { %3083 = vmatmul.mubr.bf16.vlgmr.msra.gmra.mrb[36].mxu0 %v13605_v26  ;;  %10935 = vmatpush3.bf16.msra.mxu1 %v12207_v40  ;;  %v12214_v26 = vld [vmem:[%s15699_s10 + $0x3d0] sm:$0xff]   ;;  %v12234_v40 = vld [vmem:[%s15699_s10 + $0x3f8] sm:$0xff]  }
 0x869   :  { %3123 = vmatprep.mubr.bf16.mxu1 %v1813_v60  ;;  %10957 = vmatpush3.bf16.msra.mxu0 %v12208_v34  ;;  %v12216_v60 = vld [vmem:[%s15699_s10 + $0x390] sm:$0xff]   ;;  %v12235_v34 = vld [vmem:[%s15699_s10 + $0x338] sm:$0xff]  }
 0x86a   :  { %3164 = vmatprep.mubr.bf16.mxu0 %v1815_v55  ;;  %10936 = vmatprep.subr.bf16.mxu1 %v12209_v45  ;;  %v12217_v55 = vld [vmem:[%s15699_s10 + $0x358] sm:$0xff]  }
 0x86b   :  { %10958 = vmatprep.subr.bf16.mxu0 %v12210_v44  ;;  %v12236_v45 = vld [vmem:[%s15699_s10 + $0x3b8] sm:$0xff]   ;;  %v15746_v44 = vmov 0.0  }
 0x86c   :  { %10937 = vmatpush3.bf16.msra.mxu1 %v12211_v38 }
 0x86d   :  { %10959 = vmatpush3.bf16.msra.mxu0 %v12212_v61  ;;  %10938 = vmatprep.subr.bf16.mxu1 %v12213_v16  ;;  %v9431_v16 = vld [vmem:[%s15700_s11] ss:$0 sm:$0xff] }
 0x86e   :  { %10960 = vmatprep.subr.bf16.mxu0 %v12214_v26 }
 0x870   :  { %10939 = vmatpush3.bf16.msra.mxu1 %v12215_v31 }
 0x871   :  { %10961 = vmatpush3.bf16.msra.mxu0 %v12216_v60  ;;  %10940 = vmatprep.subr.bf16.mxu1 %v12217_v55 }
 0x872   :  { %10962 = vmatprep.subr.bf16.mxu0 %v12218_v14 }
 0x874   :  { %10941 = vmatpush3.bf16.msra.mxu1 %v12219_v32 }
 0x875   :  { %10963 = vmatpush3.bf16.msra.mxu0 %v12220_v28  ;;  %10942 = vmatprep.subr.bf16.mxu1 %v12221_v21 }
 0x876   :  { %10964 = vmatprep.subr.bf16.mxu0 %v12222_v1 }
 0x878   :  { %10943 = vmatpush3.bf16.msra.mxu1 %v12223_v22 }
 0x879   :  { %10965 = vmatpush3.bf16.msra.mxu0 %v12224_v9  ;;  %10944 = vmatprep.subr.bf16.mxu1 %v12225_v11 }
 0x87a   :  { %10966 = vmatprep.subr.bf16.mxu0 %v12226_v43 }
 0x87c   :  { %10945 = vmatpush3.bf16.msra.mxu1 %v12227_v33 }
 0x87d   :  { %10967 = vmatpush3.bf16.msra.mxu0 %v12228_v0  ;;  %10946 = vmatprep.subr.bf16.mxu1 %v12229_v5 }
 0x87e   :  { %10968 = vmatprep.subr.bf16.mxu0 %v12230_v10 }
 0x880   :  { %10947 = vmatpush3.bf16.msra.mxu1 %v12231_v6 }
 0x881   :  { %10969 = vmatpush3.bf16.msra.mxu0 %v12232_v13  ;;  %10948 = vmatprep.subr.bf16.mxu1 %v12233_v7 }
 0x882   :  { %10970 = vmatprep.subr.bf16.mxu0 %v12234_v40 }
 0x884   :  { %10949 = vmatpush3.bf16.msra.mxu1 %v12235_v34 }
 0x885   :  { %10971 = vmatpush3.bf16.msra.mxu0 %v12236_v45 }
 0x886   :  { %11834 = vmatprep.subr.bf16.mxu0 %v15714_v53 }
 0x887   :  { %3124 = vmatmul.mubr.bf16.vlgmr.msra.gmra.mrb[40].mxu1 %v13665_v58 }
 0x888   :  { %3165 = vmatmul.mubr.bf16.vlgmr.msra.gmra.mrb[40].mxu0 %v13667_v47  ;;  %3313 = vmatprep.mubr.bf16.mxu1 %v15712_v2 }
 0x889   :  { %11566 = vmatprep.mubr.msk.f32.mxu0 %vm12601_vm12, %v15746_v44 }
 0x8fa   :  { %v10818_v38 = vpop.f32.mrb[28].mxu1  ;;  %v10840_v61 = vpop.f32.mrb[28].mxu0 }
 0x8fb   :  { %v10819_v26 = vpop.f32.mrb[29].mxu1  ;;  %v10841_v31 = vpop.f32.mrb[29].mxu0 }
 0x8fc   :  { %v10820_v60 = vadd.f32 %v10819_v26, %v10818_v38  ;;  %v10842_v55 = vadd.f32 %v10841_v31, %v10840_v61  ;;  %v10821_v14 = vpop.f32.mrb[30].mxu1  ;;  %v10843_v32 = vpop.f32.mrb[30].mxu0 }
 0x8fd   :  { %v10822_v58 = vpop.f32.mrb[31].mxu1  ;;  %v10844_v28 = vpop.f32.mrb[31].mxu0 }
 0x8fe   :  { %v2880_v47 = vadd.f32 %v10820_v60, %v9431_v16  ;;  %v10823_v21 = vadd.f32 %v10822_v58, %v10821_v14  ;;  %v10845_v1 = vadd.f32 %v10844_v28, %v10843_v32 }
 0x900   :  { %v2921_v22 = vadd.f32 %v10842_v55, %v2880_v47  ;;  %v2883_v9 = vadd.f32 %v10823_v21, %v9431_v16 }
 0x902   :  { %v2924_v11 = vadd.f32 %v10845_v1, %v2883_v9 }
 0x91a   :  { %v10862_v43 = vpop.f32.mrb[32].mxu1  ;;  %v10884_v33 = vpop.f32.mrb[32].mxu0 }
 0x91b   :  { %v10863_v0 = vpop.f32.mrb[33].mxu1  ;;  %v10885_v5 = vpop.f32.mrb[33].mxu0 }
 0x91c   :  { %v10864_v10 = vadd.f32 %v10863_v0, %v10862_v43  ;;  %v10886_v6 = vadd.f32 %v10885_v5, %v10884_v33  ;;  %v10865_v13 = vpop.f32.mrb[34].mxu1  ;;  %v10887_v7 = vpop.f32.mrb[34].mxu0 }
 0x91d   :  { %v10866_v40 = vpop.f32.mrb[35].mxu1  ;;  %v10888_v34 = vpop.f32.mrb[35].mxu0 }
 0x91e   :  { %v2962_v45 = vadd.f32 %v10864_v10, %v2921_v22  ;;  %v10867_v38 = vadd.f32 %v10866_v40, %v10865_v13  ;;  %v10889_v61 = vadd.f32 %v10888_v34, %v10887_v7 }
 0x920   :  { %v3003_v26 = vadd.f32 %v10886_v6, %v2962_v45  ;;  %v2965_v31 = vadd.f32 %v10867_v38, %v2924_v11 }
 0x922   :  { %v3006_v60 = vadd.f32 %v10889_v61, %v2965_v31 }
 0x93a   :  { %v10906_v14 = vpop.f32.mrb[36].mxu1 }
 0x93b   :  { %v10928_v55 = vpop.f32.mrb[36].mxu0  ;;  %v10907_v16 = vpop.f32.mrb[37].mxu1 }
 0x93c   :  { %v10908_v32 = vadd.f32 %v10907_v16, %v10906_v14  ;;  %v10929_v58 = vpop.f32.mrb[37].mxu0  ;;  %v10909_v28 = vpop.f32.mrb[38].mxu1 }
 0x93d   :  { %v10930_v47 = vadd.f32 %v10929_v58, %v10928_v55  ;;  %v10931_v21 = vpop.f32.mrb[38].mxu0  ;;  %v10910_v1 = vpop.f32.mrb[39].mxu1 }
 0x93e   :  { %v3044_v9 = vadd.f32 %v10908_v32, %v3003_v26  ;;  %v10911_v43 = vadd.f32 %v10910_v1, %v10909_v28  ;;  %v10932_v33 = vpop.f32.mrb[39].mxu0 }
 0x93f   :  { %v10933_v0 = vadd.f32 %v10932_v33, %v10931_v21 }
 0x940   :  { %v3085_v5 = vadd.f32 %v10930_v47, %v3044_v9  ;;  %v3047_v22 = vadd.f32 %v10911_v43, %v3006_v60 }
 0x942   :  { %v3088_v10 = vadd.f32 %v10933_v0, %v3047_v22 }
 0x95a   :  { %v10950_v13 = vpop.f32.mrb[40].mxu1 }
 0x95b   :  { %v10972_v6 = vpop.f32.mrb[40].mxu0  ;;  %v10951_v11 = vpop.f32.mrb[41].mxu1 }
 0x95c   :  { %v10952_v7 = vadd.f32 %v10951_v11, %v10950_v13  ;;  %v10973_v40 = vpop.f32.mrb[41].mxu0  ;;  %v10953_v34 = vpop.f32.mrb[42].mxu1  ;;  %v12242_v11 = vld [vmem:[%s15691_s2 + $0x54] ss:$8 sps:$4 sm:$0xff]  }
 0x95d   :  { %v10974_v45 = vadd.f32 %v10973_v40, %v10972_v6  ;;  %v10975_v38 = vpop.f32.mrb[42].mxu0  ;;  %v10954_v61 = vpop.f32.mrb[43].mxu1  ;;  %v12237_v6 = vld [vmem:[%s15691_s2 + $0x40] ss:$8 sps:$4 sm:$0xff]   ;;  %v12245_v40 = vld [vmem:[%s15691_s2 + $0x64] ss:$8 sps:$4 sm:$0xff]  }
 0x95e   :  { %v3126_v31 = vadd.f32 %v10952_v7, %v3085_v5  ;;  %v10955_v14 = vadd.f32 %v10954_v61, %v10953_v34  ;;  %v10976_v55 = vpop.f32.mrb[43].mxu0  ;;  %v12240_v7 = vld [vmem:[%s15691_s2 + $0x50] ss:$8 sps:$4 sm:$0xff]   ;;  %v12243_v34 = vld [vmem:[%s15691_s2 + $0x60] ss:$8 sps:$4 sm:$0xff]  }
 0x95f   :  { %v10977_v16 = vadd.f32 %v10976_v55, %v10975_v38  ;;  %v12246_v38 = vld [vmem:[%s15691_s2 + $0x70] ss:$8 sps:$4 sm:$0xff]  }
 0x960   :  { %v3167_v26 = vadd.f32 %v10974_v45, %v3126_v31  ;;  %v3129_v32 = vadd.f32 %v10955_v14, %v3088_v10  ;;  %v12248_v45 = vld [vmem:[%s15691_s2 + $0x74] ss:$8 sps:$4 sm:$0xff]  }
 0x962   :  { %v3170_v58 = vadd.f32 %v10977_v16, %v3129_v32  ;;  %v3173_v28 = vadd.f32 %v3167_v26, %v13209_v39 }
 0x964   :  { %v3175_v60 = vsel %vm296_vm11, %v3173_v28, 0.0  ;;  %v3174_v47 = vadd.f32 %v3170_v58, %v13211_v57  ;;  %v12239_v57 = vld [vmem:[%s15691_s2 + $0x44] ss:$8 sps:$4 sm:$0xff]   ;;  %v9560_v58 = vld [vmem:[%s15701_s12] ss:$0 sm:$0xff] }
 0x965   :  { %3176 = vadd.xlane.f32.xlu1 %v3175_v60  ;;  %3281 = vmatprep.subr.bf16.mxu1 %v12239_v57 }
 0x966   :  { %v3178_v21 = vsel %vm296_vm11, %v3174_v47, 0.0  ;;  %3282 = vmatpush1.bf16.msra.mxu1 %v12237_v6 }
 0x967   :  { %3179 = vadd.xlane.f32.xlu0 %v3178_v21  ;;  %3283 = vmatprep.subr.bf16.mxu1 %v12242_v11 }
 0x96a   :  { %3284 = vmatpush1.bf16.msra.mxu1 %v12240_v7 }
 0x96b   :  { %3285 = vmatprep.subr.bf16.mxu1 %v12245_v40 }
 0x96e   :  { %3286 = vmatpush1.bf16.msra.mxu1 %v12243_v34 }
 0x96f   :  { %3287 = vmatprep.subr.bf16.mxu1 %v12248_v45 }
 0x972   :  { %3288 = vmatpush1.bf16.msra.mxu1 %v12246_v38 }
 0x973   :  { %11850 = vmatprep.subr.bf16.mxu1 %v15714_v53 }
 0x9f2   :  { %v3177_v1 = vpop.xlane.xlu1 %3176 }
 0x9f3   :  { %v3181_v9 = vmul.f32 0.015625, %v3177_v1  ;;  %v9561_v1 = vld [vmem:[%s15702_s13] ss:$0 sm:$0xff] }
 0x9f4   :  { %v3180_v43 = vpop.xlane.xlu0 %3179 }
 0x9f5   :  { %v3183_v33 = vsub.f32 %v3173_v28, %v3181_v9  ;;  %v3182_v0 = vmul.f32 0.015625, %v3180_v43 }
 0x9f7   :  { %v3184_v5 = vsub.f32 %v3174_v47, %v3182_v0  ;;  %v3185_v22 = vmul.f32 %v3183_v33, %v3183_v33 }
 0x9f9   :  { %v3187_v10 = vsel %vm296_vm11, %v3185_v22, 0.0  ;;  %v3186_v13 = vmul.f32 %v3184_v5, %v3184_v5 }
 0x9fa   :  { %3188 = vadd.xlane.f32.xlu1 %v3187_v10 }
 0x9fb   :  { %v3190_v39 = vsel %vm296_vm11, %v3186_v13, 0.0 }
 0x9fc   :  { %3191 = vadd.xlane.f32.xlu0 %v3190_v39 }
 0xa87   :  { %v3189_v61 = vpop.xlane.xlu1 %3188 }
 0xa88   :  { %v3193_v31 = vmul.f32 0.015625, %v3189_v61 }
 0xa89   :  { %v3192_v14 = vpop.xlane.xlu0 %3191 }
 0xa8a   :  { %v3195_v55 = vadd.f32 1e-05, %v3193_v31  ;;  %v3194_v16 = vmul.f32 0.015625, %v3192_v14 }
 0xa8c   :  { %12537 = vrsqrt.f32 %v3195_v55  ;;  %v3196_v26 = vadd.f32 1e-05, %v3194_v16 }
 0xa8e   :  { %12539 = vrsqrt.f32 %v3196_v26 }
 0xa96   :  { %v12538_v32 = vpop.eup %12537 }
 0xa97   :  { %v3199_v28 = vmul.f32 %v12538_v32, %v3183_v33  ;;  %v9570_v33 = vld [vmem:[%s15692_s3 + $0x1] ss:$4 sm:$0x3] }
 0xa98   :  { %v12540_v60 = vpop.eup %12539  ;;  %v13873_v57 = vrot.slane %v9570_v33, %v12883_v49 }
 0xa99   :  { %v3206_v47 = vmul.f32 %v9560_v58, %v3199_v28  ;;  %v3200_v21 = vmul.f32 %v12540_v60, %v3184_v5  ;;  %v3231_v5 = vrot.slane %v9570_v33, %v12876_v46 }
 0xa9b   :  { %v3207_v9 = vmul.f32 %v9560_v58, %v3200_v21  ;;  %v13855_v43 = vadd.f32 %v9561_v1, %v3206_v47 }
 0xa9d   :  { %v13857_v0 = vadd.f32 %v9561_v1, %v3207_v9 }
 0xa9f   :  { %v3215_v22 = vpack.c.bf16 %v13857_v0, %v13855_v43 }
 0xaa1   :  { %9579 = vmatmul.mubr.msk.bf16.vlgmr.msra.gmra.mrb[44].mxu1 %vm296_vm11, %v3215_v22 }
 0xaa2   :  { %11585 = vmatprep.mubr.msk.f32.mxu1 %vm12601_vm12, %v15746_v44 }
 0xb74   :  { %v3315_v10 = vpop.f32.mrb[44].mxu1 }
 0xb75   :  { %v13868_v13 = vadd.f32 %v3315_v10, %v3231_v5  ;;  %v13870_v39 = vpop.f32.mrb[45].mxu1 }
 0xb76   :  { %v3319_v6 = vpop.f32.mrb[46].mxu1 }
 0xb77   :  { %v13875_v11 = vadd.f32 %v3319_v6, %v3231_v5  ;;  %v3321_v7 = vpop.f32.mrb[47].mxu1  ;;  %v3324_v40 = vmul.f32 %v12887_v51, %v13868_v13  ;;  %v3325_v34 = vmul.f32 %v12885_v50, %v13868_v13  ;;  %v3326_v38 = vmul.f32 %v12891_v54, %v13868_v13 }
 0xb78   :  { %v13882_v45 = vadd.f32 %v3321_v7, %v13873_v57  ;;  %v3327_v55 = vmul.f32 %v12893_v56, %v13868_v13  ;;  %v3328_v26 = vmul.f32 %v12910_v4, %v13868_v13  ;;  %v3329_v32 = vmul.f32 %v12908_v3, %v13868_v13 }
 0xb79   :  { %v12013_v61 = vpack.i.bf16 %v3325_v34, %v3324_v40  ;;  %v3332_v31 = vmul.f32 %v12887_v51, %v13875_v11  ;;  %v3333_v14 = vmul.f32 %v12885_v50, %v13875_v11  ;;  %v3334_v28 = vmul.f32 %v12891_v54, %v13875_v11 }
 0xb7a   :  { %v12023_v58 = vpack.i.bf16 %v3327_v55, %v3326_v38  ;;  %v3335_v60 = vmul.f32 %v12893_v56, %v13875_v11  ;;  %v12033_v47 = vpack.i.bf16 %v3329_v32, %v3328_v26  ;;  %v3330_v21 = vmul.f32 %v12930_v18, %v13868_v13 }
 0xb7b   :  { %12014 = vrot.lane.b32.xlu1 %v12013_v61, %s12599_s22  ;;  %v12018_v16 = vpack.i.bf16 %v3333_v14, %v3332_v31  ;;  %v3331_v1 = vmul.f32 %v12928_v17, %v13868_v13  ;;  %v3336_v22 = vmul.f32 %v12910_v4, %v13875_v11  ;;  %v3337_v33 = vmul.f32 %v12908_v3, %v13875_v11 }
 0xb7c   :  { %v12028_v9 = vpack.i.bf16 %v3335_v60, %v3334_v28  ;;  %v3338_v6 = vmul.f32 %v12930_v18, %v13875_v11  ;;  %v3339_v7 = vmul.f32 %v12928_v17, %v13875_v11 }
 0xb7d   :  { %12019 = vrot.lane.b32.xlu0 %v12018_v16, %s12599_s22  ;;  %v12043_v5 = vpack.i.bf16 %v3331_v1, %v3330_v21  ;;  %v12038_v10 = vpack.i.bf16 %v3337_v33, %v3336_v22 }
 0xb7e   :  { %v12048_v40 = vpack.i.bf16 %v3339_v7, %v3338_v6 }
 0xb7f   :  { %12024 = vrot.lane.b32.xlu1 %v12023_v58, %s12599_s22 }
 0xb81   :  { %12034 = vrot.lane.b32.xlu0 %v12033_v47, %s12599_s22 }
 0xb83   :  { %12029 = vrot.lane.b32.xlu1 %v12028_v9, %s12599_s22 }
 0xb85   :  { %12044 = vrot.lane.b32.xlu0 %v12043_v5, %s12599_s22 }
 0xb87   :  { %12039 = vrot.lane.b32.xlu1 %v12038_v10, %s12599_s22 }
 0xb8b   :  { %12049 = vrot.lane.b32.xlu1 %v12048_v40, %s12599_s22 }
 0xbed   :  { %v12015_v34 = vpop.permute.xlu1 %12014 }
 0xbee   :  { %v12017_v38 = vunpack.i.h.bf16 %v12015_v34  ;;  %v12016_v61 = vunpack.i.l.bf16 %v12015_v34 }
 0xbef   :  { %v12020_v31 = vpop.permute.xlu0 %12019 }
 0xbf0   :  { %v11835_v14 = vpack.c.bf16 %v12017_v38, %v12016_v61  ;;  %v12022_v55 = vunpack.i.h.bf16 %v12020_v31  ;;  %v12021_v16 = vunpack.i.l.bf16 %v12020_v31 }
 0xbf1   :  { %v12025_v26 = vpop.permute.xlu1 %12024 }
 0xbf2   :  { %v11851_v32 = vpack.c.bf16 %v12022_v55, %v12021_v16  ;;  %11837 = vmatpush3.bf16.xpose.msk.msra.mxu0 %vm12961_vm13, %v11835_v14  ;;  %v12027_v58 = vunpack.i.h.bf16 %v12025_v26  ;;  %v12026_v28 = vunpack.i.l.bf16 %v12025_v26 }
 0xbf3   :  { %11838 = vmatprep.subr.bf16.mxu0 %v15714_v53  ;;  %v12035_v9 = vpop.permute.xlu0 %12034 }
 0xbf4   :  { %11853 = vmatpush3.bf16.xpose.msk.msra.mxu1 %vm12961_vm13, %v11851_v32  ;;  %v11839_v1 = vpack.c.bf16 %v12027_v58, %v12026_v28  ;;  %v12037_v5 = vunpack.i.h.bf16 %v12035_v9  ;;  %v12036_v10 = vunpack.i.l.bf16 %v12035_v9  ;;  %v3318_v32 = vadd.f32 %v13870_v39, %v13873_v57 }
 0xbf5   :  { %v12030_v60 = vpop.permute.xlu1 %12029  ;;  %11854 = vmatprep.subr.bf16.mxu1 %v15714_v53  ;;  %v15747_v28 = vmov 1.0|1.0  }
 0xbf6   :  { %v12032_v47 = vunpack.i.h.bf16 %v12030_v60  ;;  %v12031_v21 = vunpack.i.l.bf16 %v12030_v60  ;;  %v11843_v40 = vpack.c.bf16 %v12037_v5, %v12036_v10  ;;  %v3340_v60 = vmul.f32 %v12784_v15, %v3318_v32 }
 0xbf7   :  { %v12045_v34 = vpop.permute.xlu0 %12044  ;;  %v3342_v57 = vmul.f32 %v12809_v24, %v3318_v32  ;;  %v3345_v9 = vmul.f32 %v12859_v36, %v3318_v32 }
 0xbf8   :  { %v11855_v22 = vpack.c.bf16 %v12032_v47, %v12031_v21  ;;  %v12047_v31 = vunpack.i.h.bf16 %v12045_v34  ;;  %v12046_v14 = vunpack.i.l.bf16 %v12045_v34  ;;  %v3341_v47 = vmul.f32 %v12804_v23, %v3318_v32 }
 0xbf9   :  { %v12040_v33 = vpop.permute.xlu1 %12039  ;;  %v3343_v21 = vmul.f32 %v12814_v25, %v3318_v32 }
 0xbfa   :  { %11841 = vmatpush3.bf16.xpose.msk.msra.mxu0 %vm12961_vm13, %v11839_v1  ;;  %v12042_v6 = vunpack.i.h.bf16 %v12040_v33  ;;  %v12041_v7 = vunpack.i.l.bf16 %v12040_v33  ;;  %v11847_v26 = vpack.c.bf16 %v12047_v31, %v12046_v14  ;;  %v3677_v39 = vpack.c.bf16 %v3341_v47, %v3340_v60 }
 0xbfb   :  { %11842 = vmatprep.subr.bf16.mxu0 %v15714_v53  ;;  %v3344_v1 = vmul.f32 %v12854_v35, %v3318_v32  ;;  %v3347_v33 = vmul.f32 %v12836_v30, %v3318_v32 }
 0xbfc   :  { %11857 = vmatpush3.bf16.xpose.msk.msra.mxu1 %vm12961_vm13, %v11855_v22  ;;  %v11859_v38 = vpack.c.bf16 %v12042_v6, %v12041_v7  ;;  %v3346_v22 = vmul.f32 %v12831_v29, %v3318_v32  ;;  %v3348_v32 = vmul.f32 %v12784_v15, %v13882_v45 }
 0xbfd   :  { %11858 = vmatprep.subr.bf16.mxu1 %v15714_v53  ;;  %v12050_v61 = vpop.permute.xlu1 %12049 }
 0xbfe   :  { %v12052_v55 = vunpack.i.h.bf16 %v12050_v61  ;;  %v12051_v16 = vunpack.i.l.bf16 %v12050_v61  ;;  %v3680_v5 = vpack.c.bf16 %v3347_v33, %v3346_v22  ;;  %v3354_v33 = vmul.f32 %v12831_v29, %v13882_v45 }
 0xc00   :  { %v11863_v58 = vpack.c.bf16 %v12052_v55, %v12051_v16 }
 0xc02   :  { %11845 = vmatpush3.bf16.xpose.msk.msra.mxu0 %vm12961_vm13, %v11843_v40 }
 0xc03   :  { %11846 = vmatprep.subr.bf16.mxu0 %v15714_v53 }
 0xc04   :  { %11861 = vmatpush3.bf16.xpose.msk.msra.mxu1 %vm12961_vm13, %v11859_v38 }
 0xc05   :  { %11862 = vmatprep.subr.bf16.mxu1 %v15714_v53 }
 0xc0a   :  { %11849 = vmatpush3.bf16.xpose.msk.msra.mxu0 %vm12961_vm13, %v11847_v26 }
 0xc0b   :  { %11867 = vmatprep.subr.msk.bf16.mxu0 %vm13014_vm14, %v15747_v28 }
 0xc0c   :  { %11865 = vmatpush3.bf16.xpose.msk.msra.mxu1 %vm12961_vm13, %v11863_v58  ;;  %v3349_v58 = vmul.f32 %v12804_v23, %v13882_v45 }
 0xc0d   :  { %11607 = vmatprep.subr.bf16.mxu1 %v15746_v44 }
 0xc11   :  { %11567 = vmatmul.mubr.msk.f32.vlgmr.msra.gmra.mrb[44].mxu0 %vm296_vm11, %v13868_v13  ;;  %v3678_v13 = vpack.c.bf16 %v3343_v21, %v3342_v57  ;;  %v3681_v57 = vpack.c.bf16 %v3349_v58, %v3348_v32  ;;  %v3350_v21 = vmul.f32 %v12809_v24, %v13882_v45 }
 0xc12   :  { %11869 = vmatpush3.bf16.msk.msra.mxu0 %vm13014_vm14, %v15747_v28 }
 0xc13   :  { %11586 = vmatmul.mubr.msk.f32.vlgmr.msra.gmra.mrb[48].mxu1 %vm296_vm11, %v13875_v11  ;;  %11871 = vmatprep.subr.msk.bf16.mxu0 %vm13028_vm15, %v15747_v28  ;;  %v3679_v11 = vpack.c.bf16 %v3345_v9, %v3344_v1  ;;  %v3352_v9 = vmul.f32 %v12854_v35, %v13882_v45 }
 0xc14   :  { %11608 = vmatpush3.bf16.msra.mxu1 %v3677_v39  ;;  %11615 = vmatprep.mubr.msk.bf16.mxu1 %vm12601_vm12, %v15746_v44 }
 0xc15   :  { %11609 = vmatprep.subr.bf16.mxu1 %v15746_v44 }
 0xc16   :  { %11873 = vmatpush3.bf16.msk.msra.mxu0 %vm13028_vm15, %v15747_v28 }
 0xc17   :  { %11875 = vmatprep.subr.msk.bf16.mxu0 %vm13039_vm0, %v15747_v28 }
 0xc18   :  { %11610 = vmatpush3.bf16.msra.mxu1 %v3678_v13  ;;  %v3351_v13 = vmul.f32 %v12814_v25, %v13882_v45 }
 0xc19   :  { %11611 = vmatprep.subr.bf16.mxu1 %v15746_v44 }
 0xc1a   :  { %11877 = vmatpush3.bf16.msk.msra.mxu0 %vm13039_vm0, %v15747_v28  ;;  %v3682_v1 = vpack.c.bf16 %v3351_v13, %v3350_v21 }
 0xc1b   :  { %11879 = vmatprep.subr.msk.bf16.mxu0 %vm13053_vm1, %v15747_v28 }
 0xc1c   :  { %11612 = vmatpush3.bf16.msra.mxu1 %v3679_v11  ;;  %v3353_v11 = vmul.f32 %v12859_v36, %v13882_v45 }
 0xc1d   :  { %11613 = vmatprep.subr.bf16.mxu1 %v15746_v44 }
 0xc1e   :  { %11881 = vmatpush3.bf16.msk.msra.mxu0 %vm13053_vm1, %v15747_v28  ;;  %v3683_v22 = vpack.c.bf16 %v3353_v11, %v3352_v9 }
 0xc1f   :  { %11619 = vmatprep.subr.bf16.mxu0 %v15746_v44 }
 0xc20   :  { %11614 = vmatpush3.bf16.msra.mxu1 %v3680_v5  ;;  %v3355_v5 = vmul.f32 %v12836_v30, %v13882_v45  ;;  %v12251_v45 = vld [vmem:[%s15693_s4 + $0x30] sm:$0xff]  }
 0xc21   :  { %11631 = vmatprep.subr.bf16.mxu1 %v15746_v44 }
 0xce4   :  { %v3465_v10 = vpop.f32.mrb[44].mxu0 }
 0xce5   :  { %v11568_v6 = vpop.f32.mrb[45].mxu0  ;;  %v3582_v7 = vsel %vm296_vm11, %v3465_v10, -inf }
 0xce6   :  { %v3578_v40 = vpop.f32.mrb[48].mxu1  ;;  %3583 = vmax.xlane.f32.xlu0 %v3582_v7  ;;  %v12249_v7 = vld [vmem:[%s15693_s4 + $0x20] sm:$0xff]  }
 0xce7   :  { %v11587_v34 = vpop.f32.mrb[49].mxu1  ;;  %v3585_v38 = vsel %vm296_vm11, %v3578_v40, -inf }
 0xce8   :  { %3586 = vmax.xlane.f32.xlu1 %v3585_v38  ;;  %v12252_v34 = vld [vmem:[%s15693_s4 + $0x38] sm:$0xff]  }
 0xd73   :  { %v3584_v61 = vpop.xlane.xlu0 %3583 }
 0xd74   :  { %v3588_v31 = vsub.f32 %v3465_v10, %v3584_v61  ;;  %v3684_v10 = vpack.c.bf16 %v3355_v5, %v3354_v33 }
 0xd75   :  { %v3587_v14 = vpop.xlane.xlu1 %3586 }
 0xd76   :  { %v3590_v55 = vmul.f32 1.442695, %v3588_v31  ;;  %v3589_v16 = vsub.f32 %v3578_v40, %v3587_v14  ;;  %v12250_v40 = vld [vmem:[%s15693_s4 + $0x28] sm:$0xff]  }
 0xd78   :  { %12541 = vpow2.f32 %v3590_v55  ;;  %v3592_v26 = vmul.f32 1.442695, %v3589_v16 }
 0xd7a   :  { %12543 = vpow2.f32 %v3592_v26 }
 0xd82   :  { %v12542_v60 = vpop.eup %12541 }
 0xd83   :  { %11604 = vmatprep.mubr.msk.f32.mxu0 %vm296_vm11, %v12542_v60  ;;  %v3675_v47 = vpack.c.bf16 %v12542_v60, %v12542_v60 }
 0xd84   :  { %v12544_v39 = vpop.eup %12543 }
 0xd85   :  { %11605 = vmatmul.mubr.msk.f32.vlgmr.msra.gmra.mrb[46].mxu0 %vm296_vm11, %v12544_v39  ;;  %11616 = vmatmul.mubr.msk.bf16.vlgmr.msra.gmra.mrb[52].mxu1 %vm296_vm11, %v3675_v47  ;;  %v3676_v6 = vpack.c.bf16 %v12544_v39, %v12544_v39 }
 0xd86   :  { %11620 = vmatpush3.bf16.msra.mxu0 %v3681_v57  ;;  %11627 = vmatprep.mubr.msk.bf16.mxu0 %vm12601_vm12, %v15746_v44 }
 0xd87   :  { %11621 = vmatprep.subr.bf16.mxu0 %v15746_v44  ;;  %11639 = vmatprep.mubr.msk.bf16.mxu1 %vm12601_vm12, %v15746_v44 }
 0xd88   :  { %11632 = vmatpush3.bf16.msra.mxu1 %v12249_v7 }
 0xd89   :  { %11633 = vmatprep.subr.bf16.mxu1 %v15746_v44 }
 0xd8a   :  { %11622 = vmatpush3.bf16.msra.mxu0 %v3682_v1  ;;  %v9618_v1 = vld [vmem:[%s15694_s5 + $0x1] ss:$0 sm:$0xff] }
 0xd8b   :  { %11623 = vmatprep.subr.bf16.mxu0 %v15746_v44 }
 0xd8c   :  { %11634 = vmatpush3.bf16.msra.mxu1 %v12250_v40 }
 0xd8d   :  { %11635 = vmatprep.subr.bf16.mxu1 %v15746_v44 }
 0xd8e   :  { %11624 = vmatpush3.bf16.msra.mxu0 %v3683_v22 }
 0xd8f   :  { %11625 = vmatprep.subr.bf16.mxu0 %v15746_v44 }
 0xd90   :  { %11636 = vmatpush3.bf16.msra.mxu1 %v12251_v45 }
 0xd91   :  { %11637 = vmatprep.subr.bf16.mxu1 %v15746_v44 }
 0xd92   :  { %11626 = vmatpush3.bf16.msra.mxu0 %v3684_v10 }
 0xd94   :  { %11638 = vmatpush3.bf16.msra.mxu1 %v12252_v34 }
 0xd95   :  { %11628 = vmatmul.mubr.msk.bf16.vlgmr.msra.gmra.mrb[48].mxu0 %vm296_vm11, %v3676_v6 }
 0xd96   :  { %4407 = vmatprep.mubr.bf16.mxu0 %v15712_v2 }
 0xe58   :  { %v11606_v38 = vpop.f32.mrb[46].mxu0  ;;  %v3722_v61 = vpop.f32.mrb[52].mxu1 }
 0xe59   :  { %v3666_v31 = vpop.f32.mrb[47].mxu0  ;;  %v11617_v14 = vpop.f32.mrb[53].mxu1 }
 0xe5a   :  { %12545 = vrcp.f32 %v3666_v31  ;;  %v3725_v55 = vpop.f32.mrb[54].mxu1 }
 0xe5b   :  { %v11618_v16 = vpop.f32.mrb[55].mxu1  ;;  %12547 = vrcp.f32 %v11606_v38 }
 0xe64   :  { %v12546_v26 = vpop.eup %12545 }
 0xe65   :  { %v3773_v32 = vmul.f32 %v12546_v26, %v3722_v61  ;;  %v12548_v58 = vpop.eup %12547 }
 0xe68   :  { %v3765_v60 = vpop.f32.mrb[48].mxu0 }
 0xe69   :  { %v3774_v47 = vmul.f32 %v12548_v58, %v3765_v60  ;;  %v11629_v39 = vpop.f32.mrb[49].mxu0  ;;  %v9634_v58 = vld [vmem:[%s15697_s8 + $0x240] sm:$0xff]  ;;  %v9627_v60 = vld [vmem:[%s15697_s8 + $0x208] sm:$0xff] }
 0xe6a   :  { %v3768_v57 = vpop.f32.mrb[50].mxu0  ;;  %v9635_v39 = vld [vmem:[%s15697_s8 + $0x248] sm:$0xff] }
 0xe6b   :  { %v3775_v21 = vpack.c.bf16 %v3774_v47, %v3773_v32  ;;  %v11630_v13 = vpop.f32.mrb[51].mxu0  ;;  %v9626_v32 = vld [vmem:[%s15697_s8 + $0x200] sm:$0xff] }
 0xe6c   :  { %v9693_v47 = vcombine.high %v9626_v32, %v9634_v58  ;;  %v9692_v57 = vcombine.low %v9626_v32, %v9634_v58  ;;  %v9695_v13 = vcombine.high %v9627_v60, %v9635_v39 }
 0xe6d   :  { %11640 = vmatmul.mubr.msk.bf16.vlgmr.msra.gmra.mrb[56].mxu1 %vm296_vm11, %v3775_v21  ;;  %v9694_v21 = vcombine.low %v9627_v60, %v9635_v39  ;;  %v9683_v60 = vld [vmem:[%s15697_s8 + $0x3c8] sm:$0xff]  ;;  %v9636_v39 = vld [vmem:[%s15697_s8 + $0x250] sm:$0xff] }
 0xe6e   :  { %4450 = vmatprep.mubr.bf16.mxu1 %v15712_v2  ;;  %4375 = vmatprep.subr.bf16.mxu0 %v9693_v47  ;;  %v9628_v47 = vld [vmem:[%s15697_s8 + $0x210] sm:$0xff] }
 0xe6f   :  { %4418 = vmatprep.subr.bf16.mxu1 %v9695_v13  ;;  %4376 = vmatpush1.bf16.msra.mxu0 %v9692_v57  ;;  %v9696_v13 = vcombine.low %v9628_v47, %v9636_v39 }
 0xe70   :  { %4419 = vmatpush1.bf16.msra.mxu1 %v9694_v21 }
 0xf40   :  { %v3851_v9 = vpop.f32.mrb[56].mxu1 }
 0xf41   :  { %v3852_v11 = vadd.f32 %v9618_v1, %v3851_v9  ;;  %v11641_v22 = vpop.f32.mrb[57].mxu1  ;;  %v9650_v9 = vld [vmem:[%s15697_s8 + $0x2c0] sm:$0xff] }
 0xf42   :  { %v3854_v33 = vpop.f32.mrb[58].mxu1 }
 0xf43   :  { %v3855_v5 = vadd.f32 %v9618_v1, %v3854_v33  ;;  %v11642_v10 = vpop.f32.mrb[59].mxu1  ;;  %v3858_v6 = vadd.f32 %v3852_v11, %v13855_v43  ;;  %v9642_v1 = vld [vmem:[%s15697_s8 + $0x280] sm:$0xff]  ;;  %v9643_v11 = vld [vmem:[%s15697_s8 + $0x288] sm:$0xff] }
 0xf44   :  { %v9709_v22 = vcombine.high %v9642_v1, %v9650_v9  ;;  %v9651_v33 = vld [vmem:[%s15697_s8 + $0x2c8] sm:$0xff] }
 0xf45   :  { %v3860_v7 = vsel %vm296_vm11, %v3858_v6, 0.0  ;;  %v3859_v40 = vadd.f32 %v3855_v5, %v13857_v0  ;;  %v9708_v5 = vcombine.low %v9642_v1, %v9650_v9  ;;  %v9710_v10 = vcombine.low %v9643_v11, %v9651_v33  ;;  %v9629_v9 = vld [vmem:[%s15697_s8 + $0x218] sm:$0xff] }
 0xf46   :  { %3861 = vadd.xlane.f32.xlu0 %v3860_v7  ;;  %4377 = vmatprep.subr.bf16.mxu0 %v9709_v22  ;;  %v9658_v7 = vld [vmem:[%s15697_s8 + $0x300] sm:$0xff]  ;;  %v9697_v1 = vcombine.high %v9628_v47, %v9636_v39 }
 0xf47   :  { %v3863_v45 = vsel %vm296_vm11, %v3859_v40, 0.0  ;;  %4378 = vmatpush1.bf16.msra.mxu0 %v9708_v5 }
 0xf4a   :  { %3864 = vadd.xlane.f32.xlu0 %v3863_v45  ;;  %v9659_v45 = vld [vmem:[%s15697_s8 + $0x308] sm:$0xff] }
 0xfd3   :  { %v3862_v34 = vpop.xlane.xlu0 %3861 }
 0xfd4   :  { %v3866_v38 = vmul.f32 0.015625, %v3862_v34 }
 0xfd6   :  { %v14042_v61 = vsub.f32 %v3858_v6, %v3866_v38  ;;  %v9711_v6 = vcombine.high %v9643_v11, %v9651_v33  ;;  %v9667_v38 = vld [vmem:[%s15697_s8 + $0x348] sm:$0xff]  ;;  %v9637_v11 = vld [vmem:[%s15697_s8 + $0x258] sm:$0xff] }
 0xfd7   :  { %v3865_v31 = vpop.xlane.xlu0 %3864  ;;  %v9698_v22 = vcombine.low %v9629_v9, %v9637_v11  ;;  %v9699_v33 = vcombine.high %v9629_v9, %v9637_v11  ;;  %v9668_v9 = vld [vmem:[%s15697_s8 + $0x350] sm:$0xff]  ;;  %v9661_v11 = vld [vmem:[%s15697_s8 + $0x318] sm:$0xff] }
 0xfd8   :  { %v3867_v14 = vmul.f32 0.015625, %v3865_v31  ;;  %v3870_v55 = vmul.f32 %v14042_v61, %v14042_v61  ;;  %4420 = vmatprep.subr.bf16.mxu1 %v9711_v6 }
 0xfd9   :  { %4421 = vmatpush1.bf16.msra.mxu1 %v9710_v10 }
 0xfda   :  { %v14046_v16 = vsub.f32 %v3859_v40, %v3867_v14  ;;  %v3872_v43 = vsel %vm296_vm11, %v3870_v55, 0.0  ;;  %v9666_v40 = vld [vmem:[%s15697_s8 + $0x340] sm:$0xff]  ;;  %v9726_v14 = vcombine.low %v9659_v45, %v9667_v38  ;;  %v9727_v55 = vcombine.high %v9659_v45, %v9667_v38 }
 0xfdb   :  { %3873 = vadd.xlane.f32.xlu1 %v3872_v43  ;;  %v9725_v34 = vcombine.high %v9658_v7, %v9666_v40  ;;  %v9724_v31 = vcombine.low %v9658_v7, %v9666_v40  ;;  %v9674_v43 = vld [vmem:[%s15697_s8 + $0x380] sm:$0xff] }
 0xfdc   :  { %v3871_v0 = vmul.f32 %v14046_v16, %v14046_v16  ;;  %4422 = vmatprep.subr.bf16.mxu1 %v9727_v55 }
 0xfdd   :  { %4379 = vmatprep.subr.bf16.mxu0 %v9725_v34  ;;  %4423 = vmatpush1.bf16.msra.mxu1 %v9726_v14 }
 0xfde   :  { %v3875_v26 = vsel %vm296_vm11, %v3871_v0, 0.0  ;;  %v9682_v0 = vld [vmem:[%s15697_s8 + $0x3c0] sm:$0xff]  ;;  %4380 = vmatpush1.bf16.msra.mxu0 %v9724_v31 }
 0xfdf   :  { %3876 = vadd.xlane.f32.xlu0 %v3875_v26  ;;  %v9675_v26 = vld [vmem:[%s15697_s8 + $0x388] sm:$0xff]  ;;  %v9740_v32 = vcombine.low %v9674_v43, %v9682_v0  ;;  %v9741_v58 = vcombine.high %v9674_v43, %v9682_v0  ;;  %v9624_v31 = vld [vmem:[%s15695_s6 + $0x1] ss:$0 sm:$0xff] }
 0xfe0   :  { %v9742_v57 = vcombine.low %v9675_v26, %v9683_v60  ;;  %v9743_v21 = vcombine.high %v9675_v26, %v9683_v60  ;;  %v9625_v0 = vld [vmem:[%s15696_s7 + $0x1] ss:$0 sm:$0xff] }
 0xfe1   :  { %4381 = vmatprep.subr.bf16.mxu0 %v9741_v58  ;;  %v9645_v58 = vld [vmem:[%s15697_s8 + $0x298] sm:$0xff] }
 0xfe2   :  { %4424 = vmatprep.subr.bf16.mxu1 %v9743_v21  ;;  %4382 = vmatpush1.bf16.msra.mxu0 %v9740_v32  ;;  %v9644_v32 = vld [vmem:[%s15697_s8 + $0x290] sm:$0xff] }
 0xfe3   :  { %4425 = vmatpush1.bf16.msra.mxu1 %v9742_v57  ;;  %4461 = vmatprep.subr.bf16.mxu0 %v9697_v1  ;;  %v9660_v1 = vld [vmem:[%s15697_s8 + $0x310] sm:$0xff] }
 0xfe4   :  { %4504 = vmatprep.subr.bf16.mxu1 %v9699_v33  ;;  %v9669_v33 = vld [vmem:[%s15697_s8 + $0x358] sm:$0xff] }
0x1068   :  { %v3874_v5 = vpop.xlane.xlu1 %3873 }
0x1069   :  { %v3878_v10 = vmul.f32 0.015625, %v3874_v5 }
0x106b   :  { %v3880_v6 = vadd.f32 1e-05, %v3878_v10 }
0x106c   :  { %v3877_v7 = vpop.xlane.xlu0 %3876 }
0x106d   :  { %12549 = vrsqrt.f32 %v3880_v6  ;;  %v3879_v40 = vmul.f32 0.015625, %v3877_v7  ;;  %v9729_v6 = vcombine.high %v9660_v1, %v9668_v9  ;;  %v9731_v7 = vcombine.high %v9661_v11, %v9669_v33 }
0x106f   :  { %v3881_v45 = vadd.f32 1e-05, %v3879_v40  ;;  %v9676_v40 = vld [vmem:[%s15697_s8 + $0x390] sm:$0xff] }
0x1071   :  { %12551 = vrsqrt.f32 %v3881_v45  ;;  %v9684_v45 = vld [vmem:[%s15697_s8 + $0x3d0] sm:$0xff] }
0x1077   :  { %v12550_v34 = vpop.eup %12549 }
0x1078   :  { %v3884_v38 = vmul.f32 %v12550_v34, %v14042_v61  ;;  %v9652_v61 = vld [vmem:[%s15697_s8 + $0x2d0] sm:$0xff]  ;;  %v9677_v34 = vld [vmem:[%s15697_s8 + $0x398] sm:$0xff] }
0x1079   :  { %v9713_v57 = vcombine.high %v9644_v32, %v9652_v61  ;;  %v9712_v5 = vcombine.low %v9644_v32, %v9652_v61  ;;  %v9744_v32 = vcombine.low %v9676_v40, %v9684_v45 }
0x107a   :  { %v3891_v55 = vmul.f32 %v9624_v31, %v3884_v38  ;;  %v9730_v38 = vcombine.low %v9661_v11, %v9669_v33 }
0x107b   :  { %v12552_v14 = vpop.eup %12551 }
0x107c   :  { %v3885_v43 = vmul.f32 %v12552_v14, %v14046_v16  ;;  %v9653_v16 = vld [vmem:[%s15697_s8 + $0x2d8] sm:$0xff]  ;;  %v14132_v60 = vadd.f32 %v9625_v0, %v3891_v55  ;;  %v9630_v55 = vld [vmem:[%s15697_s8 + $0x220] sm:$0xff] }
0x107d   :  { %v9715_v21 = vcombine.high %v9645_v58, %v9653_v16  ;;  %v9714_v10 = vcombine.low %v9645_v58, %v9653_v16 }
0x107e   :  { %v3892_v26 = vmul.f32 %v9624_v31, %v3885_v43  ;;  %v9745_v31 = vcombine.high %v9676_v40, %v9684_v45  ;;  %v9638_v43 = vld [vmem:[%s15697_s8 + $0x260] sm:$0xff]  ;;  %v9663_v40 = vld [vmem:[%s15697_s8 + $0x328] sm:$0xff] }
0x107f   :  { %v9701_v58 = vcombine.high %v9630_v55, %v9638_v43  ;;  %v9700_v11 = vcombine.low %v9630_v55, %v9638_v43  ;;  %v9671_v45 = vld [vmem:[%s15697_s8 + $0x368] sm:$0xff] }
0x1080   :  { %v14134_v47 = vadd.f32 %v9625_v0, %v3892_v26  ;;  %v9631_v0 = vld [vmem:[%s15697_s8 + $0x228] sm:$0xff] }
0x1081   :  { %v9639_v26 = vld [vmem:[%s15697_s8 + $0x268] sm:$0xff] }
0x1082   :  { %v14138_v39 = vpack.c.bf16 %v14134_v47, %v14132_v60  ;;  %v9703_v16 = vcombine.high %v9631_v0, %v9639_v26  ;;  %v9702_v33 = vcombine.low %v9631_v0, %v9639_v26  ;;  %v9679_v55 = vld [vmem:[%s15697_s8 + $0x3a8] sm:$0xff]  ;;  %v9734_v26 = vcombine.low %v9663_v40, %v9671_v45 }
0x1083   :  { %v9687_v43 = vld [vmem:[%s15697_s8 + $0x3e8] sm:$0xff] }
0x1084   :  { %9756 = vmatmul.mubr.msk.bf16.vlgmr.msra.gmra.mrb[52].mxu0 %vm296_vm11, %v14138_v39  ;;  %9757 = vmatmul.mubr.msk.bf16.vlgmr.msra.gmra.mrb[60].mxu1 %vm296_vm11, %v14138_v39 }
0x1085   :  { %4462 = vmatpush1.bf16.msra.mxu0 %v9696_v13  ;;  %4505 = vmatpush1.bf16.msra.mxu1 %v9698_v22  ;;  %v9685_v13 = vld [vmem:[%s15697_s8 + $0x3d8] sm:$0xff]  ;;  %v9728_v22 = vcombine.low %v9660_v1, %v9668_v9  ;;  %v9647_v1 = vld [vmem:[%s15697_s8 + $0x2a8] sm:$0xff] }
0x1086   :  { %4463 = vmatprep.subr.bf16.mxu0 %v9713_v57  ;;  %4506 = vmatprep.subr.bf16.mxu1 %v9715_v21  ;;  %v9747_v14 = vcombine.high %v9677_v34, %v9685_v13  ;;  %v9746_v61 = vcombine.low %v9677_v34, %v9685_v13  ;;  %v9646_v57 = vld [vmem:[%s15697_s8 + $0x2a0] sm:$0xff]  ;;  %v9655_v9 = vld [vmem:[%s15697_s8 + $0x2e8] sm:$0xff] }
0x1087   :  { %4493 = vmatprep.mubr.bf16.mxu0 %v15712_v2  ;;  %4536 = vmatprep.mubr.bf16.mxu1 %v15712_v2  ;;  %v9654_v21 = vld [vmem:[%s15697_s8 + $0x2e0] sm:$0xff]  ;;  %v9718_v13 = vcombine.low %v9647_v1, %v9655_v9 }
0x1088   :  { %v9716_v34 = vcombine.low %v9646_v57, %v9654_v21 }
0x1089   :  { %4464 = vmatpush1.bf16.msra.mxu0 %v9712_v5  ;;  %4507 = vmatpush1.bf16.msra.mxu1 %v9714_v10  ;;  %v9717_v5 = vcombine.high %v9646_v57, %v9654_v21  ;;  %v9719_v10 = vcombine.high %v9647_v1, %v9655_v9  ;;  %v9633_v57 = vld [vmem:[%s15697_s8 + $0x238] sm:$0xff]  ;;  %v9750_v9 = vcombine.low %v9679_v55, %v9687_v43 }
0x108a   :  { %4465 = vmatprep.subr.bf16.mxu0 %v9729_v6  ;;  %4508 = vmatprep.subr.bf16.mxu1 %v9731_v7  ;;  %v9662_v6 = vld [vmem:[%s15697_s8 + $0x320] sm:$0xff]  ;;  %v9641_v21 = vld [vmem:[%s15697_s8 + $0x278] sm:$0xff] }
0x108b   :  { %v9670_v7 = vld [vmem:[%s15697_s8 + $0x360] sm:$0xff] }
0x108c   :  { %v9732_v0 = vcombine.low %v9662_v6, %v9670_v7 }
0x108d   :  { %4466 = vmatpush1.bf16.msra.mxu0 %v9728_v22  ;;  %4509 = vmatpush1.bf16.msra.mxu1 %v9730_v38  ;;  %v9733_v22 = vcombine.high %v9662_v6, %v9670_v7  ;;  %v9735_v38 = vcombine.high %v9663_v40, %v9671_v45  ;;  %v9649_v6 = vld [vmem:[%s15697_s8 + $0x2b8] sm:$0xff]  ;;  %v9706_v45 = vcombine.low %v9633_v57, %v9641_v21 }
0x108e   :  { %4467 = vmatprep.subr.bf16.mxu0 %v9745_v31  ;;  %4510 = vmatprep.subr.bf16.mxu1 %v9747_v14  ;;  %v9678_v31 = vld [vmem:[%s15697_s8 + $0x3a0] sm:$0xff]  ;;  %v9657_v7 = vld [vmem:[%s15697_s8 + $0x2f8] sm:$0xff] }
0x108f   :  { %v9686_v14 = vld [vmem:[%s15697_s8 + $0x3e0] sm:$0xff] }
0x1090   :  { %v9748_v1 = vcombine.low %v9678_v31, %v9686_v14 }
0x1091   :  { %4468 = vmatpush1.bf16.msra.mxu0 %v9744_v32  ;;  %4511 = vmatpush1.bf16.msra.mxu1 %v9746_v61  ;;  %v9749_v32 = vcombine.high %v9678_v31, %v9686_v14  ;;  %v9751_v61 = vcombine.high %v9679_v55, %v9687_v43  ;;  %v9665_v31 = vld [vmem:[%s15697_s8 + $0x338] sm:$0xff]  ;;  %v9722_v43 = vcombine.low %v9649_v6, %v9657_v7 }
0x1092   :  { %4547 = vmatprep.subr.bf16.mxu0 %v9701_v58  ;;  %4590 = vmatprep.subr.bf16.mxu1 %v9703_v16  ;;  %v9632_v58 = vld [vmem:[%s15697_s8 + $0x230] sm:$0xff]  ;;  %v9673_v14 = vld [vmem:[%s15697_s8 + $0x378] sm:$0xff] }
0x1093   :  { %v9640_v16 = vld [vmem:[%s15697_s8 + $0x270] sm:$0xff] }
0x1094   :  { %9758 = vmatmul.mubr.msk.bf16.vlgmr.msra.gmra.mrb[56].mxu0 %vm296_vm11, %v14138_v39  ;;  %9759 = vmatmul.mubr.msk.bf16.vlgmr.msra.gmra.mrb[64].mxu1 %vm296_vm11, %v14138_v39  ;;  %v9704_v40 = vcombine.low %v9632_v58, %v9640_v16 }
0x1095   :  { %4548 = vmatpush1.bf16.msra.mxu0 %v9700_v11  ;;  %4591 = vmatpush1.bf16.msra.mxu1 %v9702_v33  ;;  %v9705_v11 = vcombine.high %v9632_v58, %v9640_v16  ;;  %v9707_v33 = vcombine.high %v9633_v57, %v9641_v21  ;;  %v9681_v58 = vld [vmem:[%s15697_s8 + $0x3b8] sm:$0xff]  ;;  %v9738_v21 = vcombine.low %v9665_v31, %v9673_v14 }
0x1096   :  { %4549 = vmatprep.subr.bf16.mxu0 %v9717_v5  ;;  %4592 = vmatprep.subr.bf16.mxu1 %v9719_v10  ;;  %v9648_v5 = vld [vmem:[%s15697_s8 + $0x2b0] sm:$0xff]  ;;  %v9689_v16 = vld [vmem:[%s15697_s8 + $0x3f8] sm:$0xff] }
0x1097   :  { %4579 = vmatprep.mubr.bf16.mxu0 %v15712_v2  ;;  %4622 = vmatprep.mubr.bf16.mxu1 %v15712_v2  ;;  %v9656_v10 = vld [vmem:[%s15697_s8 + $0x2f0] sm:$0xff] }
0x1098   :  { %v9720_v55 = vcombine.low %v9648_v5, %v9656_v10 }
0x1099   :  { %4550 = vmatpush1.bf16.msra.mxu0 %v9716_v34  ;;  %4593 = vmatpush1.bf16.msra.mxu1 %v9718_v13  ;;  %v9721_v34 = vcombine.high %v9648_v5, %v9656_v10  ;;  %v9723_v13 = vcombine.high %v9649_v6, %v9657_v7  ;;  %v12253_v5 = vld [vmem:[%s15699_s10 + $0x440] sm:$0xff]  }
0x109a   :  { %4551 = vmatprep.subr.bf16.mxu0 %v9733_v22  ;;  %4594 = vmatprep.subr.bf16.mxu1 %v9735_v38  ;;  %v9664_v22 = vld [vmem:[%s15697_s8 + $0x330] sm:$0xff]  ;;  %v12254_v10 = vld [vmem:[%s15699_s10 + $0x4c0] sm:$0xff]  }
0x109b   :  { %v9672_v38 = vld [vmem:[%s15697_s8 + $0x370] sm:$0xff]  ;;  %v12255_v6 = vld [vmem:[%s15699_s10 + $0x400] sm:$0xff]  }
0x109c   :  { %v9736_v57 = vcombine.low %v9664_v22, %v9672_v38  ;;  %v12256_v7 = vld [vmem:[%s15699_s10 + $0x480] sm:$0xff]  }
0x109d   :  { %4552 = vmatpush1.bf16.msra.mxu0 %v9732_v0  ;;  %4595 = vmatpush1.bf16.msra.mxu1 %v9734_v26  ;;  %v9737_v0 = vcombine.high %v9664_v22, %v9672_v38  ;;  %v9739_v26 = vcombine.high %v9665_v31, %v9673_v14  ;;  %v12261_v22 = vld [vmem:[%s15699_s10 + $0x450] sm:$0xff]   ;;  %v12265_v14 = vld [vmem:[%s15699_s10 + $0x458] sm:$0xff]  }
0x109e   :  { %4553 = vmatprep.subr.bf16.mxu0 %v9749_v32  ;;  %4596 = vmatprep.subr.bf16.mxu1 %v9751_v61  ;;  %v9680_v32 = vld [vmem:[%s15697_s8 + $0x3b0] sm:$0xff] }
0x109f   :  { %v9688_v61 = vld [vmem:[%s15697_s8 + $0x3f0] sm:$0xff] }
0x10a0   :  { %v12263_v38 = vld [vmem:[%s15699_s10 + $0x410] sm:$0xff]  }
0x10a1   :  { %4554 = vmatpush1.bf16.msra.mxu0 %v9748_v1  ;;  %4597 = vmatpush1.bf16.msra.mxu1 %v9750_v9  ;;  %v9753_v1 = vcombine.high %v9680_v32, %v9688_v61  ;;  %v9755_v9 = vcombine.high %v9681_v58, %v9689_v16  ;;  %v12264_v31 = vld [vmem:[%s15699_s10 + $0x490] sm:$0xff]  }
0x10a2   :  { %4633 = vmatprep.subr.bf16.mxu0 %v9705_v11  ;;  %4676 = vmatprep.subr.bf16.mxu1 %v9707_v33  ;;  %v9752_v11 = vcombine.low %v9680_v32, %v9688_v61  ;;  %v9754_v33 = vcombine.low %v9681_v58, %v9689_v16  ;;  %v12270_v32 = vld [vmem:[%s15699_s10 + $0x4e0] sm:$0xff]   ;;  %v12273_v16 = vld [vmem:[%s15699_s10 + $0x468] sm:$0xff]  }
0x10a3   :  { %v12271_v61 = vld [vmem:[%s15699_s10 + $0x420] sm:$0xff]  }
0x10a4   :  { %9760 = vmatmul.mubr.msk.bf16.vlgmr.msra.gmra.mrb[60].mxu0 %vm296_vm11, %v14138_v39  ;;  %9761 = vmatmul.mubr.msk.bf16.vlgmr.msra.gmra.mrb[68].mxu1 %vm296_vm11, %v14138_v39  ;;  %v12272_v58 = vld [vmem:[%s15699_s10 + $0x4a0] sm:$0xff]  }
0x10a5   :  { %4634 = vmatpush1.bf16.msra.mxu0 %v9704_v40  ;;  %4677 = vmatpush1.bf16.msra.mxu1 %v9706_v45  ;;  %v12257_v40 = vld [vmem:[%s15699_s10 + $0x448] sm:$0xff]  }
0x10a6   :  { %4635 = vmatprep.subr.bf16.mxu0 %v9721_v34  ;;  %4678 = vmatprep.subr.bf16.mxu1 %v9723_v13  ;;  %v12258_v45 = vld [vmem:[%s15699_s10 + $0x4c8] sm:$0xff]  }
0x10a7   :  { %4665 = vmatprep.mubr.bf16.mxu0 %v15712_v2  ;;  %4708 = vmatprep.mubr.bf16.mxu1 %v15712_v2  ;;  %v12259_v34 = vld [vmem:[%s15699_s10 + $0x408] sm:$0xff]  }
0x10a8   :  { %v12260_v13 = vld [vmem:[%s15699_s10 + $0x488] sm:$0xff]  }
0x10a9   :  { %4636 = vmatpush1.bf16.msra.mxu0 %v9720_v55  ;;  %4679 = vmatpush1.bf16.msra.mxu1 %v9722_v43  ;;  %v12266_v55 = vld [vmem:[%s15699_s10 + $0x4d8] sm:$0xff]  }
0x10aa   :  { %4637 = vmatprep.subr.bf16.mxu0 %v9737_v0  ;;  %4680 = vmatprep.subr.bf16.mxu1 %v9739_v26  ;;  %v12267_v43 = vld [vmem:[%s15699_s10 + $0x418] sm:$0xff]   ;;  %v12269_v26 = vld [vmem:[%s15699_s10 + $0x460] sm:$0xff]  }
0x10ab   :  { %v12268_v0 = vld [vmem:[%s15699_s10 + $0x498] sm:$0xff]  }
0x10ad   :  { %4638 = vmatpush1.bf16.msra.mxu0 %v9736_v57  ;;  %4681 = vmatpush1.bf16.msra.mxu1 %v9738_v21  ;;  %v12274_v57 = vld [vmem:[%s15699_s10 + $0x4e8] sm:$0xff]  }
0x10ae   :  { %4639 = vmatprep.subr.bf16.mxu0 %v9753_v1  ;;  %4682 = vmatprep.subr.bf16.mxu1 %v9755_v9  ;;  %v12275_v21 = vld [vmem:[%s15699_s10 + $0x428] sm:$0xff]   ;;  %v12277_v9 = vld [vmem:[%s15699_s10 + $0x470] sm:$0xff]  }
0x10af   :  { %v12276_v1 = vld [vmem:[%s15699_s10 + $0x4a8] sm:$0xff]  }
0x10b1   :  { %4640 = vmatpush1.bf16.msra.mxu0 %v9752_v11  ;;  %4683 = vmatpush1.bf16.msra.mxu1 %v9754_v33  ;;  %v12278_v11 = vld [vmem:[%s15699_s10 + $0x4f0] sm:$0xff]  }
0x10b2   :  { %11021 = vmatprep.subr.bf16.mxu0 %v12253_v5  ;;  %11043 = vmatprep.subr.bf16.mxu1 %v12254_v10  ;;  %v12279_v33 = vld [vmem:[%s15699_s10 + $0x430] sm:$0xff]   ;;  %v12281_v10 = vld [vmem:[%s15699_s10 + $0x478] sm:$0xff]  }
0x10b3   :  { %v12280_v5 = vld [vmem:[%s15699_s10 + $0x4b0] sm:$0xff]  }
0x10b4   :  { %9762 = vmatmul.mubr.msk.bf16.vlgmr.msra.gmra.mrb[64].mxu0 %vm296_vm11, %v14138_v39  ;;  %9763 = vmatmul.mubr.msk.bf16.vlgmr.msra.gmra.mrb[72].mxu1 %vm296_vm11, %v14138_v39  ;;  %v12262_v39 = vld [vmem:[%s15699_s10 + $0x4d0] sm:$0xff]  }
0x10b5   :  { %11022 = vmatpush3.bf16.msra.mxu0 %v12255_v6  ;;  %11044 = vmatpush3.bf16.msra.mxu1 %v12256_v7  ;;  %v12282_v6 = vld [vmem:[%s15699_s10 + $0x4f8] sm:$0xff]  }
0x10b6   :  { %11023 = vmatprep.subr.bf16.mxu0 %v12257_v40  ;;  %11045 = vmatprep.subr.bf16.mxu1 %v12258_v45  ;;  %v12283_v7 = vld [vmem:[%s15699_s10 + $0x438] sm:$0xff]   ;;  %v12285_v45 = vld [vmem:[%s15699_s10 + $0x540] sm:$0xff]  }
0x10b7   :  { %v12284_v40 = vld [vmem:[%s15699_s10 + $0x4b8] sm:$0xff]  }
0x10b9   :  { %11024 = vmatpush3.bf16.msra.mxu0 %v12259_v34  ;;  %11046 = vmatpush3.bf16.msra.mxu1 %v12260_v13  ;;  %v12286_v34 = vld [vmem:[%s15699_s10 + $0x5c0] sm:$0xff]  }
0x10ba   :  { %11025 = vmatprep.subr.bf16.mxu0 %v12261_v22  ;;  %11047 = vmatprep.subr.bf16.mxu1 %v12262_v39  ;;  %v9690_v13 = vld [vmem:[%s15698_s9 + $0x1] ss:$4 sm:$0xff] }
0x10bb   :  { %v3975_v22 = vrot.slane %v9690_v13, %v12876_v46  ;;  %v3983_v39 = vrot.slane %v9690_v13, %v13462_v27 }
0x10bd   :  { %11026 = vmatpush3.bf16.msra.mxu0 %v12263_v38  ;;  %11048 = vmatpush3.bf16.msra.mxu1 %v12264_v31  ;;  %v3979_v38 = vrot.slane %v9690_v13, %v12883_v49  ;;  %v3987_v31 = vrot.slane %v9690_v13, %v13468_v59 }
0x10be   :  { %11027 = vmatprep.subr.bf16.mxu0 %v12265_v14  ;;  %11049 = vmatprep.subr.bf16.mxu1 %v12266_v55 }
0x10c1   :  { %11028 = vmatpush3.bf16.msra.mxu0 %v12267_v43  ;;  %11050 = vmatpush3.bf16.msra.mxu1 %v12268_v0 }
0x10c2   :  { %11029 = vmatprep.subr.bf16.mxu0 %v12269_v26  ;;  %11051 = vmatprep.subr.bf16.mxu1 %v12270_v32 }
0x10c5   :  { %11030 = vmatpush3.bf16.msra.mxu0 %v12271_v61  ;;  %11052 = vmatpush3.bf16.msra.mxu1 %v12272_v58 }
0x10c6   :  { %11031 = vmatprep.subr.bf16.mxu0 %v12273_v16  ;;  %11053 = vmatprep.subr.bf16.mxu1 %v12274_v57 }
0x10c9   :  { %11032 = vmatpush3.bf16.msra.mxu0 %v12275_v21  ;;  %11054 = vmatpush3.bf16.msra.mxu1 %v12276_v1 }
0x10ca   :  { %11033 = vmatprep.subr.bf16.mxu0 %v12277_v9  ;;  %11055 = vmatprep.subr.bf16.mxu1 %v12278_v11 }
0x10cd   :  { %11034 = vmatpush3.bf16.msra.mxu0 %v12279_v33  ;;  %11056 = vmatpush3.bf16.msra.mxu1 %v12280_v5 }
0x10ce   :  { %11035 = vmatprep.subr.bf16.mxu0 %v12281_v10  ;;  %11057 = vmatprep.subr.bf16.mxu1 %v12282_v6 }
0x10d1   :  { %11036 = vmatpush3.bf16.msra.mxu0 %v12283_v7  ;;  %11058 = vmatpush3.bf16.msra.mxu1 %v12284_v40 }
0x10d2   :  { %11065 = vmatprep.subr.bf16.mxu0 %v12285_v45  ;;  %11087 = vmatprep.subr.bf16.mxu1 %v12286_v34 }
0x1157   :  { %v4409_v14 = vpop.f32.mrb[52].mxu0  ;;  %v4452_v55 = vpop.f32.mrb[60].mxu1 }
0x1158   :  { %v4410_v43 = vadd.f32 %v4409_v14, %v3975_v22  ;;  %v4453_v0 = vadd.f32 %v4452_v55, %v3983_v39  ;;  %v4411_v26 = vpop.f32.mrb[53].mxu0  ;;  %v4454_v32 = vpop.f32.mrb[61].mxu1 }
0x1159   :  { %v4412_v61 = vadd.f32 %v4411_v26, %v3979_v38  ;;  %v4455_v58 = vadd.f32 %v4454_v32, %v3987_v31  ;;  %v4413_v16 = vpop.f32.mrb[54].mxu0  ;;  %v4456_v57 = vpop.f32.mrb[62].mxu1 }
0x115a   :  { %v4414_v21 = vadd.f32 %v4413_v16, %v3975_v22  ;;  %v4457_v1 = vadd.f32 %v4456_v57, %v3983_v39  ;;  %v4415_v9 = vpop.f32.mrb[55].mxu0  ;;  %v4458_v11 = vpop.f32.mrb[63].mxu1  ;;  %v4719_v10 = vmax.f32 %v4410_v43, 0.0  ;;  %v4721_v6 = vmax.f32 %v4453_v0, 0.0  ;;  %v12287_v22 = vld [vmem:[%s15699_s10 + $0x500] sm:$0xff]   ;;  %v12291_v43 = vld [vmem:[%s15699_s10 + $0x508] sm:$0xff]  }
0x115b   :  { %v4416_v33 = vadd.f32 %v4415_v9, %v3979_v38  ;;  %v4459_v5 = vadd.f32 %v4458_v11, %v3987_v31  ;;  %v4720_v45 = vmax.f32 %v4412_v61, 0.0  ;;  %v4722_v34 = vmax.f32 %v4455_v58, 0.0  ;;  %v12288_v39 = vld [vmem:[%s15699_s10 + $0x580] sm:$0xff]   ;;  %v12289_v38 = vld [vmem:[%s15699_s10 + $0x548] sm:$0xff]   ;;  %v12295_v9 = vld [vmem:[%s15699_s10 + $0x510] sm:$0xff]  }
0x115c   :  { %v4735_v7 = vmax.f32 %v4414_v21, 0.0  ;;  %v4737_v40 = vmax.f32 %v4457_v1, 0.0  ;;  %v12290_v31 = vld [vmem:[%s15699_s10 + $0x5c8] sm:$0xff]   ;;  %v3991_v61 = vrot.slane %v9690_v13, %v13487_v62  ;;  %v3999_v58 = vrot.slane %v9690_v13, %v13490_v42  ;;  %v12296_v11 = vld [vmem:[%s15699_s10 + $0x590] sm:$0xff]  }
0x115d   :  { %v4736_v14 = vmax.f32 %v4416_v33, 0.0  ;;  %v4738_v55 = vmax.f32 %v4459_v5, 0.0  ;;  %v12292_v0 = vld [vmem:[%s15699_s10 + $0x588] sm:$0xff]   ;;  %v3995_v16 = vrot.slane %v9690_v13, %v13493_v48  ;;  %v4003_v57 = vrot.slane %v9690_v13, %v13496_v52  ;;  %v12297_v13 = vld [vmem:[%s15699_s10 + $0x558] sm:$0xff]  }
0x115e   :  { %v4751_v2 = vpack.c.bf16 %v4735_v7, %v4719_v10  ;;  %v4753_v53 = vpack.c.bf16 %v4737_v40, %v4721_v6  ;;  %v12298_v7 = vld [vmem:[%s15699_s10 + $0x5d8] sm:$0xff]  }
0x115f   :  { %v4752_v26 = vpack.c.bf16 %v4736_v14, %v4720_v45  ;;  %v4754_v32 = vpack.c.bf16 %v4738_v55, %v4722_v34 }
0x1161   :  { %5829 = vmatprep.mubr.bf16.mxu0 %v4752_v26  ;;  %5870 = vmatprep.mubr.bf16.mxu1 %v4754_v32 }
0x1162   :  { %5830 = vmatmul.mubr.bf16.vlgmr.msra.gmra.mrb[68].mxu0 %v4751_v2  ;;  %5871 = vmatmul.mubr.bf16.vlgmr.msra.gmra.mrb[76].mxu1 %v4753_v53  ;;  %v12293_v2 = vld [vmem:[%s15699_s10 + $0x550] sm:$0xff]  }
0x1163   :  { %11066 = vmatpush3.bf16.msra.mxu0 %v12287_v22  ;;  %11088 = vmatpush3.bf16.msra.mxu1 %v12288_v39  ;;  %v12294_v53 = vld [vmem:[%s15699_s10 + $0x5d0] sm:$0xff]  }
0x1164   :  { %11067 = vmatprep.subr.bf16.mxu0 %v12289_v38  ;;  %11089 = vmatprep.subr.bf16.mxu1 %v12290_v31  ;;  %v12299_v31 = vld [vmem:[%s15699_s10 + $0x518] sm:$0xff]  }
0x1167   :  { %v4495_v21 = vpop.f32.mrb[56].mxu0  ;;  %v4538_v1 = vpop.f32.mrb[64].mxu1  ;;  %11068 = vmatpush3.bf16.msra.mxu0 %v12291_v43  ;;  %11090 = vmatpush3.bf16.msra.mxu1 %v12292_v0  ;;  %v12300_v43 = vld [vmem:[%s15699_s10 + $0x598] sm:$0xff]  }
0x1168   :  { %v4496_v33 = vadd.f32 %v4495_v21, %v3991_v61  ;;  %v4539_v5 = vadd.f32 %v4538_v1, %v3999_v58  ;;  %v4497_v10 = vpop.f32.mrb[57].mxu0  ;;  %v4540_v6 = vpop.f32.mrb[65].mxu1  ;;  %11069 = vmatprep.subr.bf16.mxu0 %v12293_v2  ;;  %11091 = vmatprep.subr.bf16.mxu1 %v12294_v53 }
0x1169   :  { %v4498_v40 = vadd.f32 %v4497_v10, %v3995_v16  ;;  %v4541_v45 = vadd.f32 %v4540_v6, %v4003_v57  ;;  %v4499_v34 = vpop.f32.mrb[58].mxu0  ;;  %v4542_v14 = vpop.f32.mrb[66].mxu1  ;;  %v12303_v6 = vld [vmem:[%s15699_s10 + $0x520] sm:$0xff]  }
0x116a   :  { %v4500_v55 = vadd.f32 %v4499_v34, %v3991_v61  ;;  %v4543_v26 = vadd.f32 %v4542_v14, %v3999_v58  ;;  %v4501_v32 = vpop.f32.mrb[59].mxu0  ;;  %v4544_v22 = vpop.f32.mrb[67].mxu1  ;;  %v4723_v0 = vmax.f32 %v4496_v33, 0.0  ;;  %v4725_v2 = vmax.f32 %v4539_v5, 0.0  ;;  %v12301_v61 = vld [vmem:[%s15699_s10 + $0x560] sm:$0xff]   ;;  %v12307_v34 = vld [vmem:[%s15699_s10 + $0x528] sm:$0xff]  }
0x116b   :  { %v4502_v39 = vadd.f32 %v4501_v32, %v3995_v16  ;;  %v4545_v38 = vadd.f32 %v4544_v22, %v4003_v57  ;;  %11070 = vmatpush3.bf16.msra.mxu0 %v12295_v9  ;;  %11092 = vmatpush3.bf16.msra.mxu1 %v12296_v11  ;;  %v12302_v58 = vld [vmem:[%s15699_s10 + $0x5e0] sm:$0xff]   ;;  %v4724_v16 = vmax.f32 %v4498_v40, 0.0  ;;  %v4726_v57 = vmax.f32 %v4541_v45, 0.0  ;;  %v12306_v40 = vld [vmem:[%s15699_s10 + $0x5e8] sm:$0xff]   ;;  %v12309_v32 = vld [vmem:[%s15699_s10 + $0x570] sm:$0xff]  }
0x116c   :  { %v4739_v53 = vmax.f32 %v4500_v55, 0.0  ;;  %v4741_v21 = vmax.f32 %v4543_v26, 0.0  ;;  %11071 = vmatprep.subr.bf16.mxu0 %v12297_v13  ;;  %11093 = vmatprep.subr.bf16.mxu1 %v12298_v7  ;;  %v12304_v13 = vld [vmem:[%s15699_s10 + $0x5a0] sm:$0xff]   ;;  %v12305_v7 = vld [vmem:[%s15699_s10 + $0x568] sm:$0xff]   ;;  %v12310_v22 = vld [vmem:[%s15699_s10 + $0x5f0] sm:$0xff]  }
0x116d   :  { %v4740_v1 = vmax.f32 %v4502_v39, 0.0  ;;  %v4742_v9 = vmax.f32 %v4545_v38, 0.0  ;;  %v14462_v45 = vld [vmem:[%s15698_s9 + $0x21] ss:$4 sm:$0xff] }
0x116e   :  { %v14443_v11 = vpack.c.bf16 %v4739_v53, %v4723_v0  ;;  %v14445_v33 = vpack.c.bf16 %v4741_v21, %v4725_v2  ;;  %v12308_v14 = vld [vmem:[%s15699_s10 + $0x5a8] sm:$0xff]   ;;  %v4007_v55 = vrot.slane %v14462_v45, %v12876_v46  ;;  %v4015_v26 = vrot.slane %v14462_v45, %v13462_v27  ;;  %v12311_v0 = vld [vmem:[%s15699_s10 + $0x530] sm:$0xff]  }
0x116f   :  { %v4756_v5 = vpack.c.bf16 %v4740_v1, %v4724_v16  ;;  %v4758_v10 = vpack.c.bf16 %v4742_v9, %v4726_v57  ;;  %11072 = vmatpush3.bf16.msra.mxu0 %v12299_v31  ;;  %11094 = vmatpush3.bf16.msra.mxu1 %v12300_v43  ;;  %v4011_v39 = vrot.slane %v14462_v45, %v12883_v49  ;;  %v12312_v2 = vld [vmem:[%s15699_s10 + $0x5b0] sm:$0xff]   ;;  %v12313_v16 = vld [vmem:[%s15699_s10 + $0x578] sm:$0xff]  }
0x1170   :  { %11073 = vmatprep.subr.bf16.mxu0 %v12301_v61  ;;  %11095 = vmatprep.subr.bf16.mxu1 %v12302_v58  ;;  %v4019_v38 = vrot.slane %v14462_v45, %v13468_v59  ;;  %v12314_v57 = vld [vmem:[%s15699_s10 + $0x5f8] sm:$0xff]  }
0x1171   :  { %5911 = vmatprep.mubr.bf16.mxu0 %v4756_v5  ;;  %5952 = vmatprep.mubr.bf16.mxu1 %v4758_v10 }
0x1173   :  { %11074 = vmatpush3.bf16.msra.mxu0 %v12303_v6  ;;  %11096 = vmatpush3.bf16.msra.mxu1 %v12304_v13 }
0x1174   :  { %11075 = vmatprep.subr.bf16.mxu0 %v12305_v7  ;;  %11097 = vmatprep.subr.bf16.mxu1 %v12306_v40 }
0x1177   :  { %v4581_v31 = vpop.f32.mrb[60].mxu0  ;;  %v4624_v43 = vpop.f32.mrb[68].mxu1  ;;  %11076 = vmatpush3.bf16.msra.mxu0 %v12307_v34  ;;  %11098 = vmatpush3.bf16.msra.mxu1 %v12308_v14 }
0x1178   :  { %v4582_v53 = vadd.f32 %v4581_v31, %v4007_v55  ;;  %v4625_v21 = vadd.f32 %v4624_v43, %v4015_v26  ;;  %v4583_v61 = vpop.f32.mrb[61].mxu0  ;;  %v4626_v58 = vpop.f32.mrb[69].mxu1  ;;  %11077 = vmatprep.subr.bf16.mxu0 %v12309_v32  ;;  %11099 = vmatprep.subr.bf16.mxu1 %v12310_v22  ;;  %v12315_v32 = vld [vmem:[%s15699_s10 + $0x538] sm:$0xff]  }
0x1179   :  { %v4584_v1 = vadd.f32 %v4583_v61, %v4011_v39  ;;  %v4627_v9 = vadd.f32 %v4626_v58, %v4019_v38  ;;  %v4585_v5 = vpop.f32.mrb[62].mxu0  ;;  %v4628_v10 = vpop.f32.mrb[70].mxu1  ;;  %v12316_v22 = vld [vmem:[%s15699_s10 + $0x5b8] sm:$0xff]  }
0x117a   :  { %v4586_v6 = vadd.f32 %v4585_v5, %v4007_v55  ;;  %v4629_v13 = vadd.f32 %v4628_v10, %v4015_v26  ;;  %v4587_v7 = vpop.f32.mrb[63].mxu0  ;;  %v4630_v40 = vpop.f32.mrb[71].mxu1  ;;  %v4727_v31 = vmax.f32 %v4582_v53, 0.0  ;;  %v4729_v43 = vmax.f32 %v4625_v21, 0.0  ;;  %v12317_v55 = vld [vmem:[%s15699_s10 + $0x640] sm:$0xff]  }
0x117b   :  { %v4588_v34 = vadd.f32 %v4587_v7, %v4011_v39  ;;  %v4631_v14 = vadd.f32 %v4630_v40, %v4019_v38  ;;  %11078 = vmatpush3.bf16.msra.mxu0 %v12311_v0  ;;  %11100 = vmatpush3.bf16.msra.mxu1 %v12312_v2  ;;  %v12318_v26 = vld [vmem:[%s15699_s10 + $0x6c0] sm:$0xff]   ;;  %v4728_v39 = vmax.f32 %v4584_v1, 0.0  ;;  %v4730_v38 = vmax.f32 %v4627_v9, 0.0  ;;  %v12321_v1 = vld [vmem:[%s15699_s10 + $0x648] sm:$0xff]  }
0x117c   :  { %v4743_v61 = vmax.f32 %v4586_v6, 0.0  ;;  %v4745_v58 = vmax.f32 %v4629_v13, 0.0  ;;  %11079 = vmatprep.subr.bf16.mxu0 %v12313_v16  ;;  %11101 = vmatprep.subr.bf16.mxu1 %v12314_v57  ;;  %v12319_v16 = vld [vmem:[%s15699_s10 + $0x600] sm:$0xff]   ;;  %v12322_v9 = vld [vmem:[%s15699_s10 + $0x6c8] sm:$0xff]   ;;  %v4023_v13 = vrot.slane %v14462_v45, %v13487_v62  ;;  %v4031_v7 = vrot.slane %v14462_v45, %v13490_v42 }
0x117d   :  { %v4744_v0 = vmax.f32 %v4588_v34, 0.0  ;;  %v4746_v2 = vmax.f32 %v4631_v14, 0.0  ;;  %v12320_v57 = vld [vmem:[%s15699_s10 + $0x680] sm:$0xff]   ;;  %v12323_v6 = vld [vmem:[%s15699_s10 + $0x608] sm:$0xff]   ;;  %v4027_v40 = vrot.slane %v14462_v45, %v13493_v48  ;;  %v4035_v34 = vrot.slane %v14462_v45, %v13496_v52  ;;  %v12326_v14 = vld [vmem:[%s15699_s10 + $0x6d0] sm:$0xff]  }
0x117e   :  { %v14508_v5 = vpack.c.bf16 %v4743_v61, %v4727_v31  ;;  %v14510_v53 = vpack.c.bf16 %v4745_v58, %v4729_v43  ;;  %v12327_v31 = vld [vmem:[%s15699_s10 + $0x610] sm:$0xff]  }
0x117f   :  { %v4760_v21 = vpack.c.bf16 %v4744_v0, %v4728_v39  ;;  %v4762_v10 = vpack.c.bf16 %v4746_v2, %v4730_v38  ;;  %11080 = vmatpush3.bf16.msra.mxu0 %v12315_v32  ;;  %11102 = vmatpush3.bf16.msra.mxu1 %v12316_v22  ;;  %v12328_v45 = vld [vmem:[%s15699_s10 + $0x690] sm:$0xff]  }
0x1180   :  { %11109 = vmatprep.subr.bf16.mxu0 %v12317_v55  ;;  %11131 = vmatprep.subr.bf16.mxu1 %v12318_v26  ;;  %v12329_v26 = vld [vmem:[%s15699_s10 + $0x658] sm:$0xff]  }
0x1182   :  { %5912 = vmatmul.mubr.bf16.vlgmr.msra.gmra.mrb[72].mxu0 %v14443_v11  ;;  %5953 = vmatmul.mubr.bf16.vlgmr.msra.gmra.mrb[80].mxu1 %v14445_v33  ;;  %v12324_v11 = vld [vmem:[%s15699_s10 + $0x688] sm:$0xff]   ;;  %v12325_v33 = vld [vmem:[%s15699_s10 + $0x650] sm:$0xff]  }
0x1183   :  { %11110 = vmatpush3.bf16.msra.mxu0 %v12319_v16  ;;  %5993 = vmatprep.mubr.bf16.mxu0 %v4760_v21  ;;  %v12330_v21 = vld [vmem:[%s15699_s10 + $0x6d8] sm:$0xff]  }
0x1184   :  { %11132 = vmatpush3.bf16.msra.mxu1 %v12320_v57  ;;  %6034 = vmatprep.mubr.bf16.mxu1 %v4762_v10 }
0x1185   :  { %11111 = vmatprep.subr.bf16.mxu0 %v12321_v1  ;;  %11133 = vmatprep.subr.bf16.mxu1 %v12322_v9 }
0x1187   :  { %v4667_v32 = vpop.f32.mrb[64].mxu0  ;;  %v4710_v22 = vpop.f32.mrb[72].mxu1  ;;  %11112 = vmatpush3.bf16.msra.mxu0 %v12323_v6 }
0x1188   :  { %v4668_v43 = vadd.f32 %v4667_v32, %v4023_v13  ;;  %v4711_v61 = vadd.f32 %v4710_v22, %v4031_v7  ;;  %11134 = vmatpush3.bf16.msra.mxu1 %v12324_v11  ;;  %v4669_v58 = vpop.f32.mrb[65].mxu0  ;;  %v4712_v55 = vpop.f32.mrb[73].mxu1  ;;  %11113 = vmatprep.subr.bf16.mxu0 %v12325_v33  ;;  %v12331_v11 = vld [vmem:[%s15699_s10 + $0x618] sm:$0xff]  }
0x1189   :  { %v4670_v39 = vadd.f32 %v4669_v58, %v4027_v40  ;;  %v4713_v38 = vadd.f32 %v4712_v55, %v4035_v34  ;;  %v4671_v0 = vpop.f32.mrb[66].mxu0  ;;  %v4714_v2 = vpop.f32.mrb[74].mxu1  ;;  %11135 = vmatprep.subr.bf16.mxu1 %v12326_v14 }
0x118a   :  { %v4672_v10 = vadd.f32 %v4671_v0, %v4023_v13  ;;  %v4715_v16 = vadd.f32 %v4714_v2, %v4031_v7  ;;  %v4673_v57 = vpop.f32.mrb[67].mxu0  ;;  %v4716_v1 = vpop.f32.mrb[75].mxu1  ;;  %v4731_v33 = vmax.f32 %v4668_v43, 0.0  ;;  %v4733_v32 = vmax.f32 %v4711_v61, 0.0  ;;  %v12332_v13 = vld [vmem:[%s15699_s10 + $0x698] sm:$0xff]   ;;  %v12333_v7 = vld [vmem:[%s15699_s10 + $0x660] sm:$0xff]  }
0x118b   :  { %v4674_v9 = vadd.f32 %v4673_v57, %v4027_v40  ;;  %v4717_v6 = vadd.f32 %v4716_v1, %v4035_v34  ;;  %11114 = vmatpush3.bf16.msra.mxu0 %v12327_v31  ;;  %v4732_v40 = vmax.f32 %v4670_v39, 0.0  ;;  %v4734_v34 = vmax.f32 %v4713_v38, 0.0  ;;  %v12334_v43 = vld [vmem:[%s15699_s10 + $0x6e0] sm:$0xff]   ;;  %v12337_v38 = vld [vmem:[%s15699_s10 + $0x668] sm:$0xff]   ;;  %v12342_v57 = vld [vmem:[%s15699_s10 + $0x6f0] sm:$0xff]  }
0x118c   :  { %v4747_v22 = vmax.f32 %v4672_v10, 0.0  ;;  %v4749_v58 = vmax.f32 %v4715_v16, 0.0  ;;  %11136 = vmatpush3.bf16.msra.mxu1 %v12328_v45  ;;  %11115 = vmatprep.subr.bf16.mxu0 %v12329_v26  ;;  %v12335_v0 = vld [vmem:[%s15699_s10 + $0x620] sm:$0xff]   ;;  %v12338_v2 = vld [vmem:[%s15699_s10 + $0x6e8] sm:$0xff]   ;;  %v12341_v16 = vld [vmem:[%s15699_s10 + $0x670] sm:$0xff]  }
0x118d   :  { %v4748_v14 = vmax.f32 %v4674_v9, 0.0  ;;  %v4750_v31 = vmax.f32 %v4717_v6, 0.0  ;;  %11137 = vmatprep.subr.bf16.mxu1 %v12330_v21  ;;  %v12336_v39 = vld [vmem:[%s15699_s10 + $0x6a0] sm:$0xff]   ;;  %v12339_v21 = vld [vmem:[%s15699_s10 + $0x628] sm:$0xff]   ;;  %v12343_v1 = vld [vmem:[%s15699_s10 + $0x630] sm:$0xff]  }
0x118e   :  { %v14570_v61 = vpack.c.bf16 %v4747_v22, %v4731_v33  ;;  %v14572_v55 = vpack.c.bf16 %v4749_v58, %v4733_v32  ;;  %v12340_v10 = vld [vmem:[%s15699_s10 + $0x6a8] sm:$0xff]   ;;  %v12344_v9 = vld [vmem:[%s15699_s10 + $0x6b0] sm:$0xff]   ;;  %v12345_v6 = vld [vmem:[%s15699_s10 + $0x678] sm:$0xff]  }
0x118f   :  { %v4764_v45 = vpack.c.bf16 %v4748_v14, %v4732_v40  ;;  %v4766_v26 = vpack.c.bf16 %v4750_v31, %v4734_v34  ;;  %11116 = vmatpush3.bf16.msra.mxu0 %v12331_v11  ;;  %v12346_v11 = vld [vmem:[%s15699_s10 + $0x6f8] sm:$0xff]   ;;  %v12349_v22 = vld [vmem:[%s15699_s10 + $0x740] sm:$0xff]   ;;  %v12353_v40 = vld [vmem:[%s15699_s10 + $0x748] sm:$0xff]  }
0x1190   :  { %11138 = vmatpush3.bf16.msra.mxu1 %v12332_v13  ;;  %11117 = vmatprep.subr.bf16.mxu0 %v12333_v7  ;;  %v12347_v33 = vld [vmem:[%s15699_s10 + $0x638] sm:$0xff]   ;;  %v12350_v58 = vld [vmem:[%s15699_s10 + $0x7c0] sm:$0xff]   ;;  %v12354_v34 = vld [vmem:[%s15699_s10 + $0x7c8] sm:$0xff]  }
0x1191   :  { %11139 = vmatprep.subr.bf16.mxu1 %v12334_v43  ;;  %v12348_v32 = vld [vmem:[%s15699_s10 + $0x6b8] sm:$0xff]   ;;  %v12351_v13 = vld [vmem:[%s15699_s10 + $0x700] sm:$0xff]   ;;  %v12355_v14 = vld [vmem:[%s15699_s10 + $0x708] sm:$0xff]  }
0x1192   :  { %v12352_v7 = vld [vmem:[%s15699_s10 + $0x780] sm:$0xff]   ;;  %v12356_v31 = vld [vmem:[%s15699_s10 + $0x788] sm:$0xff]   ;;  %v12359_v43 = vld [vmem:[%s15699_s10 + $0x710] sm:$0xff]  }
0x1193   :  { %11118 = vmatpush3.bf16.msra.mxu0 %v12335_v0  ;;  %v12362_v0 = vld [vmem:[%s15699_s10 + $0x7d8] sm:$0xff]  }
0x1194   :  { %11140 = vmatpush3.bf16.msra.mxu1 %v12336_v39  ;;  %11119 = vmatprep.subr.bf16.mxu0 %v12337_v38  ;;  %v12363_v39 = vld [vmem:[%s15699_s10 + $0x718] sm:$0xff]  }
0x1195   :  { %11141 = vmatprep.subr.bf16.mxu1 %v12338_v2  ;;  %v12364_v38 = vld [vmem:[%s15699_s10 + $0x798] sm:$0xff]   ;;  %v12365_v2 = vld [vmem:[%s15699_s10 + $0x760] sm:$0xff]  }
0x1197   :  { %11120 = vmatpush3.bf16.msra.mxu0 %v12339_v21  ;;  %v12366_v21 = vld [vmem:[%s15699_s10 + $0x7e0] sm:$0xff]  }
0x1198   :  { %11142 = vmatpush3.bf16.msra.mxu1 %v12340_v10  ;;  %11121 = vmatprep.subr.bf16.mxu0 %v12341_v16  ;;  %v12367_v10 = vld [vmem:[%s15699_s10 + $0x720] sm:$0xff]  }
0x1199   :  { %11143 = vmatprep.subr.bf16.mxu1 %v12342_v57  ;;  %v12368_v16 = vld [vmem:[%s15699_s10 + $0x7a0] sm:$0xff]   ;;  %v12369_v57 = vld [vmem:[%s15699_s10 + $0x768] sm:$0xff]  }
0x119b   :  { %11122 = vmatpush3.bf16.msra.mxu0 %v12343_v1  ;;  %v12370_v1 = vld [vmem:[%s15699_s10 + $0x7e8] sm:$0xff]  }
0x119c   :  { %11144 = vmatpush3.bf16.msra.mxu1 %v12344_v9  ;;  %11123 = vmatprep.subr.bf16.mxu0 %v12345_v6  ;;  %v12371_v9 = vld [vmem:[%s15699_s10 + $0x728] sm:$0xff]  }
0x119d   :  { %11145 = vmatprep.subr.bf16.mxu1 %v12346_v11  ;;  %v12372_v6 = vld [vmem:[%s15699_s10 + $0x7a8] sm:$0xff]   ;;  %v12373_v11 = vld [vmem:[%s15699_s10 + $0x770] sm:$0xff]  }
0x119f   :  { %11124 = vmatpush3.bf16.msra.mxu0 %v12347_v33  ;;  %v12374_v33 = vld [vmem:[%s15699_s10 + $0x7f0] sm:$0xff]  }
0x11a0   :  { %11146 = vmatpush3.bf16.msra.mxu1 %v12348_v32  ;;  %11153 = vmatprep.subr.bf16.mxu0 %v12349_v22  ;;  %v12375_v32 = vld [vmem:[%s15699_s10 + $0x730] sm:$0xff]  }
0x11a1   :  { %11175 = vmatprep.subr.bf16.mxu1 %v12350_v58  ;;  %v12376_v22 = vld [vmem:[%s15699_s10 + $0x7b0] sm:$0xff]   ;;  %v12377_v58 = vld [vmem:[%s15699_s10 + $0x778] sm:$0xff]  }
0x11a2   :  { %5994 = vmatmul.mubr.bf16.vlgmr.msra.gmra.mrb[76].mxu0 %v14508_v5  ;;  %v12357_v5 = vld [vmem:[%s15699_s10 + $0x750] sm:$0xff]  }
0x11a3   :  { %6035 = vmatmul.mubr.bf16.vlgmr.msra.gmra.mrb[84].mxu1 %v14510_v53  ;;  %11154 = vmatpush3.bf16.msra.mxu0 %v12351_v13  ;;  %v12358_v53 = vld [vmem:[%s15699_s10 + $0x7d0] sm:$0xff]   ;;  %v12378_v13 = vld [vmem:[%s15699_s10 + $0x7f8] sm:$0xff]  }
0x11a4   :  { %6075 = vmatprep.mubr.bf16.mxu0 %v4764_v45  ;;  %11176 = vmatpush3.bf16.msra.mxu1 %v12352_v7  ;;  %v12360_v45 = vld [vmem:[%s15699_s10 + $0x790] sm:$0xff]   ;;  %v12379_v7 = vld [vmem:[%s15699_s10 + $0x738] sm:$0xff]  }
0x11a5   :  { %6116 = vmatprep.mubr.bf16.mxu1 %v4766_v26  ;;  %11155 = vmatprep.subr.bf16.mxu0 %v12353_v40  ;;  %v12361_v26 = vld [vmem:[%s15699_s10 + $0x758] sm:$0xff]  }
0x11a6   :  { %11177 = vmatprep.subr.bf16.mxu1 %v12354_v34  ;;  %v12380_v40 = vld [vmem:[%s15699_s10 + $0x7b8] sm:$0xff]   ;;  %v15748_v34 = vmov 0.0|0.0  }
0x11a7   :  { %11156 = vmatpush3.bf16.msra.mxu0 %v12355_v14  ;;  %v15749_v14 = vmov 0  }
0x11a8   :  { %11178 = vmatpush3.bf16.msra.mxu1 %v12356_v31  ;;  %11157 = vmatprep.subr.bf16.mxu0 %v12357_v5 }
0x11a9   :  { %11179 = vmatprep.subr.bf16.mxu1 %v12358_v53  ;;  %v10020_v53 = vld [vmem:[%s15700_s11 + $0x1] ss:$0 sm:$0xff] }
0x11ab   :  { %11158 = vmatpush3.bf16.msra.mxu0 %v12359_v43 }
0x11ac   :  { %11180 = vmatpush3.bf16.msra.mxu1 %v12360_v45  ;;  %11159 = vmatprep.subr.bf16.mxu0 %v12361_v26 }
0x11ad   :  { %11181 = vmatprep.subr.bf16.mxu1 %v12362_v0 }
0x11af   :  { %11160 = vmatpush3.bf16.msra.mxu0 %v12363_v39 }
0x11b0   :  { %11182 = vmatpush3.bf16.msra.mxu1 %v12364_v38  ;;  %11161 = vmatprep.subr.bf16.mxu0 %v12365_v2 }
0x11b1   :  { %11183 = vmatprep.subr.bf16.mxu1 %v12366_v21 }
0x11b3   :  { %11162 = vmatpush3.bf16.msra.mxu0 %v12367_v10 }
0x11b4   :  { %11184 = vmatpush3.bf16.msra.mxu1 %v12368_v16  ;;  %11163 = vmatprep.subr.bf16.mxu0 %v12369_v57 }
0x11b5   :  { %11185 = vmatprep.subr.bf16.mxu1 %v12370_v1 }
0x11b7   :  { %11164 = vmatpush3.bf16.msra.mxu0 %v12371_v9 }
0x11b8   :  { %11186 = vmatpush3.bf16.msra.mxu1 %v12372_v6  ;;  %11165 = vmatprep.subr.bf16.mxu0 %v12373_v11 }
0x11b9   :  { %11187 = vmatprep.subr.bf16.mxu1 %v12374_v33 }
0x11bb   :  { %11166 = vmatpush3.bf16.msra.mxu0 %v12375_v32 }
0x11bc   :  { %11188 = vmatpush3.bf16.msra.mxu1 %v12376_v22  ;;  %11167 = vmatprep.subr.bf16.mxu0 %v12377_v58 }
0x11bd   :  { %11189 = vmatprep.subr.bf16.mxu1 %v12378_v13 }
0x11bf   :  { %11168 = vmatpush3.bf16.msra.mxu0 %v12379_v7 }
0x11c0   :  { %11190 = vmatpush3.bf16.msra.mxu1 %v12380_v40 }
0x11c1   :  { %11882 = vmatprep.subr.bf16.mxu1 %v15748_v34 }
0x11c2   :  { %6076 = vmatmul.mubr.bf16.vlgmr.msra.gmra.mrb[80].mxu0 %v14570_v61 }
0x11c3   :  { %6117 = vmatmul.mubr.bf16.vlgmr.msra.gmra.mrb[88].mxu1 %v14572_v55  ;;  %6265 = vmatprep.mubr.bf16.mxu0 %v15749_v14 }
0x11c4   :  { %11659 = vmatprep.mubr.msk.f32.mxu1 %vm12601_vm12, %v15746_v44 }
0x1235   :  { %v11037_v31 = vpop.f32.mrb[68].mxu0  ;;  %v11059_v5 = vpop.f32.mrb[76].mxu1 }
0x1236   :  { %v11038_v43 = vpop.f32.mrb[69].mxu0  ;;  %v11060_v45 = vpop.f32.mrb[77].mxu1 }
0x1237   :  { %v11039_v26 = vadd.f32 %v11038_v43, %v11037_v31  ;;  %v11061_v0 = vadd.f32 %v11060_v45, %v11059_v5  ;;  %v11040_v39 = vpop.f32.mrb[70].mxu0  ;;  %v11062_v38 = vpop.f32.mrb[78].mxu1 }
0x1238   :  { %v11041_v61 = vpop.f32.mrb[71].mxu0  ;;  %v11063_v2 = vpop.f32.mrb[79].mxu1 }
0x1239   :  { %v5832_v55 = vadd.f32 %v11039_v26, %v10020_v53  ;;  %v11042_v21 = vadd.f32 %v11041_v61, %v11040_v39  ;;  %v11064_v10 = vadd.f32 %v11063_v2, %v11062_v38 }
0x123b   :  { %v5873_v16 = vadd.f32 %v11061_v0, %v5832_v55  ;;  %v5835_v57 = vadd.f32 %v11042_v21, %v10020_v53 }
0x123d   :  { %v5876_v1 = vadd.f32 %v11064_v10, %v5835_v57 }
0x1255   :  { %v11081_v9 = vpop.f32.mrb[72].mxu0  ;;  %v11103_v6 = vpop.f32.mrb[80].mxu1 }
0x1256   :  { %v11082_v11 = vpop.f32.mrb[73].mxu0  ;;  %v11104_v33 = vpop.f32.mrb[81].mxu1 }
0x1257   :  { %v11083_v32 = vadd.f32 %v11082_v11, %v11081_v9  ;;  %v11105_v22 = vadd.f32 %v11104_v33, %v11103_v6  ;;  %v11084_v58 = vpop.f32.mrb[74].mxu0  ;;  %v11106_v13 = vpop.f32.mrb[82].mxu1 }
0x1258   :  { %v11085_v7 = vpop.f32.mrb[75].mxu0  ;;  %v11107_v40 = vpop.f32.mrb[83].mxu1 }
0x1259   :  { %v5914_v31 = vadd.f32 %v11083_v32, %v5873_v16  ;;  %v11086_v5 = vadd.f32 %v11085_v7, %v11084_v58  ;;  %v11108_v43 = vadd.f32 %v11107_v40, %v11106_v13 }
0x125b   :  { %v5955_v45 = vadd.f32 %v11105_v22, %v5914_v31  ;;  %v5917_v26 = vadd.f32 %v11086_v5, %v5876_v1 }
0x125d   :  { %v5958_v39 = vadd.f32 %v11108_v43, %v5917_v26 }
0x1275   :  { %v11125_v38 = vpop.f32.mrb[76].mxu0 }
0x1276   :  { %v11147_v0 = vpop.f32.mrb[84].mxu1  ;;  %v11126_v53 = vpop.f32.mrb[77].mxu0 }
0x1277   :  { %v11127_v61 = vadd.f32 %v11126_v53, %v11125_v38  ;;  %v11148_v2 = vpop.f32.mrb[85].mxu1  ;;  %v11128_v55 = vpop.f32.mrb[78].mxu0 }
0x1278   :  { %v11149_v21 = vadd.f32 %v11148_v2, %v11147_v0  ;;  %v11150_v10 = vpop.f32.mrb[86].mxu1  ;;  %v11129_v57 = vpop.f32.mrb[79].mxu0 }
0x1279   :  { %v5996_v9 = vadd.f32 %v11127_v61, %v5955_v45  ;;  %v11130_v6 = vadd.f32 %v11129_v57, %v11128_v55  ;;  %v11151_v11 = vpop.f32.mrb[87].mxu1 }
0x127a   :  { %v11152_v33 = vadd.f32 %v11151_v11, %v11150_v10 }
0x127b   :  { %v6037_v37 = vadd.f32 %v11149_v21, %v5996_v9  ;;  %v5999_v16 = vadd.f32 %v11130_v6, %v5958_v39 }
0x127d   :  { %v6040_v32 = vadd.f32 %v11152_v33, %v5999_v16 }
0x1295   :  { %v11169_v58 = vpop.f32.mrb[80].mxu0 }
0x1296   :  { %v11191_v22 = vpop.f32.mrb[88].mxu1  ;;  %v11170_v1 = vpop.f32.mrb[81].mxu0 }
0x1297   :  { %v11171_v13 = vadd.f32 %v11170_v1, %v11169_v58  ;;  %v11192_v7 = vpop.f32.mrb[89].mxu1  ;;  %v11172_v40 = vpop.f32.mrb[82].mxu0  ;;  %v12386_v1 = vld [vmem:[%s15691_s2 + $0x94] ss:$8 sps:$4 sm:$0xff]  }
0x1298   :  { %v11193_v31 = vadd.f32 %v11192_v7, %v11191_v22  ;;  %v11194_v5 = vpop.f32.mrb[90].mxu1  ;;  %v11173_v43 = vpop.f32.mrb[83].mxu0  ;;  %v12381_v22 = vld [vmem:[%s15691_s2 + $0x80] ss:$8 sps:$4 sm:$0xff]   ;;  %v12389_v7 = vld [vmem:[%s15691_s2 + $0xa4] ss:$8 sps:$4 sm:$0xff]  }
0x1299   :  { %v6078_v26 = vadd.f32 %v11171_v13, %v6037_v37  ;;  %v11174_v38 = vadd.f32 %v11173_v43, %v11172_v40  ;;  %v11195_v0 = vpop.f32.mrb[91].mxu1  ;;  %v12384_v13 = vld [vmem:[%s15691_s2 + $0x90] ss:$8 sps:$4 sm:$0xff]   ;;  %v12387_v40 = vld [vmem:[%s15691_s2 + $0xa0] ss:$8 sps:$4 sm:$0xff]  }
0x129a   :  { %v11196_v53 = vadd.f32 %v11195_v0, %v11194_v5  ;;  %v12390_v5 = vld [vmem:[%s15691_s2 + $0xb0] ss:$8 sps:$4 sm:$0xff]  }
0x129b   :  { %v6119_v45 = vadd.f32 %v11193_v31, %v6078_v26  ;;  %v6081_v61 = vadd.f32 %v11174_v38, %v6040_v32  ;;  %v12392_v31 = vld [vmem:[%s15691_s2 + $0xb4] ss:$8 sps:$4 sm:$0xff]  }
0x129d   :  { %v6122_v2 = vadd.f32 %v11196_v53, %v6081_v61  ;;  %v6125_v55 = vadd.f32 %v6119_v45, %v14132_v60 }
0x129f   :  { %v6127_v39 = vsel %vm296_vm11, %v6125_v55, 0.0  ;;  %v6126_v21 = vadd.f32 %v6122_v2, %v14134_v47  ;;  %v12383_v47 = vld [vmem:[%s15691_s2 + $0x84] ss:$8 sps:$4 sm:$0xff]   ;;  %v10149_v2 = vld [vmem:[%s15701_s12 + $0x1] ss:$0 sm:$0xff] }
0x12a0   :  { %6128 = vadd.xlane.f32.xlu1 %v6127_v39  ;;  %6233 = vmatprep.subr.bf16.mxu0 %v12383_v47 }
0x12a1   :  { %v6130_v10 = vsel %vm296_vm11, %v6126_v21, 0.0  ;;  %6234 = vmatpush1.bf16.msra.mxu0 %v12381_v22 }
0x12a2   :  { %6131 = vadd.xlane.f32.xlu0 %v6130_v10  ;;  %6235 = vmatprep.subr.bf16.mxu0 %v12386_v1 }
0x12a5   :  { %6236 = vmatpush1.bf16.msra.mxu0 %v12384_v13 }
0x12a6   :  { %6237 = vmatprep.subr.bf16.mxu0 %v12389_v7 }
0x12a9   :  { %6238 = vmatpush1.bf16.msra.mxu0 %v12387_v40 }
0x12aa   :  { %6239 = vmatprep.subr.bf16.mxu0 %v12392_v31 }
0x12ad   :  { %6240 = vmatpush1.bf16.msra.mxu0 %v12390_v5 }
0x12ae   :  { %11898 = vmatprep.subr.bf16.mxu0 %v15748_v34 }
0x132d   :  { %v6129_v57 = vpop.xlane.xlu1 %6128 }
0x132e   :  { %v6133_v9 = vmul.f32 0.015625, %v6129_v57  ;;  %v10150_v57 = vld [vmem:[%s15702_s13 + $0x1] ss:$0 sm:$0xff] }
0x132f   :  { %v6132_v6 = vpop.xlane.xlu0 %6131 }
0x1330   :  { %v6135_v37 = vsub.f32 %v6125_v55, %v6133_v9  ;;  %v6134_v11 = vmul.f32 0.015625, %v6132_v6 }
0x1332   :  { %v6136_v33 = vsub.f32 %v6126_v21, %v6134_v11  ;;  %v6137_v16 = vmul.f32 %v6135_v37, %v6135_v37 }
0x1334   :  { %v6139_v32 = vsel %vm296_vm11, %v6137_v16, 0.0  ;;  %v6138_v58 = vmul.f32 %v6136_v33, %v6136_v33 }
0x1335   :  { %6140 = vadd.xlane.f32.xlu1 %v6139_v32 }
0x1336   :  { %v6142_v60 = vsel %vm296_vm11, %v6138_v58, 0.0 }
0x1337   :  { %6143 = vadd.xlane.f32.xlu0 %v6142_v60 }
0x13c2   :  { %v6141_v43 = vpop.xlane.xlu1 %6140 }
0x13c3   :  { %v6145_v26 = vmul.f32 0.015625, %v6141_v43 }
0x13c4   :  { %v6144_v38 = vpop.xlane.xlu0 %6143 }
0x13c5   :  { %v6147_v0 = vadd.f32 1e-05, %v6145_v26  ;;  %v6146_v53 = vmul.f32 0.015625, %v6144_v38 }
0x13c7   :  { %12553 = vrsqrt.f32 %v6147_v0  ;;  %v6148_v45 = vadd.f32 1e-05, %v6146_v53 }
0x13c9   :  { %12555 = vrsqrt.f32 %v6148_v45 }
0x13d1   :  { %v12554_v61 = vpop.eup %12553 }
0x13d2   :  { %v6151_v55 = vmul.f32 %v12554_v61, %v6135_v37  ;;  %v10159_v37 = vld [vmem:[%s15692_s3 + $0x2] ss:$4 sm:$0x3] }
0x13d3   :  { %v12556_v39 = vpop.eup %12555  ;;  %v14778_v47 = vrot.slane %v10159_v37, %v12883_v49 }
0x13d4   :  { %v6158_v21 = vmul.f32 %v10149_v2, %v6151_v55  ;;  %v6152_v10 = vmul.f32 %v12556_v39, %v6136_v33  ;;  %v6183_v33 = vrot.slane %v10159_v37, %v12876_v46 }
0x13d6   :  { %v6159_v9 = vmul.f32 %v10149_v2, %v6152_v10  ;;  %v14760_v6 = vadd.f32 %v10150_v57, %v6158_v21 }
0x13d8   :  { %v14762_v11 = vadd.f32 %v10150_v57, %v6159_v9 }
0x13da   :  { %v6167_v16 = vpack.c.bf16 %v14762_v11, %v14760_v6 }
0x13dc   :  { %10168 = vmatmul.mubr.msk.bf16.vlgmr.msra.gmra.mrb[84].mxu0 %vm296_vm11, %v6167_v16 }
0x13dd   :  { %11678 = vmatprep.mubr.msk.f32.mxu0 %vm12601_vm12, %v15746_v44 }
0x14af   :  { %v6267_v32 = vpop.f32.mrb[84].mxu0 }
0x14b0   :  { %v14773_v58 = vadd.f32 %v6267_v32, %v6183_v33  ;;  %v14775_v60 = vpop.f32.mrb[85].mxu0 }
0x14b1   :  { %v6271_v22 = vpop.f32.mrb[86].mxu0 }
0x14b2   :  { %v14780_v1 = vadd.f32 %v6271_v22, %v6183_v33  ;;  %v6273_v13 = vpop.f32.mrb[87].mxu0  ;;  %v6276_v7 = vmul.f32 %v12887_v51, %v14773_v58  ;;  %v6277_v40 = vmul.f32 %v12885_v50, %v14773_v58  ;;  %v6278_v5 = vmul.f32 %v12891_v54, %v14773_v58 }
0x14b3   :  { %v14787_v31 = vadd.f32 %v6273_v13, %v14778_v47  ;;  %v6279_v0 = vmul.f32 %v12893_v56, %v14773_v58  ;;  %v6280_v45 = vmul.f32 %v12910_v4, %v14773_v58  ;;  %v6281_v61 = vmul.f32 %v12908_v3, %v14773_v58 }
0x14b4   :  { %v12053_v43 = vpack.i.bf16 %v6277_v40, %v6276_v7  ;;  %v6284_v26 = vmul.f32 %v12887_v51, %v14780_v1  ;;  %v6285_v38 = vmul.f32 %v12885_v50, %v14780_v1  ;;  %v6286_v51 = vmul.f32 %v12891_v54, %v14780_v1 }
0x14b5   :  { %v12063_v2 = vpack.i.bf16 %v6279_v0, %v6278_v5  ;;  %v6287_v50 = vmul.f32 %v12893_v56, %v14780_v1  ;;  %v12073_v55 = vpack.i.bf16 %v6281_v61, %v6280_v45  ;;  %v6282_v39 = vmul.f32 %v12930_v18, %v14773_v58 }
0x14b6   :  { %12054 = vrot.lane.b32.xlu1 %v12053_v43, %s12599_s22  ;;  %v12058_v53 = vpack.i.bf16 %v6285_v38, %v6284_v26  ;;  %v6283_v21 = vmul.f32 %v12928_v17, %v14773_v58  ;;  %v6288_v57 = vmul.f32 %v12910_v4, %v14780_v1  ;;  %v6289_v54 = vmul.f32 %v12908_v3, %v14780_v1 }
0x14b7   :  { %v12068_v10 = vpack.i.bf16 %v6287_v50, %v6286_v51  ;;  %v6290_v16 = vmul.f32 %v12930_v18, %v14780_v1  ;;  %v6291_v37 = vmul.f32 %v12928_v17, %v14780_v1 }
0x14b8   :  { %12059 = vrot.lane.b32.xlu0 %v12058_v53, %s12599_s22  ;;  %v12083_v56 = vpack.i.bf16 %v6283_v21, %v6282_v39  ;;  %v12078_v9 = vpack.i.bf16 %v6289_v54, %v6288_v57 }
0x14b9   :  { %v12088_v33 = vpack.i.bf16 %v6291_v37, %v6290_v16 }
0x14ba   :  { %12064 = vrot.lane.b32.xlu1 %v12063_v2, %s12599_s22 }
0x14bc   :  { %12074 = vrot.lane.b32.xlu0 %v12073_v55, %s12599_s22 }
0x14be   :  { %12069 = vrot.lane.b32.xlu1 %v12068_v10, %s12599_s22 }
0x14c0   :  { %12084 = vrot.lane.b32.xlu0 %v12083_v56, %s12599_s22 }
0x14c2   :  { %12079 = vrot.lane.b32.xlu1 %v12078_v9, %s12599_s22 }
0x14c6   :  { %12089 = vrot.lane.b32.xlu1 %v12088_v33, %s12599_s22 }
0x1528   :  { %v12055_v4 = vpop.permute.xlu1 %12054 }
0x1529   :  { %v12057_v32 = vunpack.i.h.bf16 %v12055_v4  ;;  %v12056_v3 = vunpack.i.l.bf16 %v12055_v4  ;;  %v6270_v4 = vadd.f32 %v14775_v60, %v14778_v47 }
0x152a   :  { %v12060_v22 = vpop.permute.xlu0 %12059 }
0x152b   :  { %v11883_v13 = vpack.c.bf16 %v12057_v32, %v12056_v3  ;;  %v12062_v7 = vunpack.i.h.bf16 %v12060_v22  ;;  %v12061_v40 = vunpack.i.l.bf16 %v12060_v22  ;;  %v6292_v3 = vmul.f32 %v12784_v15, %v6270_v4 }
0x152c   :  { %v12065_v5 = vpop.permute.xlu1 %12064  ;;  %v6293_v22 = vmul.f32 %v12804_v23, %v6270_v4  ;;  %v6294_v47 = vmul.f32 %v12809_v24, %v6270_v4 }
0x152d   :  { %v11899_v43 = vpack.c.bf16 %v12062_v7, %v12061_v40  ;;  %11885 = vmatpush3.bf16.xpose.msk.msra.mxu1 %vm12961_vm13, %v11883_v13  ;;  %v12067_v17 = vunpack.i.h.bf16 %v12065_v5  ;;  %v12066_v18 = vunpack.i.l.bf16 %v12065_v5  ;;  %v6295_v13 = vmul.f32 %v12814_v25, %v6270_v4 }
0x152e   :  { %11886 = vmatprep.subr.bf16.mxu1 %v15748_v34  ;;  %v12075_v45 = vpop.permute.xlu0 %12074  ;;  %v6629_v60 = vpack.c.bf16 %v6293_v22, %v6292_v3  ;;  %v6297_v7 = vmul.f32 %v12859_v36, %v6270_v4  ;;  %v6299_v40 = vmul.f32 %v12836_v30, %v6270_v4 }
0x152f   :  { %11901 = vmatpush3.bf16.xpose.msk.msra.mxu0 %vm12961_vm13, %v11899_v43  ;;  %v11887_v53 = vpack.c.bf16 %v12067_v17, %v12066_v18  ;;  %v12077_v51 = vunpack.i.h.bf16 %v12075_v45  ;;  %v12076_v50 = vunpack.i.l.bf16 %v12075_v45  ;;  %v6630_v8 = vpack.c.bf16 %v6295_v13, %v6294_v47 }
0x1530   :  { %v12070_v26 = vpop.permute.xlu1 %12069  ;;  %11902 = vmatprep.subr.bf16.mxu0 %v15748_v34 }
0x1531   :  { %v12072_v38 = vunpack.i.h.bf16 %v12070_v26  ;;  %v12071_v0 = vunpack.i.l.bf16 %v12070_v26  ;;  %v11891_v21 = vpack.c.bf16 %v12077_v51, %v12076_v50 }
0x1532   :  { %v12085_v10 = vpop.permute.xlu0 %12084 }
0x1533   :  { %v11903_v61 = vpack.c.bf16 %v12072_v38, %v12071_v0  ;;  %v12087_v56 = vunpack.i.h.bf16 %v12085_v10  ;;  %v12086_v9 = vunpack.i.l.bf16 %v12085_v10  ;;  %v6303_v10 = vmul.f32 %v12814_v25, %v14787_v31 }
0x1534   :  { %v12080_v2 = vpop.permute.xlu1 %12079 }
0x1535   :  { %11889 = vmatpush3.bf16.xpose.msk.msra.mxu1 %vm12961_vm13, %v11887_v53  ;;  %v12082_v55 = vunpack.i.h.bf16 %v12080_v2  ;;  %v12081_v39 = vunpack.i.l.bf16 %v12080_v2  ;;  %v11895_v33 = vpack.c.bf16 %v12087_v56, %v12086_v9  ;;  %v6301_v2 = vmul.f32 %v12804_v23, %v14787_v31 }
0x1536   :  { %11890 = vmatprep.subr.bf16.mxu1 %v15748_v34  ;;  %v6304_v23 = vmul.f32 %v12854_v35, %v14787_v31 }
0x1537   :  { %11905 = vmatpush3.bf16.xpose.msk.msra.mxu0 %vm12961_vm13, %v11903_v61  ;;  %v11907_v57 = vpack.c.bf16 %v12082_v55, %v12081_v39  ;;  %v6300_v61 = vmul.f32 %v12784_v15, %v14787_v31 }
0x1538   :  { %11906 = vmatprep.subr.bf16.mxu0 %v15748_v34  ;;  %v12090_v54 = vpop.permute.xlu1 %12089 }
0x1539   :  { %v12092_v16 = vunpack.i.h.bf16 %v12090_v54  ;;  %v12091_v37 = vunpack.i.l.bf16 %v12090_v54  ;;  %v6633_v39 = vpack.c.bf16 %v6301_v2, %v6300_v61  ;;  %v6307_v54 = vmul.f32 %v12836_v30, %v14787_v31  ;;  %v12395_v30 = vld [vmem:[%s15693_s4 + $0x50] sm:$0xff]  }
0x153b   :  { %v11911_v32 = vpack.c.bf16 %v12092_v16, %v12091_v37 }
0x153d   :  { %11893 = vmatpush3.bf16.xpose.msk.msra.mxu1 %vm12961_vm13, %v11891_v21  ;;  %v6302_v21 = vmul.f32 %v12809_v24, %v14787_v31  ;;  %v6305_v24 = vmul.f32 %v12859_v36, %v14787_v31  ;;  %v12396_v36 = vld [vmem:[%s15693_s4 + $0x58] sm:$0xff]  }
0x153e   :  { %11894 = vmatprep.subr.bf16.mxu1 %v15748_v34 }
0x153f   :  { %11909 = vmatpush3.bf16.xpose.msk.msra.mxu0 %vm12961_vm13, %v11907_v57  ;;  %v6634_v15 = vpack.c.bf16 %v6303_v10, %v6302_v21  ;;  %v6635_v25 = vpack.c.bf16 %v6305_v24, %v6304_v23  ;;  %v6306_v57 = vmul.f32 %v12831_v29, %v14787_v31  ;;  %v10216_v21 = vld [vmem:[%s15697_s8 + $0x408] sm:$0xff] }
0x1540   :  { %11910 = vmatprep.subr.bf16.mxu0 %v15748_v34 }
0x1541   :  { %v6636_v56 = vpack.c.bf16 %v6307_v54, %v6306_v57  ;;  %v10231_v57 = vld [vmem:[%s15697_s8 + $0x480] sm:$0xff] }
0x1542   :  { %v10239_v54 = vld [vmem:[%s15697_s8 + $0x4c0] sm:$0xff] }
0x1545   :  { %11897 = vmatpush3.bf16.xpose.msk.msra.mxu1 %vm12961_vm13, %v11895_v33 }
0x1546   :  { %11915 = vmatprep.subr.msk.bf16.mxu1 %vm13014_vm14, %v15747_v28 }
0x1547   :  { %11913 = vmatpush3.bf16.xpose.msk.msra.mxu0 %vm12961_vm13, %v11911_v32 }
0x1548   :  { %11700 = vmatprep.subr.bf16.mxu0 %v15746_v44 }
0x154c   :  { %11660 = vmatmul.mubr.msk.f32.vlgmr.msra.gmra.mrb[50].mxu1 %vm296_vm11, %v14773_v58  ;;  %v6296_v58 = vmul.f32 %v12854_v35, %v6270_v4  ;;  %v12393_v35 = vld [vmem:[%s15693_s4 + $0x40] sm:$0xff]  }
0x154d   :  { %11917 = vmatpush3.bf16.msk.msra.mxu1 %vm13014_vm14, %v15747_v28 }
0x154e   :  { %11679 = vmatmul.mubr.msk.f32.vlgmr.msra.gmra.mrb[88].mxu0 %vm296_vm11, %v14780_v1  ;;  %11919 = vmatprep.subr.msk.bf16.mxu1 %vm13028_vm15, %v15747_v28  ;;  %v6631_v63 = vpack.c.bf16 %v6297_v7, %v6296_v58  ;;  %v6298_v1 = vmul.f32 %v12831_v29, %v6270_v4  ;;  %v12394_v29 = vld [vmem:[%s15693_s4 + $0x48] sm:$0xff]  }
0x154f   :  { %11701 = vmatpush3.bf16.msra.mxu0 %v6629_v60  ;;  %11708 = vmatprep.mubr.msk.bf16.mxu0 %vm12601_vm12, %v15746_v44 }
0x1550   :  { %11702 = vmatprep.subr.bf16.mxu0 %v15746_v44  ;;  %v6632_v12 = vpack.c.bf16 %v6299_v40, %v6298_v1  ;;  %v10207_v1 = vld [vmem:[%s15694_s5 + $0x2] ss:$0 sm:$0xff] }
0x1551   :  { %11921 = vmatpush3.bf16.msk.msra.mxu1 %vm13028_vm15, %v15747_v28 }
0x1552   :  { %11923 = vmatprep.subr.msk.bf16.mxu1 %vm13039_vm0, %v15747_v28 }
0x1553   :  { %11703 = vmatpush3.bf16.msra.mxu0 %v6630_v8 }
0x1554   :  { %11704 = vmatprep.subr.bf16.mxu0 %v15746_v44 }
0x1555   :  { %11925 = vmatpush3.bf16.msk.msra.mxu1 %vm13039_vm0, %v15747_v28 }
0x1556   :  { %11927 = vmatprep.subr.msk.bf16.mxu1 %vm13053_vm1, %v15747_v28 }
0x1557   :  { %11705 = vmatpush3.bf16.msra.mxu0 %v6631_v63 }
0x1558   :  { %11706 = vmatprep.subr.bf16.mxu0 %v15746_v44 }
0x1559   :  { %11929 = vmatpush3.bf16.msk.msra.mxu1 %vm13053_vm1, %v15747_v28 }
0x155a   :  { %11712 = vmatprep.subr.bf16.mxu1 %v15746_v44 }
0x155b   :  { %11707 = vmatpush3.bf16.msra.mxu0 %v6632_v12 }
0x155c   :  { %11724 = vmatprep.subr.bf16.mxu0 %v15746_v44 }
0x161f   :  { %v6417_v5 = vpop.f32.mrb[50].mxu1 }
0x1620   :  { %v11661_v19 = vpop.f32.mrb[51].mxu1  ;;  %v6534_v43 = vsel %vm296_vm11, %v6417_v5, -inf }
0x1621   :  { %v6530_v17 = vpop.f32.mrb[88].mxu0  ;;  %6535 = vmax.xlane.f32.xlu0 %v6534_v43 }
0x1622   :  { %v11680_v18 = vpop.f32.mrb[89].mxu0  ;;  %v6537_v26 = vsel %vm296_vm11, %v6530_v17, -inf }
0x1623   :  { %6538 = vmax.xlane.f32.xlu1 %v6537_v26 }
0x16ae   :  { %v6536_v38 = vpop.xlane.xlu0 %6535 }
0x16af   :  { %v6540_v0 = vsub.f32 %v6417_v5, %v6536_v38 }
0x16b0   :  { %v6539_v53 = vpop.xlane.xlu1 %6538 }
0x16b1   :  { %v6542_v20 = vmul.f32 1.442695, %v6540_v0  ;;  %v6541_v28 = vsub.f32 %v6530_v17, %v6539_v53 }
0x16b3   :  { %12557 = vpow2.f32 %v6542_v20  ;;  %v6544_v45 = vmul.f32 1.442695, %v6541_v28 }
0x16b5   :  { %12559 = vpow2.f32 %v6544_v45 }
0x16bd   :  { %v12558_v51 = vpop.eup %12557 }
0x16be   :  { %11697 = vmatprep.mubr.msk.f32.mxu1 %vm296_vm11, %v12558_v51  ;;  %v6627_v50 = vpack.c.bf16 %v12558_v51, %v12558_v51 }
0x16bf   :  { %v12560_v55 = vpop.eup %12559 }
0x16c0   :  { %11698 = vmatmul.mubr.msk.f32.vlgmr.msra.gmra.mrb[92].mxu1 %vm296_vm11, %v12560_v55  ;;  %11709 = vmatmul.mubr.msk.bf16.vlgmr.msra.gmra.mrb[92].mxu0 %vm296_vm11, %v6627_v50  ;;  %v6628_v9 = vpack.c.bf16 %v12560_v55, %v12560_v55  ;;  %v10215_v55 = vld [vmem:[%s15697_s8 + $0x400] sm:$0xff] }
0x16c1   :  { %11713 = vmatpush3.bf16.msra.mxu1 %v6633_v39  ;;  %11720 = vmatprep.mubr.msk.bf16.mxu1 %vm12601_vm12, %v15746_v44  ;;  %v10223_v39 = vld [vmem:[%s15697_s8 + $0x440] sm:$0xff] }
0x16c2   :  { %11714 = vmatprep.subr.bf16.mxu1 %v15746_v44  ;;  %11732 = vmatprep.mubr.msk.bf16.mxu0 %vm12601_vm12, %v15746_v44  ;;  %v10282_v10 = vcombine.high %v10215_v55, %v10223_v39  ;;  %v10281_v23 = vcombine.low %v10215_v55, %v10223_v39 }
0x16c3   :  { %11725 = vmatpush3.bf16.msra.mxu0 %v12393_v35  ;;  %v10240_v35 = vld [vmem:[%s15697_s8 + $0x4c8] sm:$0xff] }
0x16c4   :  { %11726 = vmatprep.subr.bf16.mxu0 %v15746_v44 }
0x16c5   :  { %11715 = vmatpush3.bf16.msra.mxu1 %v6634_v15  ;;  %v10224_v15 = vld [vmem:[%s15697_s8 + $0x448] sm:$0xff] }
0x16c6   :  { %11716 = vmatprep.subr.bf16.mxu1 %v15746_v44  ;;  %v10283_v24 = vcombine.low %v10216_v21, %v10224_v15 }
0x16c7   :  { %11727 = vmatpush3.bf16.msra.mxu0 %v12394_v29  ;;  %v10297_v29 = vcombine.low %v10231_v57, %v10239_v54 }
0x16c8   :  { %11728 = vmatprep.subr.bf16.mxu0 %v15746_v44 }
0x16c9   :  { %11717 = vmatpush3.bf16.msra.mxu1 %v6635_v25  ;;  %v10284_v25 = vcombine.high %v10216_v21, %v10224_v15  ;;  %v10214_v21 = vld [vmem:[%s15696_s7 + $0x2] ss:$0 sm:$0xff]  ;;  %v10233_v15 = vld [vmem:[%s15697_s8 + $0x490] sm:$0xff] }
0x16ca   :  { %11718 = vmatprep.subr.bf16.mxu1 %v15746_v44 }
0x16cb   :  { %11729 = vmatpush3.bf16.msra.mxu0 %v12395_v30 }
0x16cc   :  { %11730 = vmatprep.subr.bf16.mxu0 %v15746_v44 }
0x16cd   :  { %11719 = vmatpush3.bf16.msra.mxu1 %v6636_v56  ;;  %v10232_v56 = vld [vmem:[%s15697_s8 + $0x488] sm:$0xff] }
0x16ce   :  { %7327 = vmatprep.subr.bf16.mxu1 %v10282_v10  ;;  %v10299_v30 = vcombine.low %v10232_v56, %v10240_v35 }
0x16cf   :  { %11731 = vmatpush3.bf16.msra.mxu0 %v12396_v36  ;;  %v10300_v36 = vcombine.high %v10232_v56, %v10240_v35  ;;  %v10257_v35 = vld [vmem:[%s15697_s8 + $0x550] sm:$0xff] }
0x16d0   :  { %11721 = vmatmul.mubr.msk.bf16.vlgmr.msra.gmra.mrb[96].mxu1 %vm296_vm11, %v6628_v9  ;;  %7370 = vmatprep.subr.bf16.mxu0 %v10284_v25  ;;  %v10298_v9 = vcombine.high %v10231_v57, %v10239_v54 }
0x16d1   :  { %7359 = vmatprep.mubr.bf16.mxu1 %v15749_v14  ;;  %7328 = vmatpush1.bf16.msra.mxu1 %v10281_v23  ;;  %v10234_v23 = vld [vmem:[%s15697_s8 + $0x498] sm:$0xff] }
0x16d2   :  { %7329 = vmatprep.subr.bf16.mxu1 %v10298_v9  ;;  %v10249_v9 = vld [vmem:[%s15697_s8 + $0x510] sm:$0xff] }
0x16d5   :  { %7330 = vmatpush1.bf16.msra.mxu1 %v10297_v29  ;;  %v10250_v29 = vld [vmem:[%s15697_s8 + $0x518] sm:$0xff] }
0x1793   :  { %v11699_v31 = vpop.f32.mrb[92].mxu1  ;;  %v6674_v16 = vpop.f32.mrb[92].mxu0 }
0x1794   :  { %v6618_v37 = vpop.f32.mrb[93].mxu1  ;;  %v11710_v33 = vpop.f32.mrb[93].mxu0 }
0x1795   :  { %12561 = vrcp.f32 %v6618_v37  ;;  %v6677_v4 = vpop.f32.mrb[94].mxu0  ;;  %v10248_v37 = vld [vmem:[%s15697_s8 + $0x508] sm:$0xff] }
0x1796   :  { %v11711_v32 = vpop.f32.mrb[95].mxu0  ;;  %12563 = vrcp.f32 %v11699_v31  ;;  %v10247_v31 = vld [vmem:[%s15697_s8 + $0x500] sm:$0xff]  ;;  %v10256_v4 = vld [vmem:[%s15697_s8 + $0x548] sm:$0xff] }
0x179f   :  { %v12562_v3 = vpop.eup %12561 }
0x17a0   :  { %v6725_v22 = vmul.f32 %v12562_v3, %v6674_v16  ;;  %v12564_v60 = vpop.eup %12563  ;;  %v10255_v16 = vld [vmem:[%s15697_s8 + $0x540] sm:$0xff]  ;;  %v10315_v3 = vcombine.low %v10248_v37, %v10256_v4 }
0x17a1   :  { %v10314_v33 = vcombine.high %v10247_v31, %v10255_v16  ;;  %v10313_v32 = vcombine.low %v10247_v31, %v10255_v16  ;;  %v10318_v16 = vcombine.high %v10249_v9, %v10257_v35 }
0x17a3   :  { %v6717_v47 = vpop.f32.mrb[96].mxu1  ;;  %7331 = vmatprep.subr.bf16.mxu1 %v10314_v33  ;;  %v10265_v33 = vld [vmem:[%s15697_s8 + $0x590] sm:$0xff] }
0x17a4   :  { %v6726_v13 = vmul.f32 %v12564_v60, %v6717_v47  ;;  %v11722_v8 = vpop.f32.mrb[97].mxu1  ;;  %v10263_v60 = vld [vmem:[%s15697_s8 + $0x580] sm:$0xff]  ;;  %7332 = vmatpush1.bf16.msra.mxu1 %v10313_v32  ;;  %v10266_v32 = vld [vmem:[%s15697_s8 + $0x598] sm:$0xff] }
0x17a5   :  { %v6720_v58 = vpop.f32.mrb[98].mxu1  ;;  %v10271_v47 = vld [vmem:[%s15697_s8 + $0x5c0] sm:$0xff] }
0x17a6   :  { %v6727_v7 = vpack.c.bf16 %v6726_v13, %v6725_v22  ;;  %v11723_v63 = vpop.f32.mrb[99].mxu1  ;;  %v10316_v22 = vcombine.high %v10248_v37, %v10256_v4  ;;  %v10264_v13 = vld [vmem:[%s15697_s8 + $0x588] sm:$0xff]  ;;  %v10329_v8 = vcombine.low %v10263_v60, %v10271_v47  ;;  %v10330_v58 = vcombine.high %v10263_v60, %v10271_v47  ;;  %v10273_v4 = vld [vmem:[%s15697_s8 + $0x5d0] sm:$0xff] }
0x17a7   :  { %v10217_v63 = vld [vmem:[%s15697_s8 + $0x410] sm:$0xff]  ;;  %v10334_v47 = vcombine.high %v10265_v33, %v10273_v4 }
0x17a8   :  { %11733 = vmatmul.mubr.msk.bf16.vlgmr.msra.gmra.mrb[96].mxu0 %vm296_vm11, %v6727_v7  ;;  %v10272_v7 = vld [vmem:[%s15697_s8 + $0x5c8] sm:$0xff]  ;;  %7333 = vmatprep.subr.bf16.mxu1 %v10330_v58  ;;  %v10227_v58 = vld [vmem:[%s15697_s8 + $0x460] sm:$0xff] }
0x17a9   :  { %7402 = vmatprep.mubr.bf16.mxu0 %v15749_v14  ;;  %7371 = vmatpush1.bf16.msra.mxu0 %v10283_v24 }
0x17aa   :  { %7372 = vmatprep.subr.bf16.mxu0 %v10300_v36  ;;  %7334 = vmatpush1.bf16.msra.mxu1 %v10329_v8  ;;  %v10219_v8 = vld [vmem:[%s15697_s8 + $0x420] sm:$0xff] }
0x17ad   :  { %7373 = vmatpush1.bf16.msra.mxu0 %v10299_v30  ;;  %v10258_v30 = vld [vmem:[%s15697_s8 + $0x558] sm:$0xff] }
0x17ae   :  { %7374 = vmatprep.subr.bf16.mxu0 %v10316_v22  ;;  %v10320_v37 = vcombine.high %v10250_v29, %v10258_v30  ;;  %v10317_v22 = vcombine.low %v10249_v9, %v10257_v35  ;;  %v10319_v60 = vcombine.low %v10250_v29, %v10258_v30  ;;  %v10229_v9 = vld [vmem:[%s15697_s8 + $0x470] sm:$0xff]  ;;  %v10222_v35 = vld [vmem:[%s15697_s8 + $0x438] sm:$0xff] }
0x17af   :  { %v10230_v29 = vld [vmem:[%s15697_s8 + $0x478] sm:$0xff] }
0x17b1   :  { %7375 = vmatpush1.bf16.msra.mxu0 %v10315_v3  ;;  %v10274_v3 = vld [vmem:[%s15697_s8 + $0x5d8] sm:$0xff] }
0x187b   :  { %v6803_v40 = vpop.f32.mrb[96].mxu0 }
0x187c   :  { %v6804_v12 = vadd.f32 %v10207_v1, %v6803_v40  ;;  %v11734_v5 = vpop.f32.mrb[97].mxu0  ;;  %v10331_v40 = vcombine.low %v10264_v13, %v10272_v7 }
0x187d   :  { %v6806_v19 = vpop.f32.mrb[98].mxu0 }
0x187e   :  { %v6807_v43 = vadd.f32 %v10207_v1, %v6806_v19  ;;  %v11735_v17 = vpop.f32.mrb[99].mxu0  ;;  %v6810_v18 = vadd.f32 %v6804_v12, %v14760_v6  ;;  %v10225_v1 = vld [vmem:[%s15697_s8 + $0x450] sm:$0xff]  ;;  %v10332_v12 = vcombine.high %v10264_v13, %v10272_v7  ;;  %v10336_v13 = vcombine.high %v10266_v32, %v10274_v3  ;;  %v10220_v7 = vld [vmem:[%s15697_s8 + $0x428] sm:$0xff] }
0x187f   :  { %v10285_v5 = vcombine.low %v10217_v63, %v10225_v1  ;;  %v10286_v19 = vcombine.high %v10217_v63, %v10225_v1  ;;  %v10226_v17 = vld [vmem:[%s15697_s8 + $0x458] sm:$0xff]  ;;  %v10228_v63 = vld [vmem:[%s15697_s8 + $0x468] sm:$0xff]  ;;  %v10333_v1 = vcombine.low %v10265_v33, %v10273_v4  ;;  %v10245_v33 = vld [vmem:[%s15697_s8 + $0x4f0] sm:$0xff] }
0x1880   :  { %v6812_v26 = vsel %vm296_vm11, %v6810_v18, 0.0  ;;  %v6811_v38 = vadd.f32 %v6807_v43, %v14762_v11  ;;  %v10218_v43 = vld [vmem:[%s15697_s8 + $0x418] sm:$0xff]  ;;  %7376 = vmatprep.subr.bf16.mxu0 %v10332_v12  ;;  %v10290_v12 = vcombine.high %v10219_v8, %v10227_v58 }
0x1881   :  { %6813 = vadd.xlane.f32.xlu0 %v6812_v26  ;;  %v10288_v26 = vcombine.high %v10218_v43, %v10226_v17  ;;  %7377 = vmatpush1.bf16.msra.mxu0 %v10331_v40  ;;  %v10335_v40 = vcombine.low %v10266_v32, %v10274_v3  ;;  %v10238_v4 = vld [vmem:[%s15697_s8 + $0x4b8] sm:$0xff] }
0x1882   :  { %v6815_v0 = vsel %vm296_vm11, %v6811_v38, 0.0  ;;  %7413 = vmatprep.subr.bf16.mxu1 %v10286_v19  ;;  %v10235_v19 = vld [vmem:[%s15697_s8 + $0x4a0] sm:$0xff]  ;;  %v10246_v32 = vld [vmem:[%s15697_s8 + $0x4f8] sm:$0xff] }
0x1883   :  { %7456 = vmatprep.subr.bf16.mxu0 %v10288_v26  ;;  %v10289_v26 = vcombine.low %v10219_v8, %v10227_v58  ;;  %v10261_v8 = vld [vmem:[%s15697_s8 + $0x570] sm:$0xff]  ;;  %v10254_v58 = vld [vmem:[%s15697_s8 + $0x538] sm:$0xff] }
0x1885   :  { %6816 = vadd.xlane.f32.xlu0 %v6815_v0 }
0x190e   :  { %v6814_v53 = vpop.xlane.xlu0 %6813 }
0x190f   :  { %v6818_v20 = vmul.f32 0.015625, %v6814_v53 }
0x1911   :  { %v14947_v28 = vsub.f32 %v6810_v18, %v6818_v20  ;;  %v10287_v18 = vcombine.low %v10218_v43, %v10226_v17  ;;  %v10243_v43 = vld [vmem:[%s15697_s8 + $0x4e0] sm:$0xff]  ;;  %v10236_v17 = vld [vmem:[%s15697_s8 + $0x4a8] sm:$0xff] }
0x1912   :  { %v6817_v45 = vpop.xlane.xlu0 %6816 }
0x1913   :  { %v6819_v61 = vmul.f32 0.015625, %v6817_v45  ;;  %v6822_v2 = vmul.f32 %v14947_v28, %v14947_v28 }
0x1915   :  { %v14951_v51 = vsub.f32 %v6811_v38, %v6819_v61  ;;  %v6824_v6 = vsel %vm296_vm11, %v6822_v2, 0.0 }
0x1916   :  { %6825 = vadd.xlane.f32.xlu1 %v6824_v6 }
0x1917   :  { %v6823_v11 = vmul.f32 %v14951_v51, %v14951_v51 }
0x1919   :  { %v6827_v50 = vsel %vm296_vm11, %v6823_v11, 0.0  ;;  %v10213_v11 = vld [vmem:[%s15695_s6 + $0x2] ss:$0 sm:$0xff] }
0x191a   :  { %6828 = vadd.xlane.f32.xlu0 %v6827_v50 }
0x19a3   :  { %v6826_v38 = vpop.xlane.xlu1 %6825 }
0x19a4   :  { %v6830_v0 = vmul.f32 0.015625, %v6826_v38  ;;  %v10291_v38 = vcombine.low %v10220_v7, %v10228_v63 }
0x19a6   :  { %v6832_v53 = vadd.f32 1e-05, %v6830_v0  ;;  %v10306_v0 = vcombine.high %v10235_v19, %v10243_v43 }
0x19a7   :  { %v6829_v20 = vpop.xlane.xlu0 %6828 }
0x19a8   :  { %12565 = vrsqrt.f32 %v6832_v53  ;;  %v6831_v45 = vmul.f32 0.015625, %v6829_v20  ;;  %v10251_v20 = vld [vmem:[%s15697_s8 + $0x520] sm:$0xff] }
0x19aa   :  { %v6833_v61 = vadd.f32 1e-05, %v6831_v45  ;;  %v10259_v45 = vld [vmem:[%s15697_s8 + $0x560] sm:$0xff] }
0x19ac   :  { %12567 = vrsqrt.f32 %v6833_v61  ;;  %v10252_v61 = vld [vmem:[%s15697_s8 + $0x528] sm:$0xff] }
0x19b2   :  { %v12566_v2 = vpop.eup %12565 }
0x19b3   :  { %v6836_v6 = vmul.f32 %v12566_v2, %v14947_v28  ;;  %v10241_v28 = vld [vmem:[%s15697_s8 + $0x4d0] sm:$0xff]  ;;  %v10260_v2 = vld [vmem:[%s15697_s8 + $0x568] sm:$0xff] }
0x19b4   :  { %v10302_v54 = vcombine.high %v10233_v15, %v10241_v28  ;;  %v10301_v36 = vcombine.low %v10233_v15, %v10241_v28  ;;  %v10276_v15 = vld [vmem:[%s15697_s8 + $0x5e8] sm:$0xff]  ;;  %v10321_v28 = vcombine.low %v10251_v20, %v10259_v45 }
0x19b5   :  { %v6843_v55 = vmul.f32 %v10213_v11, %v6836_v6  ;;  %v10305_v6 = vcombine.low %v10235_v19, %v10243_v43  ;;  %v10277_v19 = vld [vmem:[%s15697_s8 + $0x5f0] sm:$0xff]  ;;  %v10270_v43 = vld [vmem:[%s15697_s8 + $0x5b8] sm:$0xff] }
0x19b6   :  { %v12568_v50 = vpop.eup %12567 }
0x19b7   :  { %v6837_v39 = vmul.f32 %v12568_v50, %v14951_v51  ;;  %v10242_v51 = vld [vmem:[%s15697_s8 + $0x4d8] sm:$0xff]  ;;  %v15037_v24 = vadd.f32 %v10214_v21, %v6843_v55  ;;  %v10322_v50 = vcombine.high %v10251_v20, %v10259_v45  ;;  %v10324_v55 = vcombine.high %v10252_v61, %v10260_v2  ;;  %v12397_v45 = vld [vmem:[%s15699_s10 + $0x840] sm:$0xff]  }
0x19b8   :  { %v10304_v56 = vcombine.high %v10234_v23, %v10242_v51  ;;  %v10303_v31 = vcombine.low %v10234_v23, %v10242_v51  ;;  %v10323_v23 = vcombine.low %v10252_v61, %v10260_v2  ;;  %v12399_v61 = vld [vmem:[%s15699_s10 + $0x800] sm:$0xff]  }
0x19b9   :  { %v6844_v10 = vmul.f32 %v10213_v11, %v6837_v39  ;;  %v10267_v39 = vld [vmem:[%s15697_s8 + $0x5a0] sm:$0xff] }
0x19ba   :  { %v12400_v2 = vld [vmem:[%s15699_s10 + $0x880] sm:$0xff]  }
0x19bb   :  { %v15039_v25 = vadd.f32 %v10214_v21, %v6844_v10  ;;  %v10275_v21 = vld [vmem:[%s15697_s8 + $0x5e0] sm:$0xff]  ;;  %v10268_v10 = vld [vmem:[%s15697_s8 + $0x5a8] sm:$0xff] }
0x19bc   :  { %v10338_v51 = vcombine.high %v10267_v39, %v10275_v21  ;;  %v10337_v30 = vcombine.low %v10267_v39, %v10275_v21  ;;  %v12405_v39 = vld [vmem:[%s15699_s10 + $0x850] sm:$0xff]  }
0x19bd   :  { %v15043_v57 = vpack.c.bf16 %v15039_v25, %v15037_v24  ;;  %v12407_v21 = vld [vmem:[%s15699_s10 + $0x810] sm:$0xff]  }
0x19bf   :  { %10345 = vmatmul.mubr.msk.bf16.vlgmr.msra.gmra.mrb[100].mxu1 %vm296_vm11, %v15043_v57  ;;  %10346 = vmatmul.mubr.msk.bf16.vlgmr.msra.gmra.mrb[100].mxu0 %vm296_vm11, %v15043_v57 }
0x19c0   :  { %7414 = vmatpush1.bf16.msra.mxu1 %v10285_v5  ;;  %7457 = vmatpush1.bf16.msra.mxu0 %v10287_v18  ;;  %v10292_v5 = vcombine.high %v10220_v7, %v10228_v63  ;;  %v10244_v18 = vld [vmem:[%s15697_s8 + $0x4e8] sm:$0xff]  ;;  %v10262_v7 = vld [vmem:[%s15697_s8 + $0x578] sm:$0xff] }
0x19c1   :  { %7415 = vmatprep.subr.bf16.mxu1 %v10302_v54  ;;  %7458 = vmatprep.subr.bf16.mxu0 %v10304_v56  ;;  %v10308_v53 = vcombine.high %v10236_v17, %v10244_v18  ;;  %v10307_v11 = vcombine.low %v10236_v17, %v10244_v18  ;;  %v10340_v54 = vcombine.high %v10268_v10, %v10276_v15  ;;  %v10221_v56 = vld [vmem:[%s15697_s8 + $0x430] sm:$0xff]  ;;  %v10278_v17 = vld [vmem:[%s15697_s8 + $0x5f8] sm:$0xff] }
0x19c2   :  { %7445 = vmatprep.mubr.bf16.mxu1 %v15749_v14  ;;  %7488 = vmatprep.mubr.bf16.mxu0 %v15749_v14  ;;  %v10293_v3 = vcombine.low %v10221_v56, %v10229_v9  ;;  %v10343_v20 = vcombine.low %v10270_v43, %v10278_v17 }
0x19c4   :  { %7416 = vmatpush1.bf16.msra.mxu1 %v10301_v36  ;;  %7459 = vmatpush1.bf16.msra.mxu0 %v10303_v31  ;;  %v10339_v36 = vcombine.low %v10268_v10, %v10276_v15  ;;  %v10294_v31 = vcombine.high %v10221_v56, %v10229_v9  ;;  %v12408_v10 = vld [vmem:[%s15699_s10 + $0x890] sm:$0xff]   ;;  %v12409_v15 = vld [vmem:[%s15699_s10 + $0x858] sm:$0xff]   ;;  %v12414_v56 = vld [vmem:[%s15699_s10 + $0x8e0] sm:$0xff]  }
0x19c5   :  { %7417 = vmatprep.subr.bf16.mxu1 %v10318_v16  ;;  %7460 = vmatprep.subr.bf16.mxu0 %v10320_v37  ;;  %v10296_v16 = vcombine.high %v10222_v35, %v10230_v29  ;;  %v10237_v37 = vld [vmem:[%s15697_s8 + $0x4b0] sm:$0xff]  ;;  %v12415_v9 = vld [vmem:[%s15699_s10 + $0x820] sm:$0xff]  }
0x19c6   :  { %v10309_v63 = vcombine.low %v10237_v37, %v10245_v33 }
0x19c8   :  { %7418 = vmatpush1.bf16.msra.mxu1 %v10317_v22  ;;  %7461 = vmatpush1.bf16.msra.mxu0 %v10319_v60  ;;  %v10295_v22 = vcombine.low %v10222_v35, %v10230_v29  ;;  %v10310_v60 = vcombine.high %v10237_v37, %v10245_v33  ;;  %v12416_v35 = vld [vmem:[%s15699_s10 + $0x8a0] sm:$0xff]   ;;  %v12417_v29 = vld [vmem:[%s15699_s10 + $0x868] sm:$0xff]   ;;  %v12422_v37 = vld [vmem:[%s15699_s10 + $0x8f0] sm:$0xff]  }
0x19c9   :  { %7419 = vmatprep.subr.bf16.mxu1 %v10334_v47  ;;  %7462 = vmatprep.subr.bf16.mxu0 %v10336_v13  ;;  %v10312_v47 = vcombine.high %v10238_v4, %v10246_v32  ;;  %v10253_v13 = vld [vmem:[%s15697_s8 + $0x530] sm:$0xff] }
0x19ca   :  { %v10325_v18 = vcombine.low %v10253_v13, %v10261_v8  ;;  %v12423_v33 = vld [vmem:[%s15699_s10 + $0x830] sm:$0xff]  }
0x19cc   :  { %7420 = vmatpush1.bf16.msra.mxu1 %v10333_v1  ;;  %7463 = vmatpush1.bf16.msra.mxu0 %v10335_v40  ;;  %v10311_v1 = vcombine.low %v10238_v4, %v10246_v32  ;;  %v10326_v40 = vcombine.high %v10253_v13, %v10261_v8  ;;  %v12424_v4 = vld [vmem:[%s15699_s10 + $0x8b0] sm:$0xff]   ;;  %v12425_v32 = vld [vmem:[%s15699_s10 + $0x878] sm:$0xff]   ;;  %v12430_v13 = vld [vmem:[%s15699_s10 + $0x9c0] sm:$0xff]  }
0x19cd   :  { %7499 = vmatprep.subr.bf16.mxu1 %v10290_v12  ;;  %7542 = vmatprep.subr.bf16.mxu0 %v10292_v5  ;;  %v10328_v12 = vcombine.high %v10254_v58, %v10262_v7  ;;  %v10269_v5 = vld [vmem:[%s15697_s8 + $0x5b0] sm:$0xff] }
0x19ce   :  { %v10279_v8 = vld [vmem:[%s15698_s9 + $0x2] ss:$4 sm:$0xff] }
0x19cf   :  { %10347 = vmatmul.mubr.msk.bf16.vlgmr.msra.gmra.mrb[104].mxu1 %vm296_vm11, %v15043_v57  ;;  %10348 = vmatmul.mubr.msk.bf16.vlgmr.msra.gmra.mrb[104].mxu0 %vm296_vm11, %v15043_v57 }
0x19d0   :  { %7500 = vmatpush1.bf16.msra.mxu1 %v10289_v26  ;;  %7543 = vmatpush1.bf16.msra.mxu0 %v10291_v38  ;;  %v10327_v26 = vcombine.low %v10254_v58, %v10262_v7  ;;  %v10342_v38 = vcombine.high %v10269_v5, %v10277_v19  ;;  %v6927_v58 = vrot.slane %v10279_v8, %v12876_v46 }
0x19d1   :  { %7501 = vmatprep.subr.bf16.mxu1 %v10306_v0  ;;  %7544 = vmatprep.subr.bf16.mxu0 %v10308_v53  ;;  %v10344_v0 = vcombine.high %v10270_v43, %v10278_v17  ;;  %v10341_v53 = vcombine.low %v10269_v5, %v10277_v19  ;;  %v6935_v7 = vrot.slane %v10279_v8, %v13462_v27 }
0x19d2   :  { %7531 = vmatprep.mubr.bf16.mxu1 %v15749_v14  ;;  %7574 = vmatprep.mubr.bf16.mxu0 %v15749_v14 }
0x19d4   :  { %7502 = vmatpush1.bf16.msra.mxu1 %v10305_v6  ;;  %7545 = vmatpush1.bf16.msra.mxu0 %v10307_v11  ;;  %v12401_v6 = vld [vmem:[%s15699_s10 + $0x848] sm:$0xff]  }
0x19d5   :  { %7503 = vmatprep.subr.bf16.mxu1 %v10322_v50  ;;  %7546 = vmatprep.subr.bf16.mxu0 %v10324_v55  ;;  %v12402_v11 = vld [vmem:[%s15699_s10 + $0x8c8] sm:$0xff]  }
0x19d6   :  { %v12403_v50 = vld [vmem:[%s15699_s10 + $0x808] sm:$0xff]  }
0x19d7   :  { %v12404_v55 = vld [vmem:[%s15699_s10 + $0x888] sm:$0xff]  }
0x19d8   :  { %7504 = vmatpush1.bf16.msra.mxu1 %v10321_v28  ;;  %7547 = vmatpush1.bf16.msra.mxu0 %v10323_v23  ;;  %v12410_v28 = vld [vmem:[%s15699_s10 + $0x8d8] sm:$0xff]  }
0x19d9   :  { %7505 = vmatprep.subr.bf16.mxu1 %v10338_v51  ;;  %7548 = vmatprep.subr.bf16.mxu0 %v10340_v54  ;;  %v12411_v23 = vld [vmem:[%s15699_s10 + $0x818] sm:$0xff]   ;;  %v12413_v54 = vld [vmem:[%s15699_s10 + $0x860] sm:$0xff]  }
0x19da   :  { %v12412_v51 = vld [vmem:[%s15699_s10 + $0x898] sm:$0xff]  }
0x19dc   :  { %7506 = vmatpush1.bf16.msra.mxu1 %v10337_v30  ;;  %7549 = vmatpush1.bf16.msra.mxu0 %v10339_v36  ;;  %v12418_v30 = vld [vmem:[%s15699_s10 + $0x8e8] sm:$0xff]  }
0x19dd   :  { %7585 = vmatprep.subr.bf16.mxu1 %v10294_v31  ;;  %7628 = vmatprep.subr.bf16.mxu0 %v10296_v16  ;;  %v12419_v36 = vld [vmem:[%s15699_s10 + $0x828] sm:$0xff]   ;;  %v12421_v16 = vld [vmem:[%s15699_s10 + $0x870] sm:$0xff]  }
0x19de   :  { %v12420_v31 = vld [vmem:[%s15699_s10 + $0x8a8] sm:$0xff]  }
0x19df   :  { %10349 = vmatmul.mubr.msk.bf16.vlgmr.msra.gmra.mrb[108].mxu1 %vm296_vm11, %v15043_v57  ;;  %10350 = vmatmul.mubr.msk.bf16.vlgmr.msra.gmra.mrb[108].mxu0 %vm296_vm11, %v15043_v57 }
0x19e0   :  { %7586 = vmatpush1.bf16.msra.mxu1 %v10293_v3  ;;  %7629 = vmatpush1.bf16.msra.mxu0 %v10295_v22  ;;  %v12426_v3 = vld [vmem:[%s15699_s10 + $0x8f8] sm:$0xff]  }
0x19e1   :  { %7587 = vmatprep.subr.bf16.mxu1 %v10310_v60  ;;  %7630 = vmatprep.subr.bf16.mxu0 %v10312_v47  ;;  %v12427_v22 = vld [vmem:[%s15699_s10 + $0x838] sm:$0xff]   ;;  %v12429_v47 = vld [vmem:[%s15699_s10 + $0x940] sm:$0xff]  }
0x19e2   :  { %7617 = vmatprep.mubr.bf16.mxu1 %v15749_v14  ;;  %7660 = vmatprep.mubr.bf16.mxu0 %v15749_v14  ;;  %v12398_v14 = vld [vmem:[%s15699_s10 + $0x8c0] sm:$0xff]   ;;  %v12428_v60 = vld [vmem:[%s15699_s10 + $0x8b8] sm:$0xff]  }
0x19e4   :  { %7588 = vmatpush1.bf16.msra.mxu1 %v10309_v63  ;;  %7631 = vmatpush1.bf16.msra.mxu0 %v10311_v1  ;;  %v6931_v63 = vrot.slane %v10279_v8, %v12883_v49  ;;  %v6939_v1 = vrot.slane %v10279_v8, %v13468_v59 }
0x19e5   :  { %7589 = vmatprep.subr.bf16.mxu1 %v10326_v40  ;;  %7632 = vmatprep.subr.bf16.mxu0 %v10328_v12 }
0x19e8   :  { %7590 = vmatpush1.bf16.msra.mxu1 %v10325_v18  ;;  %7633 = vmatpush1.bf16.msra.mxu0 %v10327_v26 }
0x19e9   :  { %7591 = vmatprep.subr.bf16.mxu1 %v10342_v38  ;;  %7634 = vmatprep.subr.bf16.mxu0 %v10344_v0 }
0x19ec   :  { %7592 = vmatpush1.bf16.msra.mxu1 %v10341_v53  ;;  %7635 = vmatpush1.bf16.msra.mxu0 %v10343_v20 }
0x19ed   :  { %11240 = vmatprep.subr.bf16.mxu1 %v12397_v45  ;;  %11262 = vmatprep.subr.bf16.mxu0 %v12398_v14 }
0x19ef   :  { %10351 = vmatmul.mubr.msk.bf16.vlgmr.msra.gmra.mrb[112].mxu1 %vm296_vm11, %v15043_v57  ;;  %10352 = vmatmul.mubr.msk.bf16.vlgmr.msra.gmra.mrb[112].mxu0 %vm296_vm11, %v15043_v57  ;;  %v12406_v57 = vld [vmem:[%s15699_s10 + $0x8d0] sm:$0xff]  }
0x19f0   :  { %11241 = vmatpush3.bf16.msra.mxu1 %v12399_v61  ;;  %11263 = vmatpush3.bf16.msra.mxu0 %v12400_v2 }
0x19f1   :  { %11242 = vmatprep.subr.bf16.mxu1 %v12401_v6  ;;  %11264 = vmatprep.subr.bf16.mxu0 %v12402_v11 }
0x19f4   :  { %11243 = vmatpush3.bf16.msra.mxu1 %v12403_v50  ;;  %11265 = vmatpush3.bf16.msra.mxu0 %v12404_v55 }
0x19f5   :  { %11244 = vmatprep.subr.bf16.mxu1 %v12405_v39  ;;  %11266 = vmatprep.subr.bf16.mxu0 %v12406_v57 }
0x19f8   :  { %11245 = vmatpush3.bf16.msra.mxu1 %v12407_v21  ;;  %11267 = vmatpush3.bf16.msra.mxu0 %v12408_v10 }
0x19f9   :  { %11246 = vmatprep.subr.bf16.mxu1 %v12409_v15  ;;  %11268 = vmatprep.subr.bf16.mxu0 %v12410_v28 }
0x19fc   :  { %11247 = vmatpush3.bf16.msra.mxu1 %v12411_v23  ;;  %11269 = vmatpush3.bf16.msra.mxu0 %v12412_v51 }
0x19fd   :  { %11248 = vmatprep.subr.bf16.mxu1 %v12413_v54  ;;  %11270 = vmatprep.subr.bf16.mxu0 %v12414_v56  ;;  %v12431_v54 = vld [vmem:[%s15699_s10 + $0x900] sm:$0xff]  }
0x19fe   :  { %v12432_v56 = vld [vmem:[%s15699_s10 + $0x980] sm:$0xff]  }
0x1a00   :  { %11249 = vmatpush3.bf16.msra.mxu1 %v12415_v9  ;;  %11271 = vmatpush3.bf16.msra.mxu0 %v12416_v35  ;;  %v12433_v9 = vld [vmem:[%s15699_s10 + $0x948] sm:$0xff]  }
0x1a01   :  { %11250 = vmatprep.subr.bf16.mxu1 %v12417_v29  ;;  %11272 = vmatprep.subr.bf16.mxu0 %v12418_v30  ;;  %v12434_v35 = vld [vmem:[%s15699_s10 + $0x9c8] sm:$0xff]  }
0x1a02   :  { %v12435_v29 = vld [vmem:[%s15699_s10 + $0x908] sm:$0xff]  }
0x1a03   :  { %v12436_v30 = vld [vmem:[%s15699_s10 + $0x988] sm:$0xff]  }
0x1a04   :  { %11251 = vmatpush3.bf16.msra.mxu1 %v12419_v36  ;;  %11273 = vmatpush3.bf16.msra.mxu0 %v12420_v31  ;;  %v6943_v36 = vrot.slane %v10279_v8, %v13487_v62  ;;  %v6951_v31 = vrot.slane %v10279_v8, %v13490_v42 }
0x1a05   :  { %11252 = vmatprep.subr.bf16.mxu1 %v12421_v16  ;;  %11274 = vmatprep.subr.bf16.mxu0 %v12422_v37  ;;  %v12437_v16 = vld [vmem:[%s15699_s10 + $0x950] sm:$0xff]  }
0x1a06   :  { %v12438_v37 = vld [vmem:[%s15699_s10 + $0x9d0] sm:$0xff]  }
0x1a08   :  { %11253 = vmatpush3.bf16.msra.mxu1 %v12423_v33  ;;  %11275 = vmatpush3.bf16.msra.mxu0 %v12424_v4  ;;  %v6947_v33 = vrot.slane %v10279_v8, %v13493_v48  ;;  %v6955_v4 = vrot.slane %v10279_v8, %v13496_v52  ;;  %v12441_v8 = vld [vmem:[%s15699_s10 + $0x958] sm:$0xff]  }
0x1a09   :  { %11254 = vmatprep.subr.bf16.mxu1 %v12425_v32  ;;  %11276 = vmatprep.subr.bf16.mxu0 %v12426_v3 }
0x1a0c   :  { %11255 = vmatpush3.bf16.msra.mxu1 %v12427_v22  ;;  %11277 = vmatpush3.bf16.msra.mxu0 %v12428_v60  ;;  %v12439_v22 = vld [vmem:[%s15699_s10 + $0x910] sm:$0xff]  }
0x1a0d   :  { %11284 = vmatprep.subr.bf16.mxu1 %v12429_v47  ;;  %11306 = vmatprep.subr.bf16.mxu0 %v12430_v13  ;;  %v12440_v60 = vld [vmem:[%s15699_s10 + $0x990] sm:$0xff]  }
0x1a92   :  { %v7361_v40 = vpop.f32.mrb[100].mxu1  ;;  %v7404_v12 = vpop.f32.mrb[100].mxu0 }
0x1a93   :  { %v7362_v5 = vadd.f32 %v7361_v40, %v6927_v58  ;;  %v7405_v19 = vadd.f32 %v7404_v12, %v6935_v7  ;;  %v7363_v43 = vpop.f32.mrb[101].mxu1  ;;  %v7406_v17 = vpop.f32.mrb[101].mxu0 }
0x1a94   :  { %v7364_v18 = vadd.f32 %v7363_v43, %v6931_v63  ;;  %v7407_v26 = vadd.f32 %v7406_v17, %v6939_v1  ;;  %v7365_v38 = vpop.f32.mrb[102].mxu1  ;;  %v7408_v0 = vpop.f32.mrb[102].mxu0 }
0x1a95   :  { %v7366_v53 = vadd.f32 %v7365_v38, %v6927_v58  ;;  %v7409_v20 = vadd.f32 %v7408_v0, %v6935_v7  ;;  %v7367_v45 = vpop.f32.mrb[103].mxu1  ;;  %v7410_v14 = vpop.f32.mrb[103].mxu0  ;;  %v7671_v6 = vmax.f32 %v7362_v5, 0.0  ;;  %v7673_v11 = vmax.f32 %v7405_v19, 0.0  ;;  %v12443_v0 = vld [vmem:[%s15699_s10 + $0x918] sm:$0xff]  }
0x1a96   :  { %v7368_v61 = vadd.f32 %v7367_v45, %v6931_v63  ;;  %v7411_v2 = vadd.f32 %v7410_v14, %v6939_v1  ;;  %v7672_v39 = vmax.f32 %v7364_v18, 0.0  ;;  %v7674_v57 = vmax.f32 %v7407_v26, 0.0  ;;  %v12442_v63 = vld [vmem:[%s15699_s10 + $0x9d8] sm:$0xff]  }
0x1a97   :  { %v7687_v50 = vmax.f32 %v7366_v53, 0.0  ;;  %v7689_v55 = vmax.f32 %v7409_v20, 0.0  ;;  %v12444_v53 = vld [vmem:[%s15699_s10 + $0x998] sm:$0xff]  }
0x1a98   :  { %v7688_v21 = vmax.f32 %v7368_v61, 0.0  ;;  %v7690_v10 = vmax.f32 %v7411_v2, 0.0  ;;  %v12445_v2 = vld [vmem:[%s15699_s10 + $0x960] sm:$0xff]  }
0x1a99   :  { %v7703_v15 = vpack.c.bf16 %v7687_v50, %v7671_v6  ;;  %v7705_v28 = vpack.c.bf16 %v7689_v55, %v7673_v11  ;;  %v12446_v6 = vld [vmem:[%s15699_s10 + $0x9e0] sm:$0xff]  }
0x1a9a   :  { %v7704_v23 = vpack.c.bf16 %v7688_v21, %v7672_v39  ;;  %v7706_v51 = vpack.c.bf16 %v7690_v10, %v7674_v57 }
0x1a9c   :  { %8781 = vmatprep.mubr.bf16.mxu1 %v7704_v23  ;;  %8822 = vmatprep.mubr.bf16.mxu0 %v7706_v51  ;;  %v12448_v23 = vld [vmem:[%s15699_s10 + $0x9a0] sm:$0xff]   ;;  %v12449_v51 = vld [vmem:[%s15699_s10 + $0x968] sm:$0xff]  }
0x1a9d   :  { %8782 = vmatmul.mubr.bf16.vlgmr.msra.gmra.mrb[116].mxu1 %v7703_v15  ;;  %8823 = vmatmul.mubr.bf16.vlgmr.msra.gmra.mrb[116].mxu0 %v7705_v28  ;;  %v12447_v28 = vld [vmem:[%s15699_s10 + $0x920] sm:$0xff]  }
0x1a9e   :  { %11285 = vmatpush3.bf16.msra.mxu1 %v12431_v54  ;;  %11307 = vmatpush3.bf16.msra.mxu0 %v12432_v56  ;;  %v12450_v54 = vld [vmem:[%s15699_s10 + $0x9e8] sm:$0xff]  }
0x1a9f   :  { %11286 = vmatprep.subr.bf16.mxu1 %v12433_v9  ;;  %11308 = vmatprep.subr.bf16.mxu0 %v12434_v35  ;;  %v15367_v56 = vld [vmem:[%s15698_s9 + $0x22] ss:$4 sm:$0xff] }
0x1aa0   :  { %v12451_v9 = vld [vmem:[%s15699_s10 + $0x928] sm:$0xff]  }
0x1aa1   :  { %v12452_v35 = vld [vmem:[%s15699_s10 + $0x9a8] sm:$0xff]  }
0x1aa2   :  { %v7447_v32 = vpop.f32.mrb[104].mxu1  ;;  %v7490_v3 = vpop.f32.mrb[104].mxu0  ;;  %11287 = vmatpush3.bf16.msra.mxu1 %v12435_v29  ;;  %11309 = vmatpush3.bf16.msra.mxu0 %v12436_v30  ;;  %v6959_v29 = vrot.slane %v15367_v56, %v12876_v46  ;;  %v6967_v30 = vrot.slane %v15367_v56, %v13462_v27  ;;  %v12455_v46 = vld [vmem:[%s15699_s10 + $0x930] sm:$0xff]  }
0x1aa3   :  { %v7448_v47 = vadd.f32 %v7447_v32, %v6943_v36  ;;  %v7491_v13 = vadd.f32 %v7490_v3, %v6951_v31  ;;  %v7449_v58 = vpop.f32.mrb[105].mxu1  ;;  %v7492_v7 = vpop.f32.mrb[105].mxu0  ;;  %11288 = vmatprep.subr.bf16.mxu1 %v12437_v16  ;;  %11310 = vmatprep.subr.bf16.mxu0 %v12438_v37  ;;  %v6963_v16 = vrot.slane %v15367_v56, %v12883_v49  ;;  %v12456_v27 = vld [vmem:[%s15699_s10 + $0x9b0] sm:$0xff]   ;;  %v12457_v49 = vld [vmem:[%s15699_s10 + $0x978] sm:$0xff]  }
0x1aa4   :  { %v7450_v1 = vadd.f32 %v7449_v58, %v6947_v33  ;;  %v7493_v40 = vadd.f32 %v7492_v7, %v6955_v4  ;;  %v7451_v12 = vpop.f32.mrb[106].mxu1  ;;  %v7494_v5 = vpop.f32.mrb[106].mxu0  ;;  %v6971_v37 = vrot.slane %v15367_v56, %v13468_v59  ;;  %v12458_v59 = vld [vmem:[%s15699_s10 + $0x9f8] sm:$0xff]  }
0x1aa5   :  { %v7452_v19 = vadd.f32 %v7451_v12, %v6943_v36  ;;  %v7495_v43 = vadd.f32 %v7494_v5, %v6951_v31  ;;  %v7453_v17 = vpop.f32.mrb[107].mxu1  ;;  %v7496_v18 = vpop.f32.mrb[107].mxu0  ;;  %v7675_v20 = vmax.f32 %v7448_v47, 0.0  ;;  %v7677_v45 = vmax.f32 %v7491_v13, 0.0  ;;  %v12453_v36 = vld [vmem:[%s15699_s10 + $0x970] sm:$0xff]  }
0x1aa6   :  { %v7454_v26 = vadd.f32 %v7453_v17, %v6947_v33  ;;  %v7497_v38 = vadd.f32 %v7496_v18, %v6955_v4  ;;  %11289 = vmatpush3.bf16.msra.mxu1 %v12439_v22  ;;  %11311 = vmatpush3.bf16.msra.mxu0 %v12440_v60  ;;  %v7676_v11 = vmax.f32 %v7450_v1, 0.0  ;;  %v7678_v50 = vmax.f32 %v7493_v40, 0.0  ;;  %v12454_v31 = vld [vmem:[%s15699_s10 + $0x9f0] sm:$0xff]  }
0x1aa7   :  { %v7691_v14 = vmax.f32 %v7452_v19, 0.0  ;;  %v7693_v61 = vmax.f32 %v7495_v43, 0.0  ;;  %11290 = vmatprep.subr.bf16.mxu1 %v12441_v8  ;;  %11312 = vmatprep.subr.bf16.mxu0 %v12442_v63  ;;  %v12459_v19 = vld [vmem:[%s15699_s10 + $0x938] sm:$0xff]  }
0x1aa8   :  { %v7692_v55 = vmax.f32 %v7454_v26, 0.0  ;;  %v7694_v39 = vmax.f32 %v7497_v38, 0.0  ;;  %v12460_v43 = vld [vmem:[%s15699_s10 + $0x9b8] sm:$0xff]  }
0x1aa9   :  { %v15348_v57 = vpack.c.bf16 %v7691_v14, %v7675_v20  ;;  %v15350_v21 = vpack.c.bf16 %v7693_v61, %v7677_v45 }
0x1aaa   :  { %v7708_v10 = vpack.c.bf16 %v7692_v55, %v7676_v11  ;;  %v7710_v15 = vpack.c.bf16 %v7694_v39, %v7678_v50  ;;  %11291 = vmatpush3.bf16.msra.mxu1 %v12443_v0  ;;  %11313 = vmatpush3.bf16.msra.mxu0 %v12444_v53  ;;  %v12461_v0 = vld [vmem:[%s15699_s10 + $0xa40] sm:$0xff]  }
0x1aab   :  { %11292 = vmatprep.subr.bf16.mxu1 %v12445_v2  ;;  %11314 = vmatprep.subr.bf16.mxu0 %v12446_v6  ;;  %v12462_v53 = vld [vmem:[%s15699_s10 + $0xac0] sm:$0xff]  }
0x1aac   :  { %8863 = vmatprep.mubr.bf16.mxu1 %v7708_v10  ;;  %8904 = vmatprep.mubr.bf16.mxu0 %v7710_v15  ;;  %v12463_v55 = vld [vmem:[%s15699_s10 + $0xa00] sm:$0xff]   ;;  %v12465_v10 = vld [vmem:[%s15699_s10 + $0xa48] sm:$0xff]  }
0x1aad   :  { %v12464_v39 = vld [vmem:[%s15699_s10 + $0xa80] sm:$0xff]   ;;  %v12466_v15 = vld [vmem:[%s15699_s10 + $0xac8] sm:$0xff]  }
0x1aae   :  { %11293 = vmatpush3.bf16.msra.mxu1 %v12447_v28  ;;  %11315 = vmatpush3.bf16.msra.mxu0 %v12448_v23  ;;  %v12467_v28 = vld [vmem:[%s15699_s10 + $0xa08] sm:$0xff]   ;;  %v6975_v23 = vrot.slane %v15367_v56, %v13487_v62  ;;  %v12470_v62 = vld [vmem:[%s15699_s10 + $0xad0] sm:$0xff]  }
0x1aaf   :  { %11294 = vmatprep.subr.bf16.mxu1 %v12449_v51  ;;  %11316 = vmatprep.subr.bf16.mxu0 %v12450_v54  ;;  %v6983_v51 = vrot.slane %v15367_v56, %v13490_v42  ;;  %v6979_v54 = vrot.slane %v15367_v56, %v13493_v48  ;;  %v12472_v48 = vld [vmem:[%s15699_s10 + $0xa90] sm:$0xff]  }
0x1ab2   :  { %v7533_v33 = vpop.f32.mrb[108].mxu1  ;;  %v7576_v4 = vpop.f32.mrb[108].mxu0  ;;  %11295 = vmatpush3.bf16.msra.mxu1 %v12451_v9  ;;  %11317 = vmatpush3.bf16.msra.mxu0 %v12452_v35  ;;  %v6987_v9 = vrot.slane %v15367_v56, %v13496_v52  ;;  %v12473_v52 = vld [vmem:[%s15699_s10 + $0xa58] sm:$0xff]  }
0x1ab3   :  { %v7534_v32 = vadd.f32 %v7533_v33, %v6959_v29  ;;  %v7577_v3 = vadd.f32 %v7576_v4, %v6967_v30  ;;  %v7535_v22 = vpop.f32.mrb[109].mxu1  ;;  %v7578_v60 = vpop.f32.mrb[109].mxu0  ;;  %11296 = vmatprep.subr.bf16.mxu1 %v12453_v36  ;;  %11318 = vmatprep.subr.bf16.mxu0 %v12454_v31 }
0x1ab4   :  { %v7536_v47 = vadd.f32 %v7535_v22, %v6963_v16  ;;  %v7579_v13 = vadd.f32 %v7578_v60, %v6971_v37  ;;  %v7537_v58 = vpop.f32.mrb[110].mxu1  ;;  %v7580_v7 = vpop.f32.mrb[110].mxu0 }
0x1ab5   :  { %v7538_v8 = vadd.f32 %v7537_v58, %v6959_v29  ;;  %v7581_v63 = vadd.f32 %v7580_v7, %v6967_v30  ;;  %v7539_v1 = vpop.f32.mrb[111].mxu1  ;;  %v7582_v40 = vpop.f32.mrb[111].mxu0  ;;  %v7679_v17 = vmax.f32 %v7534_v32, 0.0  ;;  %v7681_v18 = vmax.f32 %v7577_v3, 0.0  ;;  %v12471_v29 = vld [vmem:[%s15699_s10 + $0xa10] sm:$0xff]  }
0x1ab6   :  { %v7540_v12 = vadd.f32 %v7539_v1, %v6963_v16  ;;  %v7583_v5 = vadd.f32 %v7582_v40, %v6971_v37  ;;  %11297 = vmatpush3.bf16.msra.mxu1 %v12455_v46  ;;  %11319 = vmatpush3.bf16.msra.mxu0 %v12456_v27  ;;  %v7680_v20 = vmax.f32 %v7536_v47, 0.0  ;;  %v7682_v45 = vmax.f32 %v7579_v13, 0.0  ;;  %v12474_v46 = vld [vmem:[%s15699_s10 + $0xad8] sm:$0xff]  }
0x1ab7   :  { %v7695_v26 = vmax.f32 %v7538_v8, 0.0  ;;  %v7697_v38 = vmax.f32 %v7581_v63, 0.0  ;;  %11298 = vmatprep.subr.bf16.mxu1 %v12457_v49  ;;  %11320 = vmatprep.subr.bf16.mxu0 %v12458_v59  ;;  %v12475_v59 = vld [vmem:[%s15699_s10 + $0xa18] sm:$0xff]   ;;  %v12477_v63 = vld [vmem:[%s15699_s10 + $0xa60] sm:$0xff]  }
0x1ab8   :  { %v7696_v14 = vmax.f32 %v7540_v12, 0.0  ;;  %v7698_v61 = vmax.f32 %v7583_v5, 0.0  ;;  %v12476_v8 = vld [vmem:[%s15699_s10 + $0xa98] sm:$0xff]  }
0x1ab9   :  { %v15413_v2 = vpack.c.bf16 %v7695_v26, %v7679_v17  ;;  %v15415_v6 = vpack.c.bf16 %v7697_v38, %v7681_v18  ;;  %v12479_v38 = vld [vmem:[%s15699_s10 + $0xa20] sm:$0xff]  }
0x1aba   :  { %v7712_v11 = vpack.c.bf16 %v7696_v14, %v7680_v20  ;;  %v7714_v50 = vpack.c.bf16 %v7698_v61, %v7682_v45  ;;  %11299 = vmatpush3.bf16.msra.mxu1 %v12459_v19  ;;  %11321 = vmatpush3.bf16.msra.mxu0 %v12460_v43  ;;  %v12478_v19 = vld [vmem:[%s15699_s10 + $0xae0] sm:$0xff]   ;;  %v12482_v20 = vld [vmem:[%s15699_s10 + $0xae8] sm:$0xff]   ;;  %v12485_v61 = vld [vmem:[%s15699_s10 + $0xa70] sm:$0xff]  }
0x1abb   :  { %11328 = vmatprep.subr.bf16.mxu1 %v12461_v0  ;;  %11350 = vmatprep.subr.bf16.mxu0 %v12462_v53  ;;  %v12480_v0 = vld [vmem:[%s15699_s10 + $0xaa0] sm:$0xff]   ;;  %v12481_v53 = vld [vmem:[%s15699_s10 + $0xa68] sm:$0xff]  }
0x1abc   :  { %v12483_v45 = vld [vmem:[%s15699_s10 + $0xa28] sm:$0xff]  }
0x1abd   :  { %8864 = vmatmul.mubr.bf16.vlgmr.msra.gmra.mrb[120].mxu1 %v15348_v57  ;;  %8905 = vmatmul.mubr.bf16.vlgmr.msra.gmra.mrb[120].mxu0 %v15350_v21  ;;  %v12468_v57 = vld [vmem:[%s15699_s10 + $0xa88] sm:$0xff]   ;;  %v12469_v21 = vld [vmem:[%s15699_s10 + $0xa50] sm:$0xff]  }
0x1abe   :  { %11329 = vmatpush3.bf16.msra.mxu1 %v12463_v55  ;;  %8945 = vmatprep.mubr.bf16.mxu1 %v7712_v11  ;;  %v12484_v14 = vld [vmem:[%s15699_s10 + $0xaa8] sm:$0xff]   ;;  %v12486_v11 = vld [vmem:[%s15699_s10 + $0xaf0] sm:$0xff]  }
0x1abf   :  { %11351 = vmatpush3.bf16.msra.mxu0 %v12464_v39  ;;  %8986 = vmatprep.mubr.bf16.mxu0 %v7714_v50  ;;  %v12487_v50 = vld [vmem:[%s15699_s10 + $0xa30] sm:$0xff]   ;;  %v12489_v39 = vld [vmem:[%s15699_s10 + $0xa78] sm:$0xff]  }
0x1ac0   :  { %11330 = vmatprep.subr.bf16.mxu1 %v12465_v10  ;;  %11352 = vmatprep.subr.bf16.mxu0 %v12466_v15  ;;  %v12488_v55 = vld [vmem:[%s15699_s10 + $0xab0] sm:$0xff]   ;;  %v12490_v10 = vld [vmem:[%s15699_s10 + $0xaf8] sm:$0xff]  }
0x1ac1   :  { %v12491_v15 = vld [vmem:[%s15699_s10 + $0xa38] sm:$0xff]  }
0x1ac2   :  { %v7619_v42 = vpop.f32.mrb[112].mxu1  ;;  %v7662_v35 = vpop.f32.mrb[112].mxu0  ;;  %11331 = vmatpush3.bf16.msra.mxu1 %v12467_v28  ;;  %v12492_v28 = vld [vmem:[%s15699_s10 + $0xab8] sm:$0xff]  }
0x1ac3   :  { %v7620_v30 = vadd.f32 %v7619_v42, %v6975_v23  ;;  %v7663_v36 = vadd.f32 %v7662_v35, %v6983_v51  ;;  %11353 = vmatpush3.bf16.msra.mxu0 %v12468_v57  ;;  %v7621_v31 = vpop.f32.mrb[113].mxu1  ;;  %v7664_v16 = vpop.f32.mrb[113].mxu0  ;;  %11332 = vmatprep.subr.bf16.mxu1 %v12469_v21  ;;  %v12495_v57 = vld [vmem:[%s15699_s10 + $0xb00] sm:$0xff]   ;;  %v12500_v42 = vld [vmem:[%s15699_s10 + $0xb88] sm:$0xff]   ;;  %v12503_v35 = vld [vmem:[%s15699_s10 + $0xb10] sm:$0xff]  }
0x1ac4   :  { %v7622_v56 = vadd.f32 %v7621_v31, %v6979_v54  ;;  %v7665_v37 = vadd.f32 %v7664_v16, %v6987_v9  ;;  %v7623_v33 = vpop.f32.mrb[114].mxu1  ;;  %v7666_v4 = vpop.f32.mrb[114].mxu0  ;;  %11354 = vmatprep.subr.bf16.mxu0 %v12470_v62  ;;  %v12496_v21 = vld [vmem:[%s15699_s10 + $0xb80] sm:$0xff]   ;;  %v12499_v62 = vld [vmem:[%s15699_s10 + $0xb08] sm:$0xff]   ;;  %v12507_v31 = vld [vmem:[%s15699_s10 + $0xb18] sm:$0xff]  }
0x1ac5   :  { %v7624_v27 = vadd.f32 %v7623_v33, %v6975_v23  ;;  %v7667_v32 = vadd.f32 %v7666_v4, %v6983_v51  ;;  %v7625_v3 = vpop.f32.mrb[115].mxu1  ;;  %v7668_v22 = vpop.f32.mrb[115].mxu0  ;;  %v7683_v47 = vmax.f32 %v7620_v30, 0.0  ;;  %v7685_v13 = vmax.f32 %v7663_v36, 0.0  ;;  %v12493_v23 = vld [vmem:[%s15699_s10 + $0xb40] sm:$0xff]   ;;  %v12505_v30 = vld [vmem:[%s15699_s10 + $0xb58] sm:$0xff]  }
0x1ac6   :  { %v7626_v60 = vadd.f32 %v7625_v3, %v6979_v54  ;;  %v7669_v49 = vadd.f32 %v7668_v22, %v6987_v9  ;;  %11333 = vmatpush3.bf16.msra.mxu1 %v12471_v29  ;;  %v7684_v1 = vmax.f32 %v7622_v56, 0.0  ;;  %v7686_v40 = vmax.f32 %v7665_v37, 0.0  ;;  %v12494_v51 = vld [vmem:[%s15699_s10 + $0xbc0] sm:$0xff]   ;;  %v12497_v54 = vld [vmem:[%s15699_s10 + $0xb48] sm:$0xff]   ;;  %v12504_v29 = vld [vmem:[%s15699_s10 + $0xb90] sm:$0xff]  }
0x1ac7   :  { %v7699_v58 = vmax.f32 %v7624_v27, 0.0  ;;  %v7701_v7 = vmax.f32 %v7667_v32, 0.0  ;;  %11355 = vmatpush3.bf16.msra.mxu0 %v12472_v48  ;;  %11334 = vmatprep.subr.bf16.mxu1 %v12473_v52  ;;  %v12498_v9 = vld [vmem:[%s15699_s10 + $0xbc8] sm:$0xff]   ;;  %v12506_v36 = vld [vmem:[%s15699_s10 + $0xbd8] sm:$0xff]   ;;  %v12509_v48 = vld [vmem:[%s15699_s10 + $0xb60] sm:$0xff]  }
0x1ac8   :  { %v7700_v12 = vmax.f32 %v7626_v60, 0.0  ;;  %v7702_v5 = vmax.f32 %v7669_v49, 0.0  ;;  %11356 = vmatprep.subr.bf16.mxu0 %v12474_v46  ;;  %v12508_v16 = vld [vmem:[%s15699_s10 + $0xb98] sm:$0xff]   ;;  %v12510_v52 = vld [vmem:[%s15699_s10 + $0xbe0] sm:$0xff]   ;;  %v12513_v33 = vld [vmem:[%s15699_s10 + $0xb68] sm:$0xff]  }
0x1ac9   :  { %v15475_v43 = vpack.c.bf16 %v7699_v58, %v7683_v47  ;;  %v15477_v17 = vpack.c.bf16 %v7701_v7, %v7685_v13  ;;  %v12511_v56 = vld [vmem:[%s15699_s10 + $0xb20] sm:$0xff]   ;;  %v12514_v4 = vld [vmem:[%s15699_s10 + $0xbe8] sm:$0xff]   ;;  %v12517_v32 = vld [vmem:[%s15699_s10 + $0xb70] sm:$0xff]  }
0x1aca   :  { %v7716_v18 = vpack.c.bf16 %v7700_v12, %v7684_v1  ;;  %v7718_v26 = vpack.c.bf16 %v7702_v5, %v7686_v40  ;;  %11335 = vmatpush3.bf16.msra.mxu1 %v12475_v59  ;;  %v12512_v37 = vld [vmem:[%s15699_s10 + $0xba0] sm:$0xff]   ;;  %v12515_v46 = vld [vmem:[%s15699_s10 + $0xb28] sm:$0xff]   ;;  %v12518_v3 = vld [vmem:[%s15699_s10 + $0xbf0] sm:$0xff]  }
0x1acb   :  { %11357 = vmatpush3.bf16.msra.mxu0 %v12476_v8  ;;  %11336 = vmatprep.subr.bf16.mxu1 %v12477_v63  ;;  %v12516_v27 = vld [vmem:[%s15699_s10 + $0xba8] sm:$0xff]   ;;  %v12519_v22 = vld [vmem:[%s15699_s10 + $0xb30] sm:$0xff]   ;;  %v12521_v49 = vld [vmem:[%s15699_s10 + $0xb78] sm:$0xff]  }
0x1acc   :  { %11358 = vmatprep.subr.bf16.mxu0 %v12478_v19  ;;  %v12520_v60 = vld [vmem:[%s15699_s10 + $0xbb0] sm:$0xff]   ;;  %v12522_v59 = vld [vmem:[%s15699_s10 + $0xbf8] sm:$0xff]   ;;  %v10609_v8 = vld [vmem:[%s15700_s11 + $0x2] ss:$0 sm:$0xff] }
0x1acd   :  { %v12523_v47 = vld [vmem:[%s15699_s10 + $0xb38] sm:$0xff]  }
0x1ace   :  { %11337 = vmatpush3.bf16.msra.mxu1 %v12479_v38  ;;  %v12524_v13 = vld [vmem:[%s15699_s10 + $0xbb8] sm:$0xff]  }
0x1acf   :  { %11359 = vmatpush3.bf16.msra.mxu0 %v12480_v0  ;;  %11338 = vmatprep.subr.bf16.mxu1 %v12481_v53 }
0x1ad0   :  { %11360 = vmatprep.subr.bf16.mxu0 %v12482_v20 }
0x1ad2   :  { %11339 = vmatpush3.bf16.msra.mxu1 %v12483_v45 }
0x1ad3   :  { %11361 = vmatpush3.bf16.msra.mxu0 %v12484_v14  ;;  %11340 = vmatprep.subr.bf16.mxu1 %v12485_v61 }
0x1ad4   :  { %11362 = vmatprep.subr.bf16.mxu0 %v12486_v11 }
0x1ad6   :  { %11341 = vmatpush3.bf16.msra.mxu1 %v12487_v50 }
0x1ad7   :  { %11363 = vmatpush3.bf16.msra.mxu0 %v12488_v55  ;;  %11342 = vmatprep.subr.bf16.mxu1 %v12489_v39 }
0x1ad8   :  { %11364 = vmatprep.subr.bf16.mxu0 %v12490_v10 }
0x1ada   :  { %11343 = vmatpush3.bf16.msra.mxu1 %v12491_v15 }
0x1adb   :  { %11365 = vmatpush3.bf16.msra.mxu0 %v12492_v28  ;;  %11372 = vmatprep.subr.bf16.mxu1 %v12493_v23 }
0x1adc   :  { %11394 = vmatprep.subr.bf16.mxu0 %v12494_v51 }
0x1add   :  { %8946 = vmatmul.mubr.bf16.vlgmr.msra.gmra.mrb[124].mxu1 %v15413_v2  ;;  %v12501_v2 = vld [vmem:[%s15699_s10 + $0xb50] sm:$0xff]  }
0x1ade   :  { %8987 = vmatmul.mubr.bf16.vlgmr.msra.gmra.mrb[124].mxu0 %v15415_v6  ;;  %11373 = vmatpush3.bf16.msra.mxu1 %v12495_v57  ;;  %v12502_v6 = vld [vmem:[%s15699_s10 + $0xbd0] sm:$0xff]  }
0x1adf   :  { %9027 = vmatprep.mubr.bf16.mxu1 %v7716_v18  ;;  %11395 = vmatpush3.bf16.msra.mxu0 %v12496_v21 }
0x1ae0   :  { %9068 = vmatprep.mubr.bf16.mxu0 %v7718_v26  ;;  %11374 = vmatprep.subr.bf16.mxu1 %v12497_v54 }
0x1ae1   :  { %11396 = vmatprep.subr.bf16.mxu0 %v12498_v9 }
0x1ae2   :  { %11375 = vmatpush3.bf16.msra.mxu1 %v12499_v62 }
0x1ae3   :  { %11397 = vmatpush3.bf16.msra.mxu0 %v12500_v42  ;;  %11376 = vmatprep.subr.bf16.mxu1 %v12501_v2 }
0x1ae4   :  { %11398 = vmatprep.subr.bf16.mxu0 %v12502_v6 }
0x1ae6   :  { %11377 = vmatpush3.bf16.msra.mxu1 %v12503_v35 }
0x1ae7   :  { %11399 = vmatpush3.bf16.msra.mxu0 %v12504_v29  ;;  %11378 = vmatprep.subr.bf16.mxu1 %v12505_v30 }
0x1ae8   :  { %11400 = vmatprep.subr.bf16.mxu0 %v12506_v36 }
0x1aea   :  { %11379 = vmatpush3.bf16.msra.mxu1 %v12507_v31 }
0x1aeb   :  { %11401 = vmatpush3.bf16.msra.mxu0 %v12508_v16  ;;  %11380 = vmatprep.subr.bf16.mxu1 %v12509_v48 }
0x1aec   :  { %11402 = vmatprep.subr.bf16.mxu0 %v12510_v52 }
0x1aee   :  { %11381 = vmatpush3.bf16.msra.mxu1 %v12511_v56 }
0x1aef   :  { %11403 = vmatpush3.bf16.msra.mxu0 %v12512_v37  ;;  %11382 = vmatprep.subr.bf16.mxu1 %v12513_v33 }
0x1af0   :  { %11404 = vmatprep.subr.bf16.mxu0 %v12514_v4 }
0x1af2   :  { %11383 = vmatpush3.bf16.msra.mxu1 %v12515_v46 }
0x1af3   :  { %11405 = vmatpush3.bf16.msra.mxu0 %v12516_v27  ;;  %11384 = vmatprep.subr.bf16.mxu1 %v12517_v32 }
0x1af4   :  { %11406 = vmatprep.subr.bf16.mxu0 %v12518_v3 }
0x1af6   :  { %11385 = vmatpush3.bf16.msra.mxu1 %v12519_v22 }
0x1af7   :  { %11407 = vmatpush3.bf16.msra.mxu0 %v12520_v60  ;;  %11386 = vmatprep.subr.bf16.mxu1 %v12521_v49 }
0x1af8   :  { %11408 = vmatprep.subr.bf16.mxu0 %v12522_v59 }
0x1afa   :  { %11387 = vmatpush3.bf16.msra.mxu1 %v12523_v47 }
0x1afb   :  { %11409 = vmatpush3.bf16.msra.mxu0 %v12524_v13  ;;  %11933 = vmatprep.subr.bf16.mxu1 %v15748_v34 }
0x1afc   :  { %11930 = vmatprep.subr.bf16.mxu0 %v15748_v34 }
0x1afd   :  { %9028 = vmatmul.mubr.bf16.vlgmr.msra.gmra.mrb[128].mxu1 %v15475_v43 }
0x1afe   :  { %9069 = vmatmul.mubr.bf16.vlgmr.msra.gmra.mrb[128].mxu0 %v15477_v17  ;;  %11759 = vmatprep.mubr.msk.f32.mxu1 %vm12601_vm12, %v15746_v44 }
0x1aff   :  { %11740 = vmatprep.mubr.msk.f32.mxu0 %vm12601_vm12, %v15746_v44 }
0x1b70   :  { %v11256_v58 = vpop.f32.mrb[116].mxu1  ;;  %v11278_v7 = vpop.f32.mrb[116].mxu0 }
0x1b71   :  { %v11257_v63 = vpop.f32.mrb[117].mxu1  ;;  %v11279_v1 = vpop.f32.mrb[117].mxu0 }
0x1b72   :  { %v11258_v40 = vadd.f32 %v11257_v63, %v11256_v58  ;;  %v11280_v12 = vadd.f32 %v11279_v1, %v11278_v7  ;;  %v11259_v5 = vpop.f32.mrb[118].mxu1  ;;  %v11281_v19 = vpop.f32.mrb[118].mxu0 }
0x1b73   :  { %v11260_v43 = vpop.f32.mrb[119].mxu1  ;;  %v11282_v17 = vpop.f32.mrb[119].mxu0 }
0x1b74   :  { %v8784_v18 = vadd.f32 %v11258_v40, %v10609_v8  ;;  %v11261_v26 = vadd.f32 %v11260_v43, %v11259_v5  ;;  %v11283_v38 = vadd.f32 %v11282_v17, %v11281_v19 }
0x1b76   :  { %v8825_v0 = vadd.f32 %v11280_v12, %v8784_v18  ;;  %v8787_v53 = vadd.f32 %v11261_v26, %v10609_v8 }
0x1b78   :  { %v8828_v20 = vadd.f32 %v11283_v38, %v8787_v53 }
0x1b90   :  { %v11300_v45 = vpop.f32.mrb[120].mxu1  ;;  %v11322_v14 = vpop.f32.mrb[120].mxu0 }
0x1b91   :  { %v11301_v61 = vpop.f32.mrb[121].mxu1  ;;  %v11323_v11 = vpop.f32.mrb[121].mxu0 }
0x1b92   :  { %v11302_v50 = vadd.f32 %v11301_v61, %v11300_v45  ;;  %v11324_v55 = vadd.f32 %v11323_v11, %v11322_v14  ;;  %v11303_v39 = vpop.f32.mrb[122].mxu1  ;;  %v11325_v10 = vpop.f32.mrb[122].mxu0  ;;  %v9197_v61 = vld [vmem:[%s15703_s14 + $0x8] sm:$0xff]  ;;  %v9198_v11 = vld [vmem:[%s15703_s14 + $0x10] sm:$0xff] }
0x1b93   :  { %v11304_v15 = vpop.f32.mrb[123].mxu1  ;;  %v11326_v28 = vpop.f32.mrb[123].mxu0 }
0x1b94   :  { %v8866_v23 = vadd.f32 %v11302_v50, %v8825_v0  ;;  %v11305_v51 = vadd.f32 %v11304_v15, %v11303_v39  ;;  %v11327_v57 = vadd.f32 %v11326_v28, %v11325_v10  ;;  %v9200_v10 = vld [vmem:[%s15703_s14 + $0x20] sm:$0xff]  ;;  %v9201_v15 = vld [vmem:[%s15703_s14 + $0x28] sm:$0xff] }
0x1b95   :  { %v11940_v28 = vpack.c.bf16 %v9201_v15, %v9200_v10 }
0x1b96   :  { %v8907_v21 = vadd.f32 %v11324_v55, %v8866_v23  ;;  %v8869_v54 = vadd.f32 %v11305_v51, %v8828_v20  ;;  %v9199_v55 = vld [vmem:[%s15703_s14 + $0x18] sm:$0xff]  ;;  %v9202_v23 = vld [vmem:[%s15703_s14 + $0x30] sm:$0xff] }
0x1b97   :  { %v11937_v39 = vpack.c.bf16 %v9199_v55, %v9198_v11  ;;  %v9203_v51 = vld [vmem:[%s15703_s14 + $0x38] sm:$0xff] }
0x1b98   :  { %v8910_v9 = vadd.f32 %v11327_v57, %v8869_v54  ;;  %v11943_v57 = vpack.c.bf16 %v9203_v51, %v9202_v23 }
0x1bb0   :  { %v11344_v62 = vpop.f32.mrb[124].mxu1 }
0x1bb1   :  { %v11366_v42 = vpop.f32.mrb[124].mxu0  ;;  %v11345_v2 = vpop.f32.mrb[125].mxu1 }
0x1bb2   :  { %v11346_v6 = vadd.f32 %v11345_v2, %v11344_v62  ;;  %v11367_v35 = vpop.f32.mrb[125].mxu0  ;;  %v11347_v29 = vpop.f32.mrb[126].mxu1 }
0x1bb3   :  { %v11368_v30 = vadd.f32 %v11367_v35, %v11366_v42  ;;  %v11369_v36 = vpop.f32.mrb[126].mxu0  ;;  %v11348_v31 = vpop.f32.mrb[127].mxu1  ;;  %v10738_v35 = vld [vmem:[%s15701_s12 + $0x2] ss:$0 sm:$0xff] }
0x1bb4   :  { %v8948_v16 = vadd.f32 %v11346_v6, %v8907_v21  ;;  %v11349_v48 = vadd.f32 %v11348_v31, %v11347_v29  ;;  %v11370_v52 = vpop.f32.mrb[127].mxu0 }
0x1bb5   :  { %v11371_v56 = vadd.f32 %v11370_v52, %v11369_v36 }
0x1bb6   :  { %v8989_v37 = vadd.f32 %v11368_v30, %v8948_v16  ;;  %v8951_v33 = vadd.f32 %v11349_v48, %v8910_v9 }
0x1bb8   :  { %v8992_v4 = vadd.f32 %v11371_v56, %v8951_v33  ;;  %v15750_v56 = vld [vmem:[#allocation5_spill] sm:$0xff] }
0x1bd0   :  { %v11388_v46 = vpop.f32.mrb[128].mxu1 }
0x1bd1   :  { %v11410_v27 = vpop.f32.mrb[128].mxu0  ;;  %v11389_v32 = vpop.f32.mrb[129].mxu1 }
0x1bd2   :  { %v11390_v3 = vadd.f32 %v11389_v32, %v11388_v46  ;;  %v11411_v22 = vpop.f32.mrb[129].mxu0  ;;  %v11391_v60 = vpop.f32.mrb[130].mxu1  ;;  %v10742_v32 = vld [vmem:[%s15704_s15] ss:$0 sm:$0xff] }
0x1bd3   :  { %v11412_v49 = vadd.f32 %v11411_v22, %v11410_v27  ;;  %v11413_v59 = vpop.f32.mrb[130].mxu0  ;;  %v11392_v47 = vpop.f32.mrb[131].mxu1 }
0x1bd4   :  { %v9030_v13 = vadd.f32 %v11390_v3, %v8989_v37  ;;  %v11393_v58 = vadd.f32 %v11392_v47, %v11391_v60  ;;  %v11414_v7 = vpop.f32.mrb[131].mxu0  ;;  %v15751_v37 = vcvt.s32.f32 %v15750_v56 }
0x1bd5   :  { %v11415_v8 = vadd.f32 %v11414_v7, %v11413_v59 }
0x1bd6   :  { %v9071_v63 = vadd.f32 %v11412_v49, %v9030_v13  ;;  %v9033_v1 = vadd.f32 %v11393_v58, %v8992_v4  ;;  %vm9119_vm2 = vcmp.eq.f32.partialorder %v15751_v37, %v12764_v41 }
0x1bd7   :  { %v10740_v4 = vsel %vm9119_vm2, 1.0, %v15746_v44 }
0x1bd8   :  { %v9074_v40 = vadd.f32 %v11415_v8, %v9033_v1  ;;  %v9077_v12 = vadd.f32 %v9071_v63, %v15037_v24 }
0x1bda   :  { %v9079_v5 = vsel %vm296_vm11, %v9077_v12, 0.0  ;;  %v9078_v19 = vadd.f32 %v9074_v40, %v15039_v25  ;;  %v9196_v25 = vld [vmem:[%s15703_s14] sm:$0xff] }
0x1bdb   :  { %9080 = vadd.xlane.f32.xlu1 %v9079_v5  ;;  %v11934_v50 = vpack.c.bf16 %v9197_v61, %v9196_v25 }
0x1bdc   :  { %v9082_v43 = vsel %vm296_vm11, %v9078_v19, 0.0 }
0x1bdd   :  { %9083 = vadd.xlane.f32.xlu0 %v9082_v43  ;;  %11935 = vmatpush3.bf16.msra.mxu1 %v11934_v50 }
0x1bde   :  { %11936 = vmatprep.subr.bf16.mxu1 %v15748_v34 }
0x1be1   :  { %11938 = vmatpush3.bf16.msra.mxu1 %v11937_v39 }
0x1be2   :  { %11939 = vmatprep.subr.bf16.mxu1 %v15748_v34 }
0x1be5   :  { %11941 = vmatpush3.bf16.msra.mxu1 %v11940_v28 }
0x1be6   :  { %11942 = vmatprep.subr.bf16.mxu1 %v15748_v34  ;;  %v10739_v34 = vld [vmem:[%s15702_s13 + $0x2] ss:$0 sm:$0xff]  ;;  %s12603_s13 = smov [#allocation2]  }
0x1be7   :  { %s9291_s28 = sshll.u32 %s12603_s13, 4  ;;  %s9292_s28 = int_to_ptr.vmem [resolvable:$true] %s9291_s28 }
0x1be8   :  { %s12573_s29 = scalar_lea.vmem %s9292_s28, 32  ;;  %p12578_p1 = scmp.lt.s32.totalorder %s9292_s28, %s9292_s28 }
0x1be9   :  { %11944 = vmatpush3.bf16.msra.mxu1 %v11943_v57  ;;  %p12574_p0 = scmp.ne.s32.totalorder %s9292_s28, %s12573_s29  ;;  %p12579_p2 = scmp.lt.s32.totalorder %s12573_s29, %s12573_s29 }
0x1beb   :  { %p12580_p3 = por %p12579_p2, %p12578_p1 }
0x1bed   :  { %p12581_p4 = pnand %p12580_p3, %p12574_p0 }
0x1c68   :  { %v9081_v17 = vpop.xlane.xlu1 %9080 }
0x1c69   :  { %v9085_v18 = vmul.f32 0.015625, %v9081_v17 }
0x1c6a   :  { %v9084_v26 = vpop.xlane.xlu0 %9083 }
0x1c6b   :  { %v9087_v38 = vsub.f32 %v9077_v12, %v9085_v18  ;;  %v9086_v0 = vmul.f32 0.015625, %v9084_v26 }
0x1c6d   :  { %v9088_v53 = vsub.f32 %v9078_v19, %v9086_v0  ;;  %v9089_v20 = vmul.f32 %v9087_v38, %v9087_v38 }
0x1c6f   :  { %v9091_v45 = vsel %vm296_vm11, %v9089_v20, 0.0  ;;  %v9090_v14 = vmul.f32 %v9088_v53, %v9088_v53 }
0x1c70   :  { %9092 = vadd.xlane.f32.xlu1 %v9091_v45 }
0x1c71   :  { %v9094_v24 = vsel %vm296_vm11, %v9090_v14, 0.0 }
0x1c72   :  { %9095 = vadd.xlane.f32.xlu0 %v9094_v24 }
0x1cfd   :  { %v9093_v21 = vpop.xlane.xlu1 %9092 }
0x1cfe   :  { %v9097_v54 = vmul.f32 0.015625, %v9093_v21 }
0x1cff   :  { %v9096_v9 = vpop.xlane.xlu0 %9095 }
0x1d00   :  { %v9099_v62 = vadd.f32 1e-05, %v9097_v54  ;;  %v9098_v42 = vmul.f32 0.015625, %v9096_v9 }
0x1d02   :  { %12569 = vrsqrt.f32 %v9099_v62  ;;  %v9100_v2 = vadd.f32 1e-05, %v9098_v42 }
0x1d04   :  { %12571 = vrsqrt.f32 %v9100_v2 }
0x1d0c   :  { %v12570_v6 = vpop.eup %12569 }
0x1d0d   :  { %v9103_v29 = vmul.f32 %v12570_v6, %v9087_v38 }
0x1d0e   :  { %v12572_v30 = vpop.eup %12571 }
0x1d0f   :  { %v9104_v36 = vmul.f32 %v12572_v30, %v9088_v53  ;;  %v9110_v31 = vmul.f32 %v10738_v35, %v9103_v29 }
0x1d11   :  { %v9111_v16 = vmul.f32 %v10738_v35, %v9104_v36  ;;  %v9117_v48 = vadd.f32 %v10739_v34, %v9110_v31 }
0x1d13   :  { %v9118_v52 = vadd.f32 %v10739_v34, %v9111_v16 }
0x1d15   :  { %v11931_v33 = vpack.c.bf16 %v9118_v52, %v9117_v48 }
0x1d17   :  { %11932 = vmatpush3.bf16.msra.mxu0 %v11931_v33 }
0x1d1a   :  { %11741 = vmatmul.mubr.msk.f32.vlgmr.msra.gmra.mrb[90].mxu0 %vm9122_vm3, %v10740_v4 }
0x1ded   :  { %v9192_v46 = vpop.f32.mrb[90].mxu0 }
0x1dee   :  { %v11742_v27 = vpop.f32.mrb[91].mxu0  ;;  %11760 = vmatmul.mubr.msk.f32.vlgmr.msra.gmra.mrb[94].mxu1 %vm296_vm11, %v9192_v46 }
0x1ec1   :  { %v9280_v3 = vpop.f32.mrb[94].mxu1 }
0x1ec2   :  { %v9281_v22 = vadd.f32 %v10742_v32, %v9280_v3  ;;  %v11761_v60 = vpop.f32.mrb[95].mxu1 }
0x1ec4   :  { %9284 = vst [vmem:[#allocation2] sm:$0x3] %v9281_v22 }
0x1ec5   :  { %12584 = shalt.err (!%p12581_p4)
}
0x1ec6   :  { %s12585_s10 = scalar_lea.hbm %s15705_s16, 32 }
0x1ec7   :  { %p12586_p5 = scmp.ne.s32.totalorder %s15705_s16, %s12585_s10  ;;  %p12589_p6 = scmp.lt.u32.totalorder %s12585_s10, %s15705_s16 }
0x1ec9   :  { %p12591_p7 = pnand %p12589_p6, %p12586_p5 }
0x1ecb   :  { %12594 = shalt.err (!%p12591_p7)
}
0x1ecc   :  { %9294 = dma.vmem_to_hbm [thread:$0]  %s9292_s28, 32, %s15705_s16, [#allocation3]  }
0x1ecd   :  { %12595 = dma.done.wait [#allocation3], 32  }
0x1ece   :  { %12596 = vsyncadd [#allocation3], 4294967264 }
0x1ecf   :  { %9298 = vsyncpa [#allocation3], 1 }

</bundles_post_ra>
